<compile_context>
chip_gen: v6e
topology: v6e:2x2x1
jax: 0.10.0
libtpu: 0.0.40
codegen_flags: <defaults>
</compile_context>

<pallas_src>
import functools

import jax
import jax.numpy as jnp
from jax.experimental import pallas as pl
from jax.experimental.pallas import tpu as pltpu

# ---------------- config (small, consistent with the module) ----------------
K = 100                        # number of calibration bins (module default)
B = 512                        # batch
NUM_SPARSE = 4                 # number of sparse feature columns
EMB_DIM = 8                    # embedding dim per sparse feature
IN_DIM = NUM_SPARSE * EMB_DIM  # compute_input_dim(feature_columns) == 32
HIDDEN = [32, 16]              # hidden_layers
VOCAB = 50                     # vocab per sparse feature
LANE = 128
BIG = 1e30                     # finite "infinity" for bin edges (avoids 0*inf = NaN)


def _round_up(x, m):
    return ((x + m - 1) // m) * m


def _default_block_b(bsz, max_tile=1024):
    """At most 2 grid steps at small/medium batch (grid=2 feeds both v7x TCs),
    capped tile size at large batch; always a multiple of 8 sublanes."""
    bp8 = _round_up(max(bsz, 1), 8)
    if bp8 <= 2 * max_tile:
        return max(8, _round_up(bp8, 16) // 2)
    return max_tile


def logit(x):
    return jnp.log(x) - jnp.log1p(-x)


# ---------------------------- Pallas kernel ---------------------------------
def neural_calib_kernel(ids_ref, y_ref, bounds_ref, calib_ref, emb_ref,
                        w1_ref, b1_ref, w2_ref, b2_ref, w3_ref, out_ref):
    # ---- piecewise-linear calibration --------------------------------------
    y = y_ref[...]                          # (TB, 1) f32
    low = bounds_ref[0]                     # SMEM scalars: a[0], a[K-1]
    high = bounds_ref[1]
    yc = jnp.clip(y, low, high)             # torch.clamp(y, logit(1/(1+K)), logit(K/(1+K)))

    a_lo = calib_ref[0:1, :]                # (1, KP) bin lower edges (pad bins = BIG)
    a_hi = calib_ref[1:2, :]                # (1, KP) bin upper edges (last / pad = BIG)
    slope = calib_ref[2:3, :]               # (1, KP) (p[k+1]-p[k])/(a[k+1]-a[k]+1e-4); slope[K-1]=0
    p_b3 = calib_ref[3:4, :]                # (1, KP) p[k] + b3 (final bias folded in once)

    # Exactly one bin per row: a[k] <= yc < a[k+1]  (== searchsorted(right)-1 + kp1 clamp).
    sel = jnp.logical_and(a_lo <= yc, yc < a_hi)                        # (TB, KP) bool
    term = p_b3 + slope * (yc - a_lo)       # same association as reference b_k + (yc-a_k)*slope
    interp = jnp.sum(jnp.where(sel, term, 0.0), axis=1, keepdims=True)  # (TB, 1)

    # ---- fused embedding gather: one-hot @ block-diagonal table (MXU) ------
    ids = ids_ref[...]                      # (TB, NS) int32, pre-offset by i*VOCAB
    tb = ids.shape[0]
    rows = emb_ref.shape[0]
    lane_id = jax.lax.broadcasted_iota(jnp.int32, (tb, rows), 1)
    onehot = jnp.zeros((tb, rows), jnp.float32)
    for i in range(ids.shape[1]):           # static loop, NUM_SPARSE = 4
        onehot = onehot + (lane_id == ids[:, i:i + 1]).astype(jnp.float32)
    x = jnp.dot(onehot.astype(emb_ref.dtype), emb_ref[...],
                preferred_element_type=jnp.float32)                    # (TB, D) f32

    # ---- MLP residual: Linear -> ReLU -> Linear -> ReLU -> (h . w3) --------
    h = jnp.dot(x.astype(w1_ref.dtype), w1_ref[...],
                preferred_element_type=jnp.float32) + b1_ref[...]
    h = jnp.maximum(h, 0.0)
    h = jnp.dot(h.astype(w2_ref.dtype), w2_ref[...],
                preferred_element_type=jnp.float32) + b2_ref[...]
    h = jnp.maximum(h, 0.0)
    # N=1 projection: keep it off the MXU — VPU broadcast-multiply + lane reduction.
    net = jnp.sum(h * w3_ref[...], axis=1, keepdims=True)

    out_ref[...] = interp + net


# ------------------------------ wrapper --------------------------------------
def neural_calib_forward(x_ids, y, emb_tables, p, w1, b1, w2, b2, w3, b3,
                         *, block_b=None, use_bf16=False):
    bsz = x_ids.shape[0]
    num_sparse = len(emb_tables)
    vocab, emb_dim = emb_tables[0].shape
    d = num_sparse * emb_dim
    k_bins = p.shape[1]
    h1 = w1.shape[1]
    h2 = w2.shape[1]

    # Calibration knots (recomputed each forward, like the module).
    grid_vals = (1.0 + jnp.arange(k_bins, dtype=jnp.float32)) / (1.0 + k_bins)
    a = logit(grid_vals).reshape(1, k_bins)

    # Per-bin slope (kp1 clamped to the last bin => slope[K-1] == 0, so yc == a[K-1] is exact).
    a_next = jnp.concatenate([a[:, 1:], a[:, -1:]], axis=1)
    p_next = jnp.concatenate([p[:, 1:], p[:, -1:]], axis=1)
    slope = (p_next - p) / (a_next - a + 0.0001)
    a_hi = jnp.concatenate([a[:, 1:], jnp.full((1, 1), BIG, jnp.float32)], axis=1)
    p_b3 = p + b3[0, 0]                      # fold final bias in once (one bin selected per row)

    # Pack a_lo / a_hi / slope / (p+b3) into one lane-dense (4, 128) block.
    kp = _round_up(k_bins, LANE)
    pad = kp - k_bins

    def pad_row(r, val):
        return jnp.concatenate([r, jnp.full((1, pad), val, jnp.float32)], axis=1) if pad else r

    calib = jnp.concatenate([pad_row(a, BIG), pad_row(a_hi, BIG),
                             pad_row(slope, 0.0), pad_row(p_b3, 0.0)], axis=0)   # (4, kp)
    bounds = jnp.stack([a[0, 0], a[0, k_bins - 1]])          # SMEM scalars (2,)

    # Block-diagonal embedding matrix for the fused in-kernel gather.
    rows = _round_up(num_sparse * vocab, LANE)               # 200 -> 256
    emb_block = jnp.zeros((rows, d), jnp.float32)
    for i, tbl in enumerate(emb_tables):
        emb_block = emb_block.at[i * vocab:(i + 1) * vocab,
                                 i * emb_dim:(i + 1) * emb_dim].set(tbl)
    ids_off = (x_ids.astype(jnp.int32)
               + (jnp.arange(num_sparse, dtype=jnp.int32) * vocab)[None, :])

    # bf16 fast path: cast the big operands HBM-side (halves the dominant streams),
    # keep f32 accumulation inside the kernel via preferred_element_type.
    if use_bf16:
        emb_block = emb_block.astype(jnp.bfloat16)
        w1 = w1.astype(jnp.bfloat16)
        w2 = w2.astype(jnp.bfloat16)
    w3_row = w3.reshape(1, h2)               # final projection = VPU reduce, not MXU matmul

    # Batch tiling: few big tiles (grid of 2 on small batches feeds both v7x TCs).
    if block_b is None:
        block_b = _default_block_b(bsz)
    bp = _round_up(bsz, block_b)
    if bp != bsz:
        ids_off = jnp.pad(ids_off, ((0, bp - bsz), (0, 0)))
        y = jnp.pad(y, ((0, bp - bsz), (0, 0)))
    grid = (bp // block_b,)

    rep = lambda i: (0, 0)                   # replicated parameter blocks
    row = lambda i: (i, 0)                   # batch-tiled blocks

    # Advisory cost estimate so XLA can overlap surrounding glue.
    flops = 2 * bp * (rows * d + d * h1 + h1 * h2 + h2) + 10 * bp * kp
    itemsize = 2 if use_bf16 else 4
    bytes_accessed = (4 * bp * (num_sparse + 2)
                      + itemsize * (rows * d + d * h1 + h1 * h2)
                      + 4 * (4 * kp + h1 + 2 * h2 + 2))

    out = pl.pallas_call(
        neural_calib_kernel,
        out_shape=jax.ShapeDtypeStruct((bp, 1), jnp.float32),
        grid=grid,
        in_specs=[
            pl.BlockSpec((block_b, num_sparse), row),              # ids (pre-offset, int32)
            pl.BlockSpec((block_b, 1), row),                       # y
            pl.BlockSpec(memory_space=pltpu.MemorySpace.SMEM),     # clip bounds (2,)
            pl.BlockSpec((4, kp), rep),                            # packed calibration params
            pl.BlockSpec((rows, d), rep),                          # block-diagonal embeddings
            pl.BlockSpec((d, h1), rep),                            # W1
            pl.BlockSpec((1, h1), rep),                            # b1
            pl.BlockSpec((h1, h2), rep),                           # W2
            pl.BlockSpec((1, h2), rep),                            # b2
            pl.BlockSpec((1, h2), rep),                            # w3 row
        ],
        out_specs=pl.BlockSpec((block_b, 1), row),
        compiler_params=pltpu.CompilerParams(
            dimension_semantics=("parallel",)),
        cost_estimate=pl.CostEstimate(
            flops=flops, transcendentals=0, bytes_accessed=bytes_accessed),
    )(ids_off, y, bounds, calib, emb_block, w1, b1, w2, b2, w3_row)

    return out[:bsz]


# ------------------------------ glue / init ----------------------------------
def xavier_normal(key, fan_in, fan_out, gain):
    std = gain * jnp.sqrt(2.0 / (fan_in + fan_out))
    return std * jax.random.normal(key, (fan_in, fan_out), dtype=jnp.float32)


def reference_forward(x_ids, y, emb_tables, p, w1, b1, w2, b2, w3, b3):
    """Pure-JAX reference mirroring the PyTorch forward (gather + searchsorted)."""
    k_bins = p.shape[1]
    grid_vals = (1.0 + jnp.arange(k_bins, dtype=jnp.float32)) / (1.0 + k_bins)
    a = logit(grid_vals).reshape(1, k_bins)
    embs = [emb_tables[i][x_ids[:, i]] for i in range(len(emb_tables))]
    input_all = jnp.concatenate(embs, axis=1)
    low, high = a[0, 0], a[0, k_bins - 1]
    yc = jnp.clip(y, low, high)
    k = jnp.searchsorted(a[0], yc[:, 0], side="right") - 1
    kp1 = jnp.minimum(k + 1, k_bins - 1)
    a_k = a[0][k][:, None]
    a_kp1 = a[0][kp1][:, None]
    b_k = p[0][k][:, None]
    b_kp1 = p[0][kp1][:, None]
    interp = b_k + (yc - a_k) * (b_kp1 - b_k) / (a_kp1 - a_k + 0.0001)
    hp = jax.lax.Precision.HIGHEST
    h = jnp.maximum(jnp.dot(input_all, w1, precision=hp) + b1, 0.0)
    h = jnp.maximum(jnp.dot(h, w2, precision=hp) + b2, 0.0)
    net = jnp.dot(h, w3, precision=hp) + b3
    return interp + net


if __name__ == "__main__":
    key = jax.random.PRNGKey(0)
    keys = jax.random.split(key, 12)

    # sparse feature ids and labels (y is in logit space)
    x_ids = jax.random.randint(keys[0], (B, NUM_SPARSE), 0, VOCAB, dtype=jnp.int32)
    y = jax.random.normal(keys[1], (B, 1), dtype=jnp.float32) * 3.0

    # embedding_dict: one (VOCAB, EMB_DIM) table per sparse feature
    emb_tables = [
        0.05 * jax.random.normal(keys[2 + i], (VOCAB, EMB_DIM), dtype=jnp.float32)
        for i in range(NUM_SPARSE)
    ]

    # calibration knots: a = logit((1+arange(K))/(1+K)); p is the learnable parameter
    grid_vals = (1.0 + jnp.arange(K, dtype=jnp.float32)) / (1.0 + K)
    a0 = logit(grid_vals).reshape(1, K)
    p = a0 + 0.02 * jax.random.normal(keys[6], (1, K), dtype=jnp.float32)

    # MLP params: xavier_normal_(gain=calculate_gain('relu')=sqrt(2)), bias 0
    gain = jnp.sqrt(2.0)
    w1 = xavier_normal(keys[7], IN_DIM, HIDDEN[0], gain)
    b1 = jnp.zeros((1, HIDDEN[0]), jnp.float32)
    w2 = xavier_normal(keys[8], HIDDEN[0], HIDDEN[1], gain)
    b2 = jnp.zeros((1, HIDDEN[1]), jnp.float32)
    w3 = xavier_normal(keys[9], HIDDEN[1], 1, gain)
    b3 = jnp.zeros((1, 1), jnp.float32)

    ref = reference_forward(x_ids, y, emb_tables, p, w1, b1, w2, b2, w3, b3)

    # f32 path (tolerance allows MXU multi-pass f32 matmul rounding; typically ~1e-6).
    out = neural_calib_forward(x_ids, y, emb_tables, p, w1, b1, w2, b2, w3, b3,
                               use_bf16=False)
    out = jax.block_until_ready(out)
    assert out.shape == (B, 1)
    err = float(jnp.max(jnp.abs(out - ref)))
    assert err < 2e-3, f"f32 path max abs err {err}"

    # bf16 fast path (embedding block / W1 / W2 cast HBM-side, f32 accumulation).
    out_bf16 = neural_calib_forward(x_ids, y, emb_tables, p, w1, b1, w2, b2, w3, b3,
                                    use_bf16=True)
    out_bf16 = jax.block_until_ready(out_bf16)
    err_bf16 = float(jnp.max(jnp.abs(out_bf16 - ref)))
    assert err_bf16 < 3e-2, f"bf16 path max abs err {err_bf16}"

    print("KERNEL_OK")
</pallas_src>

<mosaic_0001>
module attributes {stable_mosaic.version = 11 : i64} {
  func.func @neural_calib_kernel(%arg0: i32, %arg1: memref<256x4xi32, #tpu.memory_space<vmem>>, %arg2: memref<256x1xf32, #tpu.memory_space<vmem>>, %arg3: memref<2xf32, #tpu.memory_space<smem>>, %arg4: memref<4x128xf32, #tpu.memory_space<vmem>>, %arg5: memref<256x32xf32, #tpu.memory_space<vmem>>, %arg6: memref<32x32xf32, #tpu.memory_space<vmem>>, %arg7: memref<1x32xf32, #tpu.memory_space<vmem>>, %arg8: memref<32x16xf32, #tpu.memory_space<vmem>>, %arg9: memref<1x16xf32, #tpu.memory_space<vmem>>, %arg10: memref<1x16xf32, #tpu.memory_space<vmem>>, %arg11: memref<256x1xf32, #tpu.memory_space<vmem>>) attributes {dimension_semantics = [#tpu.dimension_semantics<parallel>], iteration_bounds = array<i64: 2>, scalar_prefetch = 0 : i64, scratch_operands = 0 : i64, tpu.core_type = #tpu.core_type<tc>, window_params = [{transform_indices = @transform_0, window_bounds = array<i64: 256, 4>}, {transform_indices = @transform_1, window_bounds = array<i64: 256, 1>}, {transform_indices = @transform_2, window_bounds = array<i64: 2>}, {pipeline_mode = #tpu.pipeline_mode<synchronous>, transform_indices = @transform_3, window_bounds = array<i64: 4, 128>}, {pipeline_mode = #tpu.pipeline_mode<synchronous>, transform_indices = @transform_4, window_bounds = array<i64: 256, 32>}, {pipeline_mode = #tpu.pipeline_mode<synchronous>, transform_indices = @transform_5, window_bounds = array<i64: 32, 32>}, {pipeline_mode = #tpu.pipeline_mode<synchronous>, transform_indices = @transform_6, window_bounds = array<i64: 1, 32>}, {pipeline_mode = #tpu.pipeline_mode<synchronous>, transform_indices = @transform_7, window_bounds = array<i64: 32, 16>}, {pipeline_mode = #tpu.pipeline_mode<synchronous>, transform_indices = @transform_8, window_bounds = array<i64: 1, 16>}, {pipeline_mode = #tpu.pipeline_mode<synchronous>, transform_indices = @transform_9, window_bounds = array<i64: 1, 16>}, {transform_indices = @transform_10, window_bounds = array<i64: 256, 1>}]} {
    %c0 = arith.constant 0 : index
    %c0_0 = arith.constant 0 : index
    %0 = vector.load %arg2[%c0, %c0_0] : memref<256x1xf32, #tpu.memory_space<vmem>>, vector<256x1xf32>
    %c0_1 = arith.constant 0 : index
    %1 = memref.load %arg3[%c0_1] : memref<2xf32, #tpu.memory_space<smem>>
    %c1 = arith.constant 1 : index
    %2 = memref.load %arg3[%c1] : memref<2xf32, #tpu.memory_space<smem>>
    %3 = vector.broadcast %1 : f32 to vector<256x1xf32>
    %4 = arith.maximumf %3, %0 : vector<256x1xf32>
    %5 = vector.broadcast %2 : f32 to vector<256x1xf32>
    %6 = arith.minimumf %5, %4 : vector<256x1xf32>
    %c0_2 = arith.constant 0 : index
    %c0_3 = arith.constant 0 : index
    %7 = vector.load %arg4[%c0_2, %c0_3] : memref<4x128xf32, #tpu.memory_space<vmem>>, vector<1x128xf32>
    %c1_4 = arith.constant 1 : index
    %c0_5 = arith.constant 0 : index
    %8 = vector.load %arg4[%c1_4, %c0_5] : memref<4x128xf32, #tpu.memory_space<vmem>>, vector<1x128xf32>
    %c2 = arith.constant 2 : index
    %c0_6 = arith.constant 0 : index
    %9 = vector.load %arg4[%c2, %c0_6] : memref<4x128xf32, #tpu.memory_space<vmem>>, vector<1x128xf32>
    %c3 = arith.constant 3 : index
    %c0_7 = arith.constant 0 : index
    %10 = vector.load %arg4[%c3, %c0_7] : memref<4x128xf32, #tpu.memory_space<vmem>>, vector<1x128xf32>
    %11 = vector.broadcast %7 : vector<1x128xf32> to vector<256x128xf32>
    %12 = vector.broadcast %6 : vector<256x1xf32> to vector<256x128xf32>
    %13 = arith.cmpf ole, %11, %12 : vector<256x128xf32>
    %14 = vector.broadcast %6 : vector<256x1xf32> to vector<256x128xf32>
    %15 = vector.broadcast %8 : vector<1x128xf32> to vector<256x128xf32>
    %16 = arith.cmpf olt, %14, %15 : vector<256x128xf32>
    %17 = arith.andi %13, %16 : vector<256x128xi1>
    %18 = vector.broadcast %6 : vector<256x1xf32> to vector<256x128xf32>
    %19 = vector.broadcast %7 : vector<1x128xf32> to vector<256x128xf32>
    %20 = arith.subf %18, %19 : vector<256x128xf32>
    %21 = vector.broadcast %9 : vector<1x128xf32> to vector<256x128xf32>
    %22 = arith.mulf %21, %20 : vector<256x128xf32>
    %23 = vector.broadcast %10 : vector<1x128xf32> to vector<256x128xf32>
    %24 = arith.addf %23, %22 : vector<256x128xf32>
    %cst = arith.constant 0.000000e+00 : f32
    %25 = vector.broadcast %cst : f32 to vector<256x128xf32>
    %26 = arith.select %17, %24, %25 : vector<256x128xi1>, vector<256x128xf32>
    %cst_8 = arith.constant dense<0.000000e+00> : vector<256xf32>
    %27 = vector.multi_reduction <add>, %26, %cst_8 [1] : vector<256x128xf32> to vector<256xf32>
    %28 = vector.shape_cast %27 : vector<256xf32> to vector<256x1xf32>
    %c0_9 = arith.constant 0 : index
    %c0_10 = arith.constant 0 : index
    %29 = vector.load %arg1[%c0_9, %c0_10] : memref<256x4xi32, #tpu.memory_space<vmem>>, vector<256x4xi32>
    %30 = tpu.iota {dimensions = array<i32: 1>} : vector<256x256xi32>
    %cst_11 = arith.constant 0.000000e+00 : f32
    %31 = vector.broadcast %cst_11 : f32 to vector<256x256xf32>
    %32 = vector.extract_strided_slice %29 {offsets = [0, 0], sizes = [256, 1], strides = [1, 1]} : vector<256x4xi32> to vector<256x1xi32>
    %33 = vector.broadcast %32 : vector<256x1xi32> to vector<256x256xi32>
    %34 = arith.cmpi eq, %30, %33 : vector<256x256xi32>
    %35 = arith.extui %34 : vector<256x256xi1> to vector<256x256xi32>
    %36 = arith.sitofp %35 : vector<256x256xi32> to vector<256x256xf32>
    %37 = arith.addf %31, %36 : vector<256x256xf32>
    %38 = vector.extract_strided_slice %29 {offsets = [0, 1], sizes = [256, 1], strides = [1, 1]} : vector<256x4xi32> to vector<256x1xi32>
    %39 = vector.broadcast %38 : vector<256x1xi32> to vector<256x256xi32>
    %40 = arith.cmpi eq, %30, %39 : vector<256x256xi32>
    %41 = arith.extui %40 : vector<256x256xi1> to vector<256x256xi32>
    %42 = arith.sitofp %41 : vector<256x256xi32> to vector<256x256xf32>
    %43 = arith.addf %37, %42 : vector<256x256xf32>
    %44 = vector.extract_strided_slice %29 {offsets = [0, 2], sizes = [256, 1], strides = [1, 1]} : vector<256x4xi32> to vector<256x1xi32>
    %45 = vector.broadcast %44 : vector<256x1xi32> to vector<256x256xi32>
    %46 = arith.cmpi eq, %30, %45 : vector<256x256xi32>
    %47 = arith.extui %46 : vector<256x256xi1> to vector<256x256xi32>
    %48 = arith.sitofp %47 : vector<256x256xi32> to vector<256x256xf32>
    %49 = arith.addf %43, %48 : vector<256x256xf32>
    %50 = vector.extract_strided_slice %29 {offsets = [0, 3], sizes = [256, 1], strides = [1, 1]} : vector<256x4xi32> to vector<256x1xi32>
    %51 = vector.broadcast %50 : vector<256x1xi32> to vector<256x256xi32>
    %52 = arith.cmpi eq, %30, %51 : vector<256x256xi32>
    %53 = arith.extui %52 : vector<256x256xi1> to vector<256x256xi32>
    %54 = arith.sitofp %53 : vector<256x256xi32> to vector<256x256xf32>
    %55 = arith.addf %49, %54 : vector<256x256xf32>
    %c0_12 = arith.constant 0 : index
    %c0_13 = arith.constant 0 : index
    %56 = vector.load %arg5[%c0_12, %c0_13] : memref<256x32xf32, #tpu.memory_space<vmem>>, vector<256x32xf32>
    %cst_14 = arith.constant dense<0.000000e+00> : vector<256x32xf32>
    %57 = tpu.matmul %55, %56, %cst_14 {dimension_numbers = #tpu.dot_dimension_numbers<[1], [0], [0], [1], [0, 0, 1, 1], [], []>} : vector<256x256xf32>, vector<256x32xf32>, vector<256x32xf32> -> vector<256x32xf32>
    %c0_15 = arith.constant 0 : index
    %c0_16 = arith.constant 0 : index
    %58 = vector.load %arg6[%c0_15, %c0_16] : memref<32x32xf32, #tpu.memory_space<vmem>>, vector<32x32xf32>
    %cst_17 = arith.constant dense<0.000000e+00> : vector<256x32xf32>
    %59 = tpu.matmul %57, %58, %cst_17 {dimension_numbers = #tpu.dot_dimension_numbers<[1], [0], [0], [1], [0, 0, 1, 1], [], []>} : vector<256x32xf32>, vector<32x32xf32>, vector<256x32xf32> -> vector<256x32xf32>
    %c0_18 = arith.constant 0 : index
    %c0_19 = arith.constant 0 : index
    %60 = vector.load %arg7[%c0_18, %c0_19] : memref<1x32xf32, #tpu.memory_space<vmem>>, vector<1x32xf32>
    %61 = vector.broadcast %60 : vector<1x32xf32> to vector<256x32xf32>
    %62 = arith.addf %59, %61 : vector<256x32xf32>
    %cst_20 = arith.constant 0.000000e+00 : f32
    %63 = vector.broadcast %cst_20 : f32 to vector<256x32xf32>
    %64 = arith.maximumf %62, %63 : vector<256x32xf32>
    %c0_21 = arith.constant 0 : index
    %c0_22 = arith.constant 0 : index
    %65 = vector.load %arg8[%c0_21, %c0_22] : memref<32x16xf32, #tpu.memory_space<vmem>>, vector<32x16xf32>
    %cst_23 = arith.constant dense<0.000000e+00> : vector<256x16xf32>
    %66 = tpu.matmul %64, %65, %cst_23 {dimension_numbers = #tpu.dot_dimension_numbers<[1], [0], [0], [1], [0, 0, 1, 1], [], []>} : vector<256x32xf32>, vector<32x16xf32>, vector<256x16xf32> -> vector<256x16xf32>
    %c0_24 = arith.constant 0 : index
    %c0_25 = arith.constant 0 : index
    %67 = vector.load %arg9[%c0_24, %c0_25] : memref<1x16xf32, #tpu.memory_space<vmem>>, vector<1x16xf32>
    %68 = vector.broadcast %67 : vector<1x16xf32> to vector<256x16xf32>
    %69 = arith.addf %66, %68 : vector<256x16xf32>
    %cst_26 = arith.constant 0.000000e+00 : f32
    %70 = vector.broadcast %cst_26 : f32 to vector<256x16xf32>
    %71 = arith.maximumf %69, %70 : vector<256x16xf32>
    %c0_27 = arith.constant 0 : index
    %c0_28 = arith.constant 0 : index
    %72 = vector.load %arg10[%c0_27, %c0_28] : memref<1x16xf32, #tpu.memory_space<vmem>>, vector<1x16xf32>
    %73 = vector.broadcast %72 : vector<1x16xf32> to vector<256x16xf32>
    %74 = arith.mulf %71, %73 : vector<256x16xf32>
    %cst_29 = arith.constant dense<0.000000e+00> : vector<256xf32>
    %75 = vector.multi_reduction <add>, %74, %cst_29 [1] : vector<256x16xf32> to vector<256xf32>
    %76 = vector.shape_cast %75 : vector<256xf32> to vector<256x1xf32>
    %77 = arith.addf %28, %76 : vector<256x1xf32>
    %c0_30 = arith.constant 0 : index
    %c0_31 = arith.constant 0 : index
    %78 = vector.load %arg11[%c0_30, %c0_31] : memref<256x1xf32, #tpu.memory_space<vmem>>, vector<256x1xf32>
    tpu.vector_store %arg11[%c0_30, %c0_31], %77 {strides = array<i32>} : memref<256x1xf32, #tpu.memory_space<vmem>>, vector<256x1xf32>,
    return
  }
  func.func @transform_0(%arg0: i32) -> (i32, i32) {
    %c0_i32 = arith.constant 0 : i32
    %c0_i32_0 = arith.constant 0 : i32
    return %arg0, %c0_i32 : i32, i32
  }
  func.func @transform_1(%arg0: i32) -> (i32, i32) {
    %c0_i32 = arith.constant 0 : i32
    %c0_i32_0 = arith.constant 0 : i32
    return %arg0, %c0_i32 : i32, i32
  }
  func.func @transform_2(%arg0: i32) -> i32 {
    %c0_i32 = arith.constant 0 : i32
    %c0_i32_0 = arith.constant 0 : i32
    return %c0_i32 : i32
  }
  func.func @transform_3(%arg0: i32) -> (i32, i32) {
    %c0_i32 = arith.constant 0 : i32
    %c0_i32_0 = arith.constant 0 : i32
    %c0_i32_1 = arith.constant 0 : i32
    return %c0_i32, %c0_i32_0 : i32, i32
  }
  func.func @transform_4(%arg0: i32) -> (i32, i32) {
    %c0_i32 = arith.constant 0 : i32
    %c0_i32_0 = arith.constant 0 : i32
    %c0_i32_1 = arith.constant 0 : i32
    return %c0_i32, %c0_i32_0 : i32, i32
  }
  func.func @transform_5(%arg0: i32) -> (i32, i32) {
    %c0_i32 = arith.constant 0 : i32
    %c0_i32_0 = arith.constant 0 : i32
    %c0_i32_1 = arith.constant 0 : i32
    return %c0_i32, %c0_i32_0 : i32, i32
  }
  func.func @transform_6(%arg0: i32) -> (i32, i32) {
    %c0_i32 = arith.constant 0 : i32
    %c0_i32_0 = arith.constant 0 : i32
    %c0_i32_1 = arith.constant 0 : i32
    return %c0_i32, %c0_i32_0 : i32, i32
  }
  func.func @transform_7(%arg0: i32) -> (i32, i32) {
    %c0_i32 = arith.constant 0 : i32
    %c0_i32_0 = arith.constant 0 : i32
    %c0_i32_1 = arith.constant 0 : i32
    return %c0_i32, %c0_i32_0 : i32, i32
  }
  func.func @transform_8(%arg0: i32) -> (i32, i32) {
    %c0_i32 = arith.constant 0 : i32
    %c0_i32_0 = arith.constant 0 : i32
    %c0_i32_1 = arith.constant 0 : i32
    return %c0_i32, %c0_i32_0 : i32, i32
  }
  func.func @transform_9(%arg0: i32) -> (i32, i32) {
    %c0_i32 = arith.constant 0 : i32
    %c0_i32_0 = arith.constant 0 : i32
    %c0_i32_1 = arith.constant 0 : i32
    return %c0_i32, %c0_i32_0 : i32, i32
  }
  func.func @transform_10(%arg0: i32) -> (i32, i32) {
    %c0_i32 = arith.constant 0 : i32
    %c0_i32_0 = arith.constant 0 : i32
    return %arg0, %c0_i32 : i32, i32
  }
}

</mosaic_0001>

<bundles_post_ra>
// kernel: tpu_custom_call.1
= control target key start
LH: loop header
LB: loop body
LE: loop exit
PB: predicated region body
PF: predicated region fallthrough
CT: control target
= control target key end

     0   :  { %15 = vsyncpa [#allocation3], 0  ;;  %s4417_s13 = smov 0   ;;  %s6592_s0 = inlined_call_operand.vmem [shape: s32[512,4], index: 0, kind: input, shape index: {}]   ;;  %s6593_s1 = inlined_call_operand.vmem [shape: f32[512,1], index: 1, kind: input, shape index: {}]   ;;  %s6594_s2 = inlined_call_operand.vmem [shape: f32[2], index: 2, kind: input, shape index: {}]   ;;  %s6595_s3 = inlined_call_operand.vmem [shape: f32[4,128], index: 3, kind: input, shape index: {}]   ;;  %s6596_s4 = inlined_call_operand.vmem [shape: f32[256,32], index: 4, kind: input, shape index: {}]   ;;  %s6597_s5 = inlined_call_operand.vmem [shape: f32[32,32], index: 5, kind: input, shape index: {}]   ;;  %s6598_s6 = inlined_call_operand.vmem [shape: f32[1,32], index: 6, kind: input, shape index: {}]   ;;  %s6599_s7 = inlined_call_operand.vmem [shape: f32[32,16], index: 7, kind: input, shape index: {}]   ;;  %s6600_s8 = inlined_call_operand.vmem [shape: f32[1,16], index: 8, kind: input, shape index: {}]   ;;  %s6601_s9 = inlined_call_operand.vmem [shape: f32[1,16], index: 9, kind: input, shape index: {}]   ;;  %s6602_s10 = inlined_call_operand.vmem [shape: f32[512,1], index: 10, kind: output, shape index: {}]  }
   0x1 LB: > { %s3677_s14 = sadd.s32 4294967295, %s4354_s13   ;;  %p3679_p0 = scmp.ge.s32.totalorder %s4354_s13, 1  ;;  %s4354_s13 = sphi %s4417_s13, %s21_s13  }
   0x2   : > { %p272_p1 = scmp.lt.s32.totalorder %s4354_s13, 3  ;;  %s285_s17 = sshll.u32 %s6594_s2, 4  ;;  %s286_s17 = int_to_ptr.vmem [resolvable:$true] %s285_s17 }
   0x3   : > { %p4432_p3 = scmp.eq.s32.totalorder %s3677_s14, 0  ;;  %s4329_s20 = scalar_lea.vmem %s286_s17, 16 }
   0x4   : > { %p4428_p2 = pnand %p3679_p0, %p272_p1  ;;  %p4330_p6 = scmp.ne.s32.totalorder %s286_s17, %s4329_s20 }
   0x5   : > { %p4337_p10 = scmp.lt.s32.totalorder %s286_s17, %s286_s17  ;;  %p4338_p11 = scmp.lt.s32.totalorder %s4329_s20, %s4329_s20 }
   0x6   : > { %p4208_p4 = pneg %p4428_p2 }
   0x7   : > { %p4339_p12 = por %p4338_p11, %p4337_p10 }
   0x8   : > { %p4209_p5 = pnand %p4432_p3, %p4208_p4 }
   0xa   : > { %p4331_p7 = pneg %p4209_p5 }
   0xc   : > { %p4332_p8 = pnand %p4331_p7, %p4330_p6 }
   0xe   : > { %p4333_p9 = pneg %p4332_p8 }
  0x10   : > { %p4340_p13 = pnand %p4339_p12, %p4333_p9 }
  0x12   : > { %4343 = shalt.err (!%p4340_p13)
}
  0x13   : > { %s4356_s21 = smov [#allocation2]   ;;  %337 = sbr.rel (%p4428_p2) target bundleno = 1319 (0x527), region = 60 }
  0x14   : > { %4211 = dma.vmem_to_smem (!%p4209_p5), %s286_s17, 16, %s4356_s21, [#allocation3]  }
  0x18   : > { %4349 = dma.done.wait (%p4432_p3), [#allocation3], 16  }
  0x19   : > { %4351 = vsyncadd (%p4432_p3), [#allocation3], 4294967280 }
  0x1a   : > { %343 = sfence }
  0x1b   : > { %s3684_s22 = sshll.u32 %s3677_s14, 5  ;;  %v4357_v0 = vmov 2   ;;  %v4358_v1 = vmov 0.0   ;;  %v4359_v6 = vmov 0   ;;  %v2425_v7 = vld [vmem:[%s6596_s4 + $0x78] sm:$0xff]  ;;  %v2424_v8 = vld [vmem:[%s6596_s4 + $0x70] sm:$0xff] }
  0x1c   : > { %4237 = vset.pattern.permute.xlu0 %v4357_v0  ;;  %4228 = vset.pattern.permute.xlu1 %v4357_v0  ;;  %p382_p0 = scmp.lt.s32.totalorder %s3684_s22, 63  ;;  %v4360_v9 = vmov 3   ;;  %v2423_v10 = vld [vmem:[%s6596_s4 + $0x68] sm:$0xff]  ;;  %v4361_v11 = vmov 1   ;;  %v2422_v12 = vld [vmem:[%s6596_s4 + $0x60] sm:$0xff]  ;;  %v2421_v13 = vld [vmem:[%s6596_s4 + $0x58] sm:$0xff] }
  0x1d   : > { %2442 = vmatprep.subr.mxu0 %v4358_v1  ;;  %v2420_v14 = vld [vmem:[%s6596_s4 + $0x50] sm:$0xff]  ;;  %v2419_v15 = vld [vmem:[%s6596_s4 + $0x48] sm:$0xff]  ;;  %v2418_v18 = vld [vmem:[%s6596_s4 + $0x40] sm:$0xff]  ;;  %s431_s17 = sld [smem:[#allocation2]] }
  0x1e   : > { %s6656_s22 = smov (!%p382_p0, %s3684_s22), 63  ;;  %2443 = vmatpush1.msra.mxu0 %v2425_v7  ;;  %v2417_v19 = vld [vmem:[%s6596_s4 + $0x38] sm:$0xff]  ;;  %v2416_v21 = vld [vmem:[%s6596_s4 + $0x30] sm:$0xff]  ;;  %v2415_v22 = vld [vmem:[%s6596_s4 + $0x28] sm:$0xff]  ;;  %s3690_s20 = sld [smem:[#allocation2 + $0x1]] }
  0x1f   : > { %s4449_s23 = sshll.u32 %s6656_s22, 3  ;;  %2444 = vmatprep.subr.mxu0 %v4358_v1  ;;  %v2414_v23 = vld [vmem:[%s6596_s4 + $0x20] sm:$0xff]  ;;  %v2413_v24 = vld [vmem:[%s6596_s4 + $0x18] sm:$0xff]  ;;  %v2412_v25 = vld [vmem:[%s6596_s4 + $0x10] sm:$0xff] }
  0x20   : > { %s4455_s26 = scalar_lea.vmem %s6592_s0, %s4449_s23  ;;  %2445 = vmatpush1.msra.mxu0 %v2424_v8  ;;  %v2411_v27 = vld [vmem:[%s6596_s4 + $0x8] sm:$0xff]  ;;  %v2410_v28 = vld [vmem:[%s6596_s4] sm:$0xff]  ;;  %v2441_v30 = vld [vmem:[%s6596_s4 + $0xf8] sm:$0xff]  ;;  %s5675_s24 = scalar_lea.vmem %s6593_s1, %s4449_s23 }
  0x21   : > { %v4458_v2 = vld [vmem:[%s4455_s26 + $0x18] sm:$0xff]  ;;  %v4461_v3 = vld [vmem:[%s4455_s26] sm:$0xff]  ;;  %v4466_v4 = vld [vmem:[%s4455_s26 + $0x30] sm:$0xff]  ;;  %2446 = vmatprep.subr.mxu0 %v4358_v1  ;;  %s6476_s22 = scalar_lea.vmem %s6602_s10, %s4449_s23 }
  0x22   : > { %1716 = vperm.xlu0 %4237, %v4458_v2   ;;  %1707 = vperm.xlu1 %4228, %v4461_v3   ;;  %v968_v5 = vld [vmem:[%s4455_s26 + $0x8] sm:$0xff]  ;;  %v969_v16 = vld [vmem:[%s4455_s26 + $0x10] sm:$0xff]  ;;  %v4518_v20 = vld [vmem:[%s4455_s26 + $0x60] sm:$0xff] }
  0x23   : > { %2447 = vmatpush1.msra.mxu0 %v2423_v10  ;;  %v4505_v17 = vld [vmem:[%s4455_s26 + $0x48] sm:$0xff]  ;;  %v4561_v29 = vld [vmem:[%s4455_s26 + $0x40] sm:$0xff]  ;;  %v2440_v32 = vld [vmem:[%s6596_s4 + $0xf0] sm:$0xff] }
  0x24   : > { %2448 = vmatprep.subr.mxu0 %v4358_v1  ;;  %v4548_v26 = vld [vmem:[%s4455_s26 + $0x28] sm:$0xff]  ;;  %v971_v31 = vld [vmem:[%s4455_s26 + $0x20] sm:$0xff]  ;;  %v4574_v33 = vld [vmem:[%s4455_s26 + $0x58] sm:$0xff] }
  0x25   : > { %2449 = vmatpush1.msra.mxu0 %v2422_v12  ;;  %v2439_v34 = vld [vmem:[%s6596_s4 + $0xe8] sm:$0xff]  ;;  %v2438_v35 = vld [vmem:[%s6596_s4 + $0xe0] sm:$0xff]  ;;  %v4587_v36 = vld [vmem:[%s4455_s26 + $0x70] sm:$0xff] }
  0x26   : > { %1725 = vperm.xlu0 %4237, %v4466_v4   ;;  %4229 = vset.pattern.permute.xlu1 %v4359_v6  ;;  %v2437_v37 = vld [vmem:[%s6596_s4 + $0xd8] sm:$0xff]  ;;  %v4596_v38 = vld [vmem:[%s4455_s26 + $0x88] sm:$0xff]  ;;  %v2436_v39 = vld [vmem:[%s6596_s4 + $0xd0] sm:$0xff] }
  0x27   : > { %1006 = vperm.xlu1 %4229, %v968_v5   ;;  %2450 = vmatprep.subr.mxu0 %v4358_v1  ;;  %v2435_v40 = vld [vmem:[%s6596_s4 + $0xc8] sm:$0xff]  ;;  %v4609_v41 = vld [vmem:[%s4455_s26 + $0xa0] sm:$0xff]  ;;  %v2433_v43 = vld [vmem:[%s6596_s4 + $0xb8] sm:$0xff] }
  0x28   : > { %2451 = vmatpush1.msra.mxu0 %v2421_v13  ;;  %v2434_v42 = vld [vmem:[%s6596_s4 + $0xc0] sm:$0xff]  ;;  %v2432_v44 = vld [vmem:[%s6596_s4 + $0xb0] sm:$0xff]  ;;  %v2431_v45 = vld [vmem:[%s6596_s4 + $0xa8] sm:$0xff] }
  0x29   : > { %2452 = vmatprep.subr.mxu0 %v4358_v1  ;;  %v2430_v46 = vld [vmem:[%s6596_s4 + $0xa0] sm:$0xff]  ;;  %v2429_v47 = vld [vmem:[%s6596_s4 + $0x98] sm:$0xff]  ;;  %v2428_v48 = vld [vmem:[%s6596_s4 + $0x90] sm:$0xff] }
  0x2a   : > { %4246 = vset.pattern.permute.xlu0 %v4360_v9  ;;  %2453 = vmatpush1.msra.mxu0 %v2420_v14  ;;  %v2427_v49 = vld [vmem:[%s6596_s4 + $0x88] sm:$0xff]  ;;  %v2426_v50 = vld [vmem:[%s6596_s4 + $0x80] sm:$0xff]  ;;  %v4665_v51 = vld [vmem:[%s4455_s26 + $0x78] sm:$0xff] }
  0x2b   : > { %2059 = vperm.xlu0 %4246, %v4461_v3   ;;  %4230 = vset.pattern.permute.xlu1 %v4361_v11  ;;  %v974_v52 = vld [vmem:[%s4455_s26 + $0x38] sm:$0xff]  ;;  %v4671_v53 = vld [vmem:[%s4455_s26 + $0x90] sm:$0xff]  ;;  %v4675_v54 = vld [vmem:[%s4455_s26 + $0xa8] sm:$0xff] }
  0x2c   : > { %1358 = vperm.xlu1 %4230, %v968_v5   ;;  %2454 = vmatprep.subr.mxu0 %v4358_v1  ;;  %v991_v55 = vld [vmem:[%s4455_s26 + $0xc0] sm:$0xff]  ;;  %v977_v56 = vld [vmem:[%s4455_s26 + $0x50] sm:$0xff]  ;;  %v4698_v57 = vld [vmem:[%s4455_s26 + $0xd8] sm:$0xff] }
  0x2d   : > { %2455 = vmatpush1.msra.mxu0 %v2419_v15 }
  0x2e   : > { %2456 = vmatprep.subr.mxu0 %v4358_v1 }
  0x2f   : > { %2068 = vperm.xlu0 %4246, %v4458_v2   ;;  %2457 = vmatpush1.msra.mxu0 %v2418_v18 }
  0x30   : > { %4231 = vset.pattern.permute.xlu1 %v4357_v0  ;;  %2458 = vmatprep.subr.mxu0 %v4358_v1 }
  0x31   : > { %1710 = vperm.xlu1 %4231, %v968_v5   ;;  %2459 = vmatpush1.msra.mxu0 %v2417_v19  ;;  %v999_v19 = vlaneseq }
  0x32   : > { %2460 = vmatprep.subr.mxu0 %v4358_v1 }
  0x33   : > { %2077 = vperm.xlu0 %4246, %v4466_v4   ;;  %2461 = vmatpush1.msra.mxu0 %v2416_v21  ;;  %v4764_v21 = vand.u32 127, %v999_v19 }
  0x34   : > { %2462 = vmatprep.subr.mxu0 %v4358_v1 }
  0x35   : > { %4232 = vset.pattern.permute.xlu1 %v4359_v6  ;;  %2463 = vmatpush1.msra.mxu0 %v2415_v22 }
  0x36   : > { %1009 = vperm.xlu1 %4232, %v969_v16   ;;  %2464 = vmatprep.subr.mxu0 %v4358_v1 }
  0x37   : > { %2086 = vperm.xlu0 %4246, %v4505_v17   ;;  %2465 = vmatpush1.msra.mxu0 %v2414_v23 }
  0x38   : > { %2466 = vmatprep.subr.mxu0 %v4358_v1 }
  0x39   : > { %2467 = vmatpush1.msra.mxu0 %v2413_v24  ;;  %v4773_v24 = vadd.s32 128, %v4764_v21 }
  0x3a   : > { %4233 = vset.pattern.permute.xlu1 %v4360_v9  ;;  %2468 = vmatprep.subr.mxu0 %v4358_v1 }
  0x3b   : > { %2095 = vperm.xlu0 %4246, %v4518_v20   ;;  %2062 = vperm.xlu1 %4233, %v968_v5  }
  0x3c   : > { %2469 = vmatpush1.msra.mxu0 %v2412_v25 }
  0x3d   : > { %2470 = vmatprep.subr.mxu0 %v4358_v1 }
  0x3e   : > { %2471 = vmatpush1.msra.mxu0 %v2411_v27  ;;  %v4780_v27 = vld [vmem:[%s4455_s26 + $0xb8] sm:$0xff] }
  0x3f   : > { %4265 = vset.pattern.permute.xlu0 %v4361_v11  ;;  %4234 = vset.pattern.permute.xlu1 %v4357_v0 }
  0x40   : > { %1355 = vperm.xlu0 %4265, %v4461_v3   ;;  %1713 = vperm.xlu1 %4234, %v969_v16  }
  0x41   : > { %2472 = vmatprep.subr.mxu0 %v4358_v1 }
  0x42   : > { %2473 = vmatpush1.msra.mxu0 %v2410_v28 }
  0x43   : > { %2474 = vmatprep.subr.mxu0 %v4358_v1 }
  0x44   : > { %1361 = vperm.xlu0 %4265, %v969_v16   ;;  %4235 = vset.pattern.permute.xlu1 %v4361_v11 }
  0x45   : > { %1364 = vperm.xlu1 %4235, %v4458_v2   ;;  %2475 = vmatpush2.msra.mxu0 %v2441_v30 }
  0x46   : > { %2476 = vmatprep.subr.mxu0 %v4358_v1 }
  0x47   : > { %2477 = vmatpush2.msra.mxu0 %v2440_v32 }
  0x48   : > { %1370 = vperm.xlu0 %4265, %v4548_v26   ;;  %2478 = vmatprep.subr.mxu0 %v4358_v1 }
  0x49   : > { %4236 = vset.pattern.permute.xlu1 %v4360_v9  ;;  %2479 = vmatpush2.msra.mxu0 %v2439_v34 }
  0x4a   : > { %2065 = vperm.xlu1 %4236, %v969_v16   ;;  %2480 = vmatprep.subr.mxu0 %v4358_v1 }
  0x4b   : > { %2481 = vmatpush2.msra.mxu0 %v2438_v35 }
  0x4c   : > { %1379 = vperm.xlu0 %4265, %v4561_v29   ;;  %2482 = vmatprep.subr.mxu0 %v4358_v1 }
  0x4d   : > { %2483 = vmatpush2.msra.mxu0 %v2437_v37 }
  0x4e   : > { %4238 = vset.pattern.permute.xlu1 %v4359_v6  ;;  %2484 = vmatprep.subr.mxu0 %v4358_v1 }
  0x4f   : > { %1015 = vperm.xlu1 %4238, %v971_v31   ;;  %2485 = vmatpush2.msra.mxu0 %v2436_v39 }
  0x50   : > { %1388 = vperm.xlu0 %4265, %v4574_v33   ;;  %2486 = vmatprep.subr.mxu0 %v4358_v1 }
  0x51   : > { %2487 = vmatpush2.msra.mxu0 %v2435_v40 }
  0x52   : > { %2488 = vmatprep.subr.mxu0 %v4358_v1 }
  0x53   : > { %4239 = vset.pattern.permute.xlu1 %v4361_v11  ;;  %2489 = vmatpush2.msra.mxu0 %v2434_v42 }
  0x54   : > { %1397 = vperm.xlu0 %4265, %v4587_v36   ;;  %1367 = vperm.xlu1 %4239, %v971_v31  }
  0x55   : > { %2490 = vmatprep.subr.mxu0 %v4358_v1 }
  0x56   : > { %2491 = vmatpush2.msra.mxu0 %v2433_v43 }
  0x57   : > { %2492 = vmatprep.subr.mxu0 %v4358_v1 }
  0x58   : > { %1406 = vperm.xlu0 %4265, %v4596_v38   ;;  %4240 = vset.pattern.permute.xlu1 %v4357_v0 }
  0x59   : > { %1719 = vperm.xlu1 %4240, %v971_v31   ;;  %2493 = vmatpush2.msra.mxu0 %v2432_v44 }
  0x5a   : > { %2494 = vmatprep.subr.mxu0 %v4358_v1 }
  0x5b   : > { %2495 = vmatpush2.msra.mxu0 %v2431_v45 }
  0x5c   : > { %1415 = vperm.xlu0 %4265, %v4609_v41   ;;  %2496 = vmatprep.subr.mxu0 %v4358_v1 }
  0x5d   : > { %4241 = vset.pattern.permute.xlu1 %v4359_v6  ;;  %2497 = vmatpush2.msra.mxu0 %v2430_v46 }
  0x5e   : > { %1018 = vperm.xlu1 %4241, %v4548_v26   ;;  %2498 = vmatprep.subr.mxu0 %v4358_v1 }
  0x5f   : > { %2499 = vmatpush2.msra.mxu0 %v2429_v47 }
  0x60   : > { %4284 = vset.pattern.permute.xlu0 %v4359_v6  ;;  %2500 = vmatprep.subr.mxu0 %v4358_v1 }
  0x61   : > { %1003 = vperm.xlu0 %4284, %v4461_v3   ;;  %2501 = vmatpush2.msra.mxu0 %v2428_v48 }
  0x62   : > { %4242 = vset.pattern.permute.xlu1 %v4360_v9  ;;  %2502 = vmatprep.subr.mxu0 %v4358_v1 }
  0x63   : > { %2071 = vperm.xlu1 %4242, %v971_v31   ;;  %2503 = vmatpush2.msra.mxu0 %v2427_v49 }
  0x64   : > { %2504 = vmatprep.subr.mxu0 %v4358_v1 }
  0x65   : > { %1012 = vperm.xlu0 %4284, %v4458_v2   ;;  %2505 = vmatpush2.msra.mxu0 %v2426_v50 }
  0x67   : > { %4243 = vset.pattern.permute.xlu1 %v4357_v0 }
  0x68   : > { %1722 = vperm.xlu1 %4243, %v4548_v26  }
  0x69   : > { %1021 = vperm.xlu0 %4284, %v4466_v4  }
  0x6c   : > { %4244 = vset.pattern.permute.xlu1 %v4361_v11 }
  0x6d   : > { %1373 = vperm.xlu1 %4244, %v4466_v4   ;;  %1030 = vperm.xlu0 %4284, %v4505_v17  }
  0x71   : > { %4245 = vset.pattern.permute.xlu1 %v4360_v9  ;;  %1039 = vperm.xlu0 %4284, %v4518_v20  }
  0x72   : > { %2074 = vperm.xlu1 %4245, %v4548_v26  }
  0x75   : > { %1048 = vperm.xlu0 %4284, %v4665_v51  }
  0x76   : > { %4247 = vset.pattern.permute.xlu1 %v4359_v6 }
  0x77   : > { %1024 = vperm.xlu1 %4247, %v974_v52  }
  0x79   : > { %1057 = vperm.xlu0 %4284, %v4671_v53  }
  0x7b   : > { %4248 = vset.pattern.permute.xlu1 %v4361_v11 }
  0x7c   : > { %1376 = vperm.xlu1 %4248, %v974_v52  }
  0x7d   : > { %1066 = vperm.xlu0 %4284, %v4675_v54  }
  0x80   : > { %4249 = vset.pattern.permute.xlu1 %v4357_v0 }
  0x81   : > { %1728 = vperm.xlu1 %4249, %v974_v52   ;;  %1075 = vperm.xlu0 %4284, %v991_v55  }
  0x85   : > { %4250 = vset.pattern.permute.xlu1 %v4359_v6  ;;  %4295 = vset.pattern.permute.xlu0 %v4357_v0 }
  0x86   : > { %1027 = vperm.xlu1 %4250, %v4561_v29   ;;  %1734 = vperm.xlu0 %4295, %v4505_v17  }
  0x8a   : > { %4251 = vset.pattern.permute.xlu1 %v4360_v9  ;;  %1743 = vperm.xlu0 %4295, %v4518_v20  }
  0x8b   : > { %2080 = vperm.xlu1 %4251, %v974_v52  }
  0x8e   : > { %1752 = vperm.xlu0 %4295, %v4665_v51  }
  0x8f   : > { %4252 = vset.pattern.permute.xlu1 %v4357_v0 }
  0x90   : > { %1731 = vperm.xlu1 %4252, %v4561_v29  }
  0x92   : > { %1761 = vperm.xlu0 %4295, %v4671_v53  }
  0x94   : > { %4253 = vset.pattern.permute.xlu1 %v4361_v11 }
  0x95   : > { %1382 = vperm.xlu1 %4253, %v4505_v17   ;;  %v4756_v17 = vld [vmem:[%s4455_s26 + $0x68] sm:$0xff] }
  0x96   : > { %1770 = vperm.xlu0 %4295, %v4675_v54  }
  0x99   : > { %4254 = vset.pattern.permute.xlu1 %v4360_v9 }
  0x9a   : > { %2083 = vperm.xlu1 %4254, %v4561_v29   ;;  %1779 = vperm.xlu0 %4295, %v991_v55  }
  0x9d   : > { %v4700_v58 = vpop.permute.xlu1 %1707  ;;  %v4702_v59 = vpop.permute.xlu0 %1716 }
  0x9e   : > { %4255 = vset.pattern.permute.xlu1 %v4359_v6  ;;  %1788 = vperm.xlu0 %4295, %v4698_v57   ;;  %vm1802_vm1 = vcmp.eq.s32.totalorder %v4764_v21, %v4700_v58  ;;  %vm1808_vm2 = vcmp.eq.s32.totalorder %v4764_v21, %v4702_v59  ;;  %vm1803_vm3 = vcmp.eq.s32.totalorder %v4773_v24, %v4700_v58 }
  0x9f   : > { %1033 = vperm.xlu1 %4255, %v977_v56   ;;  %vm1809_vm4 = vcmp.eq.s32.totalorder %v4773_v24, %v4702_v59  ;;  %v4807_v30 = vsel %vm1802_vm1, 1.0, %v4358_v1  ;;  %v4810_v31 = vsel %vm1808_vm2, 1.0, %v4358_v1  ;;  %v3824_v37 = vsel %vm1803_vm3, 1.0, %v4358_v1 }
  0xa1   : > { %v4706_v60 = vpop.permute.xlu0 %1725 }
  0xa2   : > { %v4708_v61 = vpop.permute.xlu1 %1006  ;;  %4306 = vset.pattern.permute.xlu0 %v4360_v9 }
  0xa3   : > { %4256 = vset.pattern.permute.xlu1 %v4361_v11  ;;  %2104 = vperm.xlu0 %4306, %v4665_v51   ;;  %vm1100_vm5 = vcmp.eq.s32.totalorder %v4764_v21, %v4708_v61  ;;  %vm1101_vm7 = vcmp.eq.s32.totalorder %v4773_v24, %v4708_v61 }
  0xa4   : > { %1385 = vperm.xlu1 %4256, %v977_v56   ;;  %v3697_v34 = vsel %vm1100_vm5, 1.0, %v4358_v1  ;;  %v3698_v39 = vsel %vm1101_vm7, 1.0, %v4358_v1 }
  0xa6   : > { %v4713_v62 = vpop.permute.xlu0 %2059 }
  0xa7   : > { %v4715_v63 = vpop.permute.xlu1 %1358  ;;  %2113 = vperm.xlu0 %4306, %v4671_v53   ;;  %vm2154_vm8 = vcmp.eq.s32.totalorder %v4764_v21, %v4713_v62  ;;  %vm2155_vm11 = vcmp.eq.s32.totalorder %v4773_v24, %v4713_v62 }
  0xa8   : > { %4257 = vset.pattern.permute.xlu1 %v4357_v0  ;;  %vm1452_vm0 = vcmp.eq.s32.totalorder %v4764_v21, %v4715_v63  ;;  %vm1453_vm6 = vcmp.eq.s32.totalorder %v4773_v24, %v4715_v63  ;;  %v4830_v40 = vsel %vm2154_vm8, 1.0, %v4358_v1  ;;  %v3888_v48 = vsel %vm2155_vm11, 1.0, %v4358_v1 }
  0xa9   : > { %1737 = vperm.xlu1 %4257, %v977_v56   ;;  %v3761_v28 = vsel %vm1452_vm0, 1.0, %v4358_v1  ;;  %v3762_v35 = vsel %vm1453_vm6, 1.0, %v4358_v1 }
  0xaa   : > { %v4719_v2 = vpop.permute.xlu0 %2068  ;;  %v1644_v42 = vadd.f32 %v3761_v28, %v3697_v34  ;;  %v1645_v46 = vadd.f32 %v3762_v35, %v3698_v39 }
  0xab   : > { %2122 = vperm.xlu0 %4306, %v4675_v54   ;;  %vm2160_vm12 = vcmp.eq.s32.totalorder %v4764_v21, %v4719_v2  ;;  %vm2161_vm13 = vcmp.eq.s32.totalorder %v4773_v24, %v4719_v2 }
  0xac   : > { %v4721_v3 = vpop.permute.xlu1 %1710  ;;  %v4859_v49 = vsel %vm2160_vm12, 1.0, %v4358_v1  ;;  %v4862_v50 = vsel %vm2161_vm13, 1.0, %v4358_v1 }
  0xad   : > { %4258 = vset.pattern.permute.xlu1 %v4359_v6  ;;  %vm1804_vm9 = vcmp.eq.s32.totalorder %v4764_v21, %v4721_v3  ;;  %vm1805_vm10 = vcmp.eq.s32.totalorder %v4773_v24, %v4721_v3 }
  0xae   : > { %1036 = vperm.xlu1 %4258, %v4574_v33   ;;  %v4726_v4 = vpop.permute.xlu0 %2077  ;;  %v3825_v43 = vsel %vm1804_vm9, 1.0, %v4358_v1  ;;  %v3826_v44 = vsel %vm1805_vm10, 1.0, %v4358_v1 }
  0xaf   : > { %2131 = vperm.xlu0 %4306, %v991_v55   ;;  %v1996_v52 = vadd.f32 %v3825_v43, %v1644_v42  ;;  %v1997_v55 = vadd.f32 %v3826_v44, %v1645_v46 }
  0xb1   : > { %v4728_v5 = vpop.permute.xlu1 %1009 }
  0xb2   : > { %4259 = vset.pattern.permute.xlu1 %v4360_v9  ;;  %v4731_v7 = vpop.permute.xlu0 %2086  ;;  %vm1102_vm14 = vcmp.eq.s32.totalorder %v4764_v21, %v4728_v5  ;;  %vm1103_vm15 = vcmp.eq.s32.totalorder %v4773_v24, %v4728_v5 }
  0xb3   : > { %2089 = vperm.xlu1 %4259, %v977_v56   ;;  %2140 = vperm.xlu0 %4306, %v4698_v57   ;;  %v3699_v56 = vsel %vm1102_vm14, 1.0, %v4358_v1  ;;  %v3700_v58 = vsel %vm1103_vm15, 1.0, %v4358_v1 }
  0xb6   : > { %v4734_v8 = vpop.permute.xlu1 %2062  ;;  %v4736_v10 = vpop.permute.xlu0 %2095 }
  0xb7   : > { %4260 = vset.pattern.permute.xlu1 %v4357_v0  ;;  %4309 = vset.pattern.permute.xlu0 %v4361_v11  ;;  %vm2157_vm0 = vcmp.eq.s32.totalorder %v4773_v24, %v4734_v8  ;;  %vm2156_vm1 = vcmp.eq.s32.totalorder %v4764_v21, %v4734_v8 }
  0xb8   : > { %1740 = vperm.xlu1 %4260, %v4574_v33   ;;  %1424 = vperm.xlu0 %4309, %v4780_v27   ;;  %v3890_v59 = vsel %vm2157_vm0, 1.0, %v4358_v1  ;;  %v3889_v61 = vsel %vm2156_vm1, 1.0, %v4358_v1 }
  0xbb   : > { %v4741_v12 = vpop.permute.xlu0 %1355  ;;  %v4743_v13 = vpop.permute.xlu1 %1713 }
  0xbc   : > { %4261 = vset.pattern.permute.xlu1 %v4361_v11  ;;  %vm1450_vm2 = vcmp.eq.s32.totalorder %v4764_v21, %v4741_v12  ;;  %vm1451_vm3 = vcmp.eq.s32.totalorder %v4773_v24, %v4741_v12  ;;  %vm1806_vm6 = vcmp.eq.s32.totalorder %v4764_v21, %v4743_v13  ;;  %vm1807_vm7 = vcmp.eq.s32.totalorder %v4773_v24, %v4743_v13 }
  0xbd   : > { %1391 = vperm.xlu1 %4261, %v4518_v20   ;;  %v3759_v62 = vsel %vm1450_vm2, 1.0, %v4358_v1  ;;  %v3760_v63 = vsel %vm1451_vm3, 1.0, %v4358_v1  ;;  %v2348_v13 = vadd.f32 %v3889_v61, %v1996_v52  ;;  %v3827_v34 = vsel %vm1806_vm6, 1.0, %v4358_v1 }
  0xbe   : > { %v3828_v35 = vsel %vm1807_vm7, 1.0, %v4358_v1 }
  0xbf   : > { %v4747_v14 = vpop.permute.xlu0 %1361 }
  0xc0   : > { %v4749_v15 = vpop.permute.xlu1 %1364  ;;  %vm1455_vm5 = vcmp.eq.s32.totalorder %v4773_v24, %v4747_v14 }
  0xc1   : > { %4262 = vset.pattern.permute.xlu1 %v4360_v9  ;;  %vm1456_vm10 = vcmp.eq.s32.totalorder %v4764_v21, %v4749_v15  ;;  %vm1457_vm11 = vcmp.eq.s32.totalorder %v4773_v24, %v4749_v15 }
  0xc2   : > { %2092 = vperm.xlu1 %4262, %v4574_v33   ;;  %v4819_v33 = vsel %vm1809_vm4, 1.0, %v4358_v1  ;;  %vm1454_vm4 = vcmp.eq.s32.totalorder %v4764_v21, %v4747_v14  ;;  %v2349_v14 = vadd.f32 %v3890_v59, %v1997_v55  ;;  %v3765_v55 = vsel %vm1456_vm10, 1.0, %v4358_v1 }
  0xc3   : > { %v4753_v16 = vpop.permute.xlu0 %1370  ;;  %v3763_v3 = vsel %vm1454_vm4, 1.0, %v4358_v1  ;;  %vm1814_vm10 = vcmp.eq.s32.totalorder %v4764_v21, %v4706_v60 }
  0xc4   : > { %v1646_v42 = vadd.f32 %v3763_v3, %v3699_v56  ;;  %vm1460_vm15 = vcmp.eq.s32.totalorder %v4764_v21, %v4753_v16  ;;  %vm1461_vm0 = vcmp.eq.s32.totalorder %v4773_v24, %v4753_v16 }
  0xc5   : > { %v4758_v18 = vpop.permute.xlu1 %2065  ;;  %v4930_v61 = vsel %vm1460_vm15, 1.0, %v4358_v1 }
  0xc6   : > { %4263 = vset.pattern.permute.xlu1 %v4359_v6  ;;  %vm2159_vm13 = vcmp.eq.s32.totalorder %v4773_v24, %v4758_v18  ;;  %vm2158_vm1 = vcmp.eq.s32.totalorder %v4764_v21, %v4758_v18 }
  0xc7   : > { %1042 = vperm.xlu1 %4263, %v4756_v17   ;;  %v4762_v20 = vpop.permute.xlu0 %1379 }
  0xca   : > { %v4766_v22 = vpop.permute.xlu1 %1015 }
  0xcb   : > { %4264 = vset.pattern.permute.xlu1 %v4361_v11  ;;  %v4769_v23 = vpop.permute.xlu0 %1388  ;;  %vm1106_vm4 = vcmp.eq.s32.totalorder %v4764_v21, %v4766_v22  ;;  %vm1107_vm6 = vcmp.eq.s32.totalorder %v4773_v24, %v4766_v22 }
  0xcc   : > { %1394 = vperm.xlu1 %4264, %v4756_v17  }
  0xcf   : > { %v4775_v25 = vpop.permute.xlu1 %1367  ;;  %v4777_v26 = vpop.permute.xlu0 %1397 }
  0xd0   : > { %4266 = vset.pattern.permute.xlu1 %v4357_v0  ;;  %vm1458_vm2 = vcmp.eq.s32.totalorder %v4764_v21, %v4775_v25  ;;  %vm1459_vm3 = vcmp.eq.s32.totalorder %v4773_v24, %v4775_v25 }
  0xd1   : > { %1746 = vperm.xlu1 %4266, %v4756_v17   ;;  %v3767_v3 = vsel %vm1458_vm2, 1.0, %v4358_v1  ;;  %v3768_v16 = vsel %vm1459_vm3, 1.0, %v4358_v1 }
  0xd3   : > { %v4804_v29 = vpop.permute.xlu0 %1406 }
  0xd4   : > { %v4816_v32 = vpop.permute.xlu1 %1719 }
  0xd5   : > { %4267 = vset.pattern.permute.xlu1 %v4359_v6  ;;  %vm1810_vm7 = vcmp.eq.s32.totalorder %v4764_v21, %v4816_v32 }
  0xd6   : > { %1045 = vperm.xlu1 %4267, %v4587_v36  }
  0xd7   : > { %v4841_v45 = vpop.permute.xlu0 %1415 }
  0xd9   : > { %v4855_v47 = vpop.permute.xlu1 %1018 }
  0xda   : > { %4268 = vset.pattern.permute.xlu1 %v4360_v9 }
  0xdb   : > { %2098 = vperm.xlu1 %4268, %v4756_v17   ;;  %v3764_v17 = vsel %vm1455_vm5, 1.0, %v4358_v1  ;;  %vm1815_vm5 = vcmp.eq.s32.totalorder %v4773_v24, %v4706_v60 }
  0xdc   : > { %v1004_v2 = vpop.permute.xlu0 %1003  ;;  %v1647_v46 = vadd.f32 %v3764_v17, %v3700_v58  ;;  %v3703_v17 = vsel %vm1106_vm4, 1.0, %v4358_v1 }
  0xdd   : > { %vm1098_vm8 = vcmp.eq.s32.totalorder %v4764_v21, %v1004_v2  ;;  %vm1099_vm9 = vcmp.eq.s32.totalorder %v4773_v24, %v1004_v2  ;;  %v3891_v2 = vsel %vm2158_vm1, 1.0, %v4358_v1 }
  0xde   : > { %v3695_v5 = vsel %vm1098_vm8, 1.0, %v4358_v1  ;;  %v3696_v8 = vsel %vm1099_vm9, 1.0, %v4358_v1  ;;  %v4885_v12 = vpop.permute.xlu1 %2071  ;;  %vm1811_vm8 = vcmp.eq.s32.totalorder %v4773_v24, %v4816_v32  ;;  %vm1109_vm9 = vcmp.eq.s32.totalorder %v4773_v24, %v4855_v47 }
  0xdf   : > { %v1642_v19 = vadd.f32 %v3759_v62, %v3695_v5  ;;  %4269 = vset.pattern.permute.xlu1 %v4357_v0  ;;  %v1643_v28 = vadd.f32 %v3760_v63, %v3696_v8  ;;  %v1999_v62 = vadd.f32 %v3828_v35, %v1647_v46  ;;  %v1998_v63 = vadd.f32 %v3827_v34, %v1646_v42 }
  0xe0   : > { %v1013_v39 = vpop.permute.xlu0 %1012  ;;  %1749 = vperm.xlu1 %4269, %v4587_v36   ;;  %v3832_v35 = vsel %vm1811_vm8, 1.0, %v4358_v1  ;;  %vm2162_vm15 = vcmp.eq.s32.totalorder %v4764_v21, %v4885_v12 }
  0xe1   : > { %vm1105_vm12 = vcmp.eq.s32.totalorder %v4773_v24, %v1013_v39  ;;  %v1995_v43 = vadd.f32 %v3824_v37, %v1643_v28  ;;  %v1994_v44 = vadd.f32 %v4807_v30, %v1642_v19  ;;  %vm1104_vm14 = vcmp.eq.s32.totalorder %v4764_v21, %v1013_v39 }
  0xe2   : > { %v3702_v52 = vsel %vm1105_vm12, 1.0, %v4358_v1  ;;  %v3766_v30 = vsel %vm1457_vm11, 1.0, %v4358_v1  ;;  %v1650_v19 = vadd.f32 %v3767_v3, %v3703_v17  ;;  %vm2163_vm11 = vcmp.eq.s32.totalorder %v4773_v24, %v4885_v12 }
  0xe3   : > { %v4905_v59 = vpop.permute.xlu1 %1722  ;;  %v2347_v56 = vadd.f32 %v3888_v48, %v1995_v43  ;;  %v2346_v37 = vadd.f32 %v4830_v40, %v1994_v44  ;;  %v3892_v48 = vsel %vm2159_vm13, 1.0, %v4358_v1  ;;  %v3701_v40 = vsel %vm1104_vm14, 1.0, %v4358_v1 }
  0xe4   : > { %4270 = vset.pattern.permute.xlu1 %v4361_v11  ;;  %v1649_v15 = vadd.f32 %v3766_v30, %v3702_v52  ;;  %v4924_v58 = vpop.permute.xlu0 %1021  ;;  %v1648_v5 = vadd.f32 %v3765_v55, %v3701_v40  ;;  %v2351_v8 = vadd.f32 %v3892_v48, %v1999_v62  ;;  %v2350_v28 = vadd.f32 %v3891_v2, %v1998_v63 }
  0xe5   : > { %1400 = vperm.xlu1 %4270, %v4665_v51   ;;  %2506 = vmatprep.mubr.f32.mxu0 %v2347_v56  ;;  %v3770_v51 = vsel %vm1461_vm0, 1.0, %v4358_v1  ;;  %vm1111_vm12 = vcmp.eq.s32.totalorder %v4773_v24, %v4924_v58  ;;  %vm1108_vm14 = vcmp.eq.s32.totalorder %v4764_v21, %v4855_v47  ;;  %v3896_v42 = vsel %vm2163_vm11, 1.0, %v4358_v1 }
  0xe6   : > { %2507 = vmatmul.mubr.f32.vlgmr.msra.gmra.mxu0 %v2346_v37  ;;  %v2001_v22 = vadd.f32 %v4819_v33, %v1649_v15  ;;  %v3831_v33 = vsel %vm1810_vm7, 1.0, %v4358_v1  ;;  %v2000_v39 = vadd.f32 %v4810_v31, %v1648_v5  ;;  %vm1813_vm0 = vcmp.eq.s32.totalorder %v4773_v24, %v4905_v59 }
  0xe7   : > { %2511 = vmatprep.mubr.f32.mxu0 %v2349_v14  ;;  %v3704_v14 = vsel %vm1107_vm6, 1.0, %v4358_v1  ;;  %vm1110_vm1 = vcmp.eq.s32.totalorder %v4764_v21, %v4924_v58  ;;  %v3708_v44 = vsel %vm1111_vm12, 1.0, %v4358_v1  ;;  %v3705_v52 = vsel %vm1108_vm14, 1.0, %v4358_v1 }
  0xe8   : > { %v1374_v18 = vpop.permute.xlu1 %1373  ;;  %v4963_v25 = vpop.permute.xlu0 %1030  ;;  %v1651_v34 = vadd.f32 %v3768_v16, %v3704_v14  ;;  %v2353_v43 = vadd.f32 %v4862_v50, %v2001_v22  ;;  %v3895_v56 = vsel %vm2162_vm15, 1.0, %v4358_v1  ;;  %vm1812_vm4 = vcmp.eq.s32.totalorder %v4764_v21, %v4905_v59 }
  0xe9   : > { %4271 = vset.pattern.permute.xlu1 %v4360_v9  ;;  %vm1463_vm13 = vcmp.eq.s32.totalorder %v4773_v24, %v1374_v18  ;;  %vm1462_vm2 = vcmp.eq.s32.totalorder %v4764_v21, %v1374_v18  ;;  %v3834_v47 = vsel %vm1813_vm0, 1.0, %v4358_v1  ;;  %v2352_v37 = vadd.f32 %v4859_v49, %v2000_v39  ;;  %v5066_v39 = vld [vmem:[%s4455_s26 + $0xe8] sm:$0xff] }
  0xea   : > { %2101 = vperm.xlu1 %4271, %v4587_v36   ;;  %2512 = vmatmul.mubr.f32.gmra.mxu0 %v2348_v13  ;;  %v3706_v36 = vsel %vm1109_vm9, 1.0, %v4358_v1  ;;  %v4989_v13 = vld [vmem:[%s4455_s26 + $0x80] sm:$0xff]  ;;  %v3772_v31 = vsel %vm1463_vm13, 1.0, %v4358_v1  ;;  %v2003_v46 = vadd.f32 %v3832_v35, %v1651_v34  ;;  %v3707_v30 = vsel %vm1110_vm1, 1.0, %v4358_v1 }
  0xeb   : > { %2516 = vmatprep.mubr.f32.mxu0 %v2351_v8  ;;  %v1653_v55 = vadd.f32 %v3770_v51, %v3706_v36  ;;  %v3771_v12 = vsel %vm1462_vm2, 1.0, %v4358_v1  ;;  %v1655_v48 = vadd.f32 %v3772_v31, %v3708_v44  ;;  %v3836_v15 = vsel %vm1815_vm5, 1.0, %v4358_v1 }
  0xec   : > { %v5010_v50 = vpop.permute.xlu0 %1039  ;;  %v2355_v40 = vadd.f32 %v3896_v42, %v2003_v46  ;;  %v2002_v59 = vadd.f32 %v3831_v33, %v1650_v19  ;;  %vm2167_vm7 = vcmp.eq.s32.totalorder %v4773_v24, %v4726_v4  ;;  %v3833_v58 = vsel %vm1812_vm4, 1.0, %v4358_v1  ;;  %v5053_v19 = vld [vmem:[%s4455_s26 + $0xd0] sm:$0xff] }
  0xed   : > { %v2075_v32 = vpop.permute.xlu1 %2074  ;;  %v2005_v63 = vadd.f32 %v3834_v47, %v1653_v55  ;;  %v1652_v51 = vadd.f32 %v4930_v61, %v3705_v52  ;;  %v1654_v2 = vadd.f32 %v3771_v12, %v3707_v30  ;;  %v3835_v16 = vsel %vm1814_vm10, 1.0, %v4358_v1  ;;  %1433 = vperm.xlu0 %4309, %v5053_v19  }
  0xee   : > { %4272 = vset.pattern.permute.xlu1 %v4359_v6  ;;  %2517 = vmatmul.mubr.f32.gmra.mxu0 %v2350_v28  ;;  %vm2165_vm3 = vcmp.eq.s32.totalorder %v4773_v24, %v2075_v32  ;;  %vm2164_vm6 = vcmp.eq.s32.totalorder %v4764_v21, %v2075_v32  ;;  %v2354_v3 = vadd.f32 %v3895_v56, %v2002_v59  ;;  %v3900_v61 = vsel %vm2167_vm7, 1.0, %v4358_v1 }
  0xef   : > { %1051 = vperm.xlu1 %4272, %v4989_v13   ;;  %2521 = vmatprep.mubr.f32.mxu0 %v2353_v43  ;;  %v3898_v49 = vsel %vm2165_vm3, 1.0, %v4358_v1  ;;  %v3897_v5 = vsel %vm2164_vm6, 1.0, %v4358_v1  ;;  %v2007_v8 = vadd.f32 %v3836_v15, %v1655_v48  ;;  %vm2166_vm5 = vcmp.eq.s32.totalorder %v4764_v21, %v4726_v4 }
  0xf0   : > { %v2357_v18 = vadd.f32 %v3898_v49, %v2005_v63  ;;  %v5047_v17 = vpop.permute.xlu0 %1048  ;;  %v2004_v22 = vadd.f32 %v3833_v58, %v1652_v51  ;;  %v2006_v28 = vadd.f32 %v3835_v16, %v1654_v2  ;;  %v3899_v34 = vsel %vm2166_vm5, 1.0, %v4358_v1 }
  0xf1   : > { %v2359_v4 = vadd.f32 %v3900_v61, %v2007_v8  ;;  %1442 = vperm.xlu0 %4309, %v5066_v39   ;;  %vm1466_vm0 = vcmp.eq.s32.totalorder %v4764_v21, %v4762_v20  ;;  %vm1467_vm1 = vcmp.eq.s32.totalorder %v4773_v24, %v4762_v20  ;;  %vm1117_vm2 = vcmp.eq.s32.totalorder %v4773_v24, %v4963_v25 }
  0xf2   : > { %2522 = vmatmul.mubr.f32.gmra.mxu0 %v2352_v37  ;;  %v1025_v62 = vpop.permute.xlu1 %1024  ;;  %v2356_v60 = vadd.f32 %v3897_v5, %v2004_v22  ;;  %v2358_v36 = vadd.f32 %v3899_v34, %v2006_v28  ;;  %vm1116_vm4 = vcmp.eq.s32.totalorder %v4764_v21, %v4963_v25  ;;  %v3776_v20 = vsel %vm1467_vm1, 1.0, %v4358_v1 }
  0xf3   : > { %4273 = vset.pattern.permute.xlu1 %v4361_v11  ;;  %2526 = vmatprep.mubr.f32.mxu0 %v2355_v40  ;;  %vm1112_vm10 = vcmp.eq.s32.totalorder %v4764_v21, %v1025_v62  ;;  %vm1113_vm11 = vcmp.eq.s32.totalorder %v4773_v24, %v1025_v62  ;;  %v3775_v62 = vsel %vm1466_vm0, 1.0, %v4358_v1  ;;  %v3714_v58 = vsel %vm1117_vm2, 1.0, %v4358_v1 }
  0xf4   : > { %1403 = vperm.xlu1 %4273, %v4989_v13   ;;  %v5059_v33 = vpop.permute.xlu0 %1057  ;;  %v3709_v31 = vsel %vm1112_vm10, 1.0, %v4358_v1  ;;  %v3710_v46 = vsel %vm1113_vm11, 1.0, %v4358_v1 }
  0xf5   : > { %4312 = vset.pattern.permute.xlu0 %v4359_v6 }
  0xf6   : > { %2527 = vmatmul.mubr.f32.gmra.mxu0 %v2354_v3  ;;  %1084 = vperm.xlu0 %4312, %v4698_v57  }
  0xf7   : > { %2531 = vmatprep.mubr.f32.mxu0 %v2357_v18  ;;  %v1377_v14 = vpop.permute.xlu1 %1376 }
  0xf8   : > { %4274 = vset.pattern.permute.xlu1 %v4357_v0  ;;  %vm1464_vm8 = vcmp.eq.s32.totalorder %v4764_v21, %v1377_v14  ;;  %vm1465_vm9 = vcmp.eq.s32.totalorder %v4773_v24, %v1377_v14  ;;  %v5072_v32 = vpop.permute.xlu0 %1066  ;;  %v986_v14 = vld [vmem:[%s4455_s26 + $0x98] sm:$0xff] }
  0xf9   : > { %1755 = vperm.xlu1 %4274, %v4989_v13   ;;  %v3773_v43 = vsel %vm1464_vm8, 1.0, %v4358_v1  ;;  %v3774_v44 = vsel %vm1465_vm9, 1.0, %v4358_v1 }
  0xfa   : > { %2532 = vmatmul.mubr.f32.gmra.mxu0 %v2356_v60  ;;  %v1656_v56 = vadd.f32 %v3773_v43, %v3709_v31  ;;  %v1657_v47 = vadd.f32 %v3774_v44, %v3710_v46 }
  0xfb   : > { %2536 = vmatprep.mubr.f32.mxu0 %v2359_v4 }
  0xfc   : > { %v1729_v35 = vpop.permute.xlu1 %1728 }
  0xfd   : > { %4275 = vset.pattern.permute.xlu1 %v4359_v6  ;;  %vm1816_vm12 = vcmp.eq.s32.totalorder %v4764_v21, %v1729_v35  ;;  %vm1817_vm13 = vcmp.eq.s32.totalorder %v4773_v24, %v1729_v35 }
  0xfe   : > { %1054 = vperm.xlu1 %4275, %v4596_v38   ;;  %2537 = vmatmul.mubr.f32.gmra.mxu0 %v2358_v36  ;;  %v3837_v52 = vsel %vm1816_vm12, 1.0, %v4358_v1  ;;  %v3838_v55 = vsel %vm1817_vm13, 1.0, %v4358_v1  ;;  %vm2173_vm12 = vcmp.eq.s32.totalorder %v4773_v24, %v4731_v7 }
  0xff   : > { %v2008_v30 = vadd.f32 %v3837_v52, %v1656_v56  ;;  %v2009_v12 = vadd.f32 %v3838_v55, %v1657_v47 }
 0x101   : > { %v1028_v42 = vpop.permute.xlu1 %1027 }
 0x102   : > { %4276 = vset.pattern.permute.xlu1 %v4360_v9  ;;  %vm1114_vm3 = vcmp.eq.s32.totalorder %v4764_v21, %v1028_v42  ;;  %vm1115_vm6 = vcmp.eq.s32.totalorder %v4773_v24, %v1028_v42 }
 0x103   : > { %2107 = vperm.xlu1 %4276, %v4989_v13   ;;  %v5088_v13 = vpop.permute.xlu0 %1075  ;;  %v3711_v63 = vsel %vm1114_vm3, 1.0, %v4358_v1  ;;  %v3712_v25 = vsel %vm1115_vm6, 1.0, %v4358_v1 }
 0x104   : > { %v1658_v5 = vadd.f32 %v3775_v62, %v3711_v63  ;;  %v1659_v22 = vadd.f32 %v3776_v20, %v3712_v25 }
 0x106   : > { %v2081_v37 = vpop.permute.xlu1 %2080 }
 0x107   : > { %vm2168_vm14 = vcmp.eq.s32.totalorder %v4764_v21, %v2081_v37  ;;  %vm2169_vm15 = vcmp.eq.s32.totalorder %v4773_v24, %v2081_v37  ;;  %4277 = vset.pattern.permute.xlu1 %v4357_v0  ;;  %v1735_v49 = vpop.permute.xlu0 %1734 }
 0x108   : > { %v3901_v48 = vsel %vm2168_vm14, 1.0, %v4358_v1  ;;  %v3902_v40 = vsel %vm2169_vm15, 1.0, %v4358_v1  ;;  %1758 = vperm.xlu1 %4277, %v4596_v38   ;;  %vm1821_vm8 = vcmp.eq.s32.totalorder %v4773_v24, %v1735_v49  ;;  %vm1820_vm11 = vcmp.eq.s32.totalorder %v4764_v21, %v1735_v49 }
 0x109   : > { %v2361_v15 = vadd.f32 %v3902_v40, %v2009_v12  ;;  %v2360_v59 = vadd.f32 %v3901_v48, %v2008_v30  ;;  %v3842_v61 = vsel %vm1821_vm8, 1.0, %v4358_v1  ;;  %v3841_v34 = vsel %vm1820_vm11, 1.0, %v4358_v1  ;;  %v2670_v30 = vld [vmem:[%s6597_s5 + $0x18] sm:$0xff]  ;;  %v2669_v12 = vld [vmem:[%s6597_s5 + $0x10] sm:$0xff]  ;;  %v2668_v48 = vld [vmem:[%s6597_s5 + $0x8] sm:$0xff] }
 0x10a   : > { %vm2172_vm15 = vcmp.eq.s32.totalorder %v4764_v21, %v4731_v7  ;;  %4092 = vmatprep.subr.mxu1 %v2670_v30  ;;  %v5154_v40 = vld [vmem:[%s4455_s26 + $0xf0] sm:$0xff]  ;;  %vm1472_vm8 = vcmp.eq.s32.totalorder %v4764_v21, %v4769_v23 }
 0x10b   : > { %2541 = vmatprep.mubr.f32.mxu0 %v2361_v15  ;;  %v1732_v57 = vpop.permute.xlu1 %1731  ;;  %v3905_v52 = vsel %vm2172_vm15, 1.0, %v4358_v1  ;;  %4093 = vmatpush3.msra.mxu1 %v2670_v30  ;;  %v2667_v15 = vld [vmem:[%s6597_s5] sm:$0xff] }
 0x10c   : > { %4278 = vset.pattern.permute.xlu1 %v4361_v11  ;;  %2542 = vmatmul.mubr.f32.gmra.mxu0 %v2360_v59  ;;  %vm1818_vm7 = vcmp.eq.s32.totalorder %v4764_v21, %v1732_v57  ;;  %vm1819_vm5 = vcmp.eq.s32.totalorder %v4773_v24, %v1732_v57 }
 0x10d   : > { %1409 = vperm.xlu1 %4278, %v4671_v53   ;;  %v3713_v53 = vsel %vm1116_vm4, 1.0, %v4358_v1  ;;  %v3839_v2 = vsel %vm1818_vm7, 1.0, %v4358_v1  ;;  %v3840_v18 = vsel %vm1819_vm5, 1.0, %v4358_v1  ;;  %4094 = vmatprep.subr.mxu1 %v2669_v12 }
 0x10e   : > { %v2010_v60 = vadd.f32 %v3839_v2, %v1658_v5  ;;  %v2011_v35 = vadd.f32 %v3840_v18, %v1659_v22  ;;  %4095 = vmatpush3.msra.mxu1 %v2669_v12  ;;  %1093 = vperm.xlu0 %4312, %v5154_v40   ;;  %v3781_v22 = vsel %vm1472_vm8, 1.0, %v4358_v1 }
 0x10f   : > { %4096 = vmatprep.subr.mxu1 %v2668_v48 }
 0x110   : > { %v1383_v51 = vpop.permute.xlu1 %1382  ;;  %4097 = vmatpush3.msra.mxu1 %v2668_v48 }
 0x111   : > { %vm1468_vm9 = vcmp.eq.s32.totalorder %v4764_v21, %v1383_v51  ;;  %vm1469_vm10 = vcmp.eq.s32.totalorder %v4773_v24, %v1383_v51  ;;  %4279 = vset.pattern.permute.xlu1 %v4360_v9  ;;  %4098 = vmatprep.subr.mxu1 %v2667_v15 }
 0x112   : > { %v3777_v3 = vsel %vm1468_vm9, 1.0, %v4358_v1  ;;  %v3778_v16 = vsel %vm1469_vm10, 1.0, %v4358_v1  ;;  %2110 = vperm.xlu1 %4279, %v4596_v38   ;;  %v3906_v38 = vsel %vm2173_vm12, 1.0, %v4358_v1  ;;  %4099 = vmatpush3.msra.mxu1 %v2667_v15  ;;  %vm1473_vm9 = vcmp.eq.s32.totalorder %v4773_v24, %v4769_v23 }
 0x113   : > { %v1661_v8 = vadd.f32 %v3778_v16, %v3714_v58  ;;  %v1660_v28 = vadd.f32 %v3777_v3, %v3713_v53  ;;  %4317 = vset.pattern.permute.xlu0 %v4357_v0  ;;  %vm1123_vm10 = vcmp.eq.s32.totalorder %v4773_v24, %v5010_v50  ;;  %vm1122_vm12 = vcmp.eq.s32.totalorder %v4764_v21, %v5010_v50 }
 0x114   : > { %1797 = vperm.xlu0 %4317, %v5154_v40   ;;  %v3782_v23 = vsel %vm1473_vm9, 1.0, %v4358_v1  ;;  %v3719_v50 = vsel %vm1122_vm12, 1.0, %v4358_v1 }
 0x115   : > { %v2084_v4 = vpop.permute.xlu1 %2083  ;;  %v2013_v36 = vadd.f32 %v3842_v61, %v1661_v8  ;;  %v2012_v46 = vadd.f32 %v3841_v34, %v1660_v28 }
 0x116   : > { %vm2170_vm13 = vcmp.eq.s32.totalorder %v4764_v21, %v2084_v4  ;;  %vm2171_vm14 = vcmp.eq.s32.totalorder %v4773_v24, %v2084_v4  ;;  %4280 = vset.pattern.permute.xlu1 %v4359_v6 }
 0x117   : > { %v3903_v42 = vsel %vm2170_vm13, 1.0, %v4358_v1  ;;  %v3904_v43 = vsel %vm2171_vm14, 1.0, %v4358_v1  ;;  %1060 = vperm.xlu1 %4280, %v986_v14   ;;  %v2365_v56 = vadd.f32 %v3906_v38, %v2013_v36  ;;  %v2364_v7 = vadd.f32 %v3905_v52, %v2012_v46  ;;  %v4326_v36 = vld [vmem:[%s4455_s26 + $0xa0] sm:$0xff]  ;;  %v989_v46 = vld [vmem:[%s4455_s26 + $0xb0] sm:$0xff] }
 0x118   : > { %v2363_v44 = vadd.f32 %v3904_v43, %v2011_v35  ;;  %v2362_v31 = vadd.f32 %v3903_v42, %v2010_v60  ;;  %4320 = vset.pattern.permute.xlu0 %v4360_v9 }
 0x119   : > { %2149 = vperm.xlu0 %4320, %v5154_v40  }
 0x11a   : > { %2546 = vmatprep.mubr.f32.mxu0 %v2363_v44  ;;  %v1034_v55 = vpop.permute.xlu1 %1033 }
 0x11b   : > { %4281 = vset.pattern.permute.xlu1 %v4361_v11  ;;  %2547 = vmatmul.mubr.f32.gmra.mxu0 %v2362_v31  ;;  %vm1118_vm2 = vcmp.eq.s32.totalorder %v4764_v21, %v1034_v55  ;;  %vm1119_vm3 = vcmp.eq.s32.totalorder %v4773_v24, %v1034_v55 }
 0x11c   : > { %1412 = vperm.xlu1 %4281, %v986_v14   ;;  %2551 = vmatprep.mubr.f32.mxu0 %v2365_v56  ;;  %v3715_v62 = vsel %vm1118_vm2, 1.0, %v4358_v1  ;;  %v3716_v20 = vsel %vm1119_vm3, 1.0, %v4358_v1 }
 0x11d   : > { %4323 = vset.pattern.permute.xlu0 %v4359_v6 }
 0x11f   : > { %2552 = vmatmul.mubr.f32.gmra.mxu0 %v2364_v7  ;;  %v1386_v47 = vpop.permute.xlu1 %1385 }
 0x120   : > { %4282 = vset.pattern.permute.xlu1 %v4357_v0  ;;  %vm1470_vm0 = vcmp.eq.s32.totalorder %v4764_v21, %v1386_v47  ;;  %vm1471_vm1 = vcmp.eq.s32.totalorder %v4773_v24, %v1386_v47 }
 0x121   : > { %1764 = vperm.xlu1 %4282, %v986_v14   ;;  %v3779_v57 = vsel %vm1470_vm0, 1.0, %v4358_v1  ;;  %v3780_v49 = vsel %vm1471_vm1, 1.0, %v4358_v1 }
 0x122   : > { %v1662_v51 = vadd.f32 %v3779_v57, %v3715_v62  ;;  %v1663_v53 = vadd.f32 %v3780_v49, %v3716_v20 }
 0x124   : > { %v1738_v37 = vpop.permute.xlu1 %1737 }
 0x125   : > { %4283 = vset.pattern.permute.xlu1 %v4359_v6  ;;  %vm1822_vm4 = vcmp.eq.s32.totalorder %v4764_v21, %v1738_v37  ;;  %vm1823_vm6 = vcmp.eq.s32.totalorder %v4773_v24, %v1738_v37 }
 0x126   : > { %1063 = vperm.xlu1 %4283, %v4609_v41   ;;  %v3843_v58 = vsel %vm1822_vm4, 1.0, %v4358_v1  ;;  %v3844_v63 = vsel %vm1823_vm6, 1.0, %v4358_v1  ;;  %vm2179_vm4 = vcmp.eq.s32.totalorder %v4773_v24, %v4736_v10 }
 0x127   : > { %v2014_v2 = vadd.f32 %v3843_v58, %v1662_v51  ;;  %v2015_v3 = vadd.f32 %v3844_v63, %v1663_v53  ;;  %v3912_v30 = vsel %vm2179_vm4, 1.0, %v4358_v1  ;;  %vm1128_vm4 = vcmp.eq.s32.totalorder %v4764_v21, %v5047_v17 }
 0x129   : > { %v1037_v59 = vpop.permute.xlu1 %1036 }
 0x12a   : > { %4285 = vset.pattern.permute.xlu1 %v4360_v9  ;;  %vm1120_vm11 = vcmp.eq.s32.totalorder %v4764_v21, %v1037_v59  ;;  %vm1121_vm13 = vcmp.eq.s32.totalorder %v4773_v24, %v1037_v59 }
 0x12b   : > { %2116 = vperm.xlu1 %4285, %v986_v14   ;;  %v3720_v14 = vsel %vm1123_vm10, 1.0, %v4358_v1  ;;  %v3717_v60 = vsel %vm1120_vm11, 1.0, %v4358_v1  ;;  %v3718_v28 = vsel %vm1121_vm13, 1.0, %v4358_v1 }
 0x12c   : > { %v1664_v38 = vadd.f32 %v3781_v22, %v3717_v60  ;;  %v1665_v31 = vadd.f32 %v3782_v23, %v3718_v28 }
 0x12e   : > { %v2090_v25 = vpop.permute.xlu1 %2089 }
 0x12f   : > { %vm2174_vm7 = vcmp.eq.s32.totalorder %v4764_v21, %v2090_v25  ;;  %vm2175_vm5 = vcmp.eq.s32.totalorder %v4773_v24, %v2090_v25  ;;  %4286 = vset.pattern.permute.xlu1 %v4357_v0 }
 0x130   : > { %v3907_v16 = vsel %vm2174_vm7, 1.0, %v4358_v1  ;;  %v3908_v5 = vsel %vm2175_vm5, 1.0, %v4358_v1  ;;  %1767 = vperm.xlu1 %4286, %v4609_v41   ;;  %v1744_v41 = vpop.permute.xlu0 %1743  ;;  %vm2178_vm5 = vcmp.eq.s32.totalorder %v4764_v21, %v4736_v10 }
 0x131   : > { %v2367_v18 = vadd.f32 %v3908_v5, %v2015_v3  ;;  %v2366_v8 = vadd.f32 %v3907_v16, %v2014_v2  ;;  %vm1827_vm0 = vcmp.eq.s32.totalorder %v4773_v24, %v1744_v41  ;;  %vm1826_vm3 = vcmp.eq.s32.totalorder %v4764_v21, %v1744_v41 }
 0x132   : > { %v3848_v44 = vsel %vm1827_vm0, 1.0, %v4358_v1  ;;  %v3847_v56 = vsel %vm1826_vm3, 1.0, %v4358_v1  ;;  %v3911_v49 = vsel %vm2178_vm5, 1.0, %v4358_v1  ;;  %vm1478_vm0 = vcmp.eq.s32.totalorder %v4764_v21, %v4777_v26 }
 0x133   : > { %2556 = vmatprep.mubr.f32.mxu0 %v2367_v18  ;;  %v1741_v61 = vpop.permute.xlu1 %1740 }
 0x134   : > { %4287 = vset.pattern.permute.xlu1 %v4361_v11  ;;  %2557 = vmatmul.mubr.f32.gmra.mxu0 %v2366_v8  ;;  %vm1824_vm14 = vcmp.eq.s32.totalorder %v4764_v21, %v1741_v61  ;;  %vm1825_vm15 = vcmp.eq.s32.totalorder %v4773_v24, %v1741_v61  ;;  %v5228_v58 = vpop.permute.xlu0 %1752 }
 0x135   : > { %1418 = vperm.xlu1 %4287, %v4675_v54   ;;  %v3845_v34 = vsel %vm1824_vm14, 1.0, %v4358_v1  ;;  %v3846_v42 = vsel %vm1825_vm15, 1.0, %v4358_v1  ;;  %vm1833_vm5 = vcmp.eq.s32.totalorder %v4773_v24, %v5228_v58 }
 0x136   : > { %v2016_v52 = vadd.f32 %v3845_v34, %v1664_v38  ;;  %v2017_v47 = vadd.f32 %v3846_v42, %v1665_v31  ;;  %v4327_v38 = vld [vmem:[%s4455_s26 + $0xc0] sm:$0xff]  ;;  %v3787_v42 = vsel %vm1478_vm0, 1.0, %v4358_v1 }
 0x138   : > { %v1392_v54 = vpop.permute.xlu1 %1391  ;;  %v5231_v51 = vpop.permute.xlu0 %1761 }
 0x139   : > { %vm1474_vm1 = vcmp.eq.s32.totalorder %v4764_v21, %v1392_v54  ;;  %vm1475_vm2 = vcmp.eq.s32.totalorder %v4773_v24, %v1392_v54  ;;  %4288 = vset.pattern.permute.xlu1 %v4360_v9 }
 0x13a   : > { %v3783_v4 = vsel %vm1474_vm1, 1.0, %v4358_v1  ;;  %v3784_v35 = vsel %vm1475_vm2, 1.0, %v4358_v1  ;;  %2119 = vperm.xlu1 %4288, %v4326_v36   ;;  %vm1479_vm1 = vcmp.eq.s32.totalorder %v4773_v24, %v4777_v26  ;;  %vm1129_vm2 = vcmp.eq.s32.totalorder %v4773_v24, %v5047_v17 }
 0x13b   : > { %v1667_v43 = vadd.f32 %v3784_v35, %v3720_v14  ;;  %v1666_v55 = vadd.f32 %v3783_v4, %v3719_v50  ;;  %v3726_v26 = vsel %vm1129_vm2, 1.0, %v4358_v1  ;;  %v3725_v17 = vsel %vm1128_vm4, 1.0, %v4358_v1 }
 0x13c   : > { %v5237_v25 = vpop.permute.xlu0 %1770 }
 0x13d   : > { %v2093_v7 = vpop.permute.xlu1 %2092  ;;  %v2019_v37 = vadd.f32 %v3848_v44, %v1667_v43  ;;  %v2018_v57 = vadd.f32 %v3847_v56, %v1666_v55  ;;  %v3788_v43 = vsel %vm1479_vm1, 1.0, %v4358_v1 }
 0x13e   : > { %vm2176_vm6 = vcmp.eq.s32.totalorder %v4764_v21, %v2093_v7  ;;  %vm2177_vm7 = vcmp.eq.s32.totalorder %v4773_v24, %v2093_v7  ;;  %4289 = vset.pattern.permute.xlu1 %v4359_v6 }
 0x13f   : > { %v3909_v12 = vsel %vm2176_vm6, 1.0, %v4358_v1  ;;  %v3910_v48 = vsel %vm2177_vm7, 1.0, %v4358_v1  ;;  %1069 = vperm.xlu1 %4289, %v989_v46   ;;  %v2371_v20 = vadd.f32 %v3912_v30, %v2019_v37  ;;  %v2370_v10 = vadd.f32 %v3911_v49, %v2018_v57 }
 0x140   : > { %v2369_v15 = vadd.f32 %v3910_v48, %v2017_v47  ;;  %v2368_v59 = vadd.f32 %v3909_v12, %v2016_v52  ;;  %v5250_v23 = vpop.permute.xlu0 %1779  ;;  %v3854_v47 = vsel %vm1833_vm5, 1.0, %v4358_v1 }
 0x142   : > { %2561 = vmatprep.mubr.f32.mxu0 %v2369_v15  ;;  %v1043_v62 = vpop.permute.xlu1 %1042  ;;  %v992_v15 = vld [vmem:[%s4455_s26 + $0xc8] sm:$0xff] }
 0x143   : > { %4290 = vset.pattern.permute.xlu1 %v4361_v11  ;;  %2562 = vmatmul.mubr.f32.gmra.mxu0 %v2368_v59  ;;  %vm1124_vm10 = vcmp.eq.s32.totalorder %v4764_v21, %v1043_v62  ;;  %vm1125_vm11 = vcmp.eq.s32.totalorder %v4773_v24, %v1043_v62 }
 0x144   : > { %1421 = vperm.xlu1 %4290, %v989_v46   ;;  %2566 = vmatprep.mubr.f32.mxu0 %v2371_v20  ;;  %v3721_v5 = vsel %vm1124_vm10, 1.0, %v4358_v1  ;;  %v3722_v18 = vsel %vm1125_vm11, 1.0, %v4358_v1  ;;  %v5258_v36 = vpop.permute.xlu0 %1788  ;;  %vm1832_vm11 = vcmp.eq.s32.totalorder %v4764_v21, %v5228_v58 }
 0x145   : > { %v3853_v59 = vsel %vm1832_vm11, 1.0, %v4358_v1 }
 0x147   : > { %2567 = vmatmul.mubr.f32.gmra.mxu0 %v2370_v10  ;;  %v1395_v63 = vpop.permute.xlu1 %1394 }
 0x148   : > { %4291 = vset.pattern.permute.xlu1 %v4357_v0  ;;  %vm1476_vm8 = vcmp.eq.s32.totalorder %v4764_v21, %v1395_v63  ;;  %vm1477_vm9 = vcmp.eq.s32.totalorder %v4773_v24, %v1395_v63  ;;  %v2105_v52 = vpop.permute.xlu0 %2104 }
 0x149   : > { %1773 = vperm.xlu1 %4291, %v989_v46   ;;  %v3785_v3 = vsel %vm1476_vm8, 1.0, %v4358_v1  ;;  %v3786_v16 = vsel %vm1477_vm9, 1.0, %v4358_v1 }
 0x14a   : > { %v1668_v41 = vadd.f32 %v3785_v3, %v3721_v5  ;;  %v1669_v22 = vadd.f32 %v3786_v16, %v3722_v18 }
 0x14c   : > { %v1747_v53 = vpop.permute.xlu1 %1746 }
 0x14d   : > { %4292 = vset.pattern.permute.xlu1 %v4359_v6  ;;  %vm1828_vm12 = vcmp.eq.s32.totalorder %v4764_v21, %v1747_v53  ;;  %vm1829_vm13 = vcmp.eq.s32.totalorder %v4773_v24, %v1747_v53 }
 0x14e   : > { %1072 = vperm.xlu1 %4292, %v4780_v27   ;;  %v3849_v8 = vsel %vm1828_vm12, 1.0, %v4358_v1  ;;  %v3850_v61 = vsel %vm1829_vm13, 1.0, %v4358_v1  ;;  %vm2185_vm12 = vcmp.eq.s32.totalorder %v4773_v24, %v2105_v52 }
 0x14f   : > { %v2020_v60 = vadd.f32 %v3849_v8, %v1668_v41  ;;  %v2021_v54 = vadd.f32 %v3850_v61, %v1669_v22  ;;  %v3918_v58 = vsel %vm2185_vm12, 1.0, %v4358_v1  ;;  %vm1134_vm12 = vcmp.eq.s32.totalorder %v4764_v21, %v5059_v33 }
 0x151   : > { %v1046_v2 = vpop.permute.xlu1 %1045 }
 0x152   : > { %4293 = vset.pattern.permute.xlu1 %v4360_v9  ;;  %vm1126_vm3 = vcmp.eq.s32.totalorder %v4764_v21, %v1046_v2  ;;  %vm1127_vm6 = vcmp.eq.s32.totalorder %v4773_v24, %v1046_v2 }
 0x153   : > { %2125 = vperm.xlu1 %4293, %v989_v46   ;;  %v3723_v44 = vsel %vm1126_vm3, 1.0, %v4358_v1  ;;  %v3724_v46 = vsel %vm1127_vm6, 1.0, %v4358_v1 }
 0x154   : > { %v1670_v37 = vadd.f32 %v3787_v42, %v3723_v44  ;;  %v1671_v48 = vadd.f32 %v3788_v43, %v3724_v46 }
 0x156   : > { %v2099_v14 = vpop.permute.xlu1 %2098 }
 0x157   : > { %vm2180_vm14 = vcmp.eq.s32.totalorder %v4764_v21, %v2099_v14  ;;  %vm2181_vm15 = vcmp.eq.s32.totalorder %v4773_v24, %v2099_v14  ;;  %4294 = vset.pattern.permute.xlu1 %v4357_v0 }
 0x158   : > { %v3913_v50 = vsel %vm2180_vm14, 1.0, %v4358_v1  ;;  %v3914_v28 = vsel %vm2181_vm15, 1.0, %v4358_v1  ;;  %1776 = vperm.xlu1 %4294, %v4780_v27   ;;  %vm2184_vm15 = vcmp.eq.s32.totalorder %v4764_v21, %v2105_v52  ;;  %v4328_v52 = vld [vmem:[%s4455_s26 + $0xd8] sm:$0xff] }
 0x159   : > { %v2373_v34 = vadd.f32 %v3914_v28, %v2021_v54  ;;  %v2372_v4 = vadd.f32 %v3913_v50, %v2020_v60  ;;  %v3917_v16 = vsel %vm2184_vm15, 1.0, %v4358_v1  ;;  %vm1839_vm15 = vcmp.eq.s32.totalorder %v4773_v24, %v5231_v51 }
 0x15b   : > { %2571 = vmatprep.mubr.f32.mxu0 %v2373_v34  ;;  %v1750_v35 = vpop.permute.xlu1 %1749 }
 0x15c   : > { %4296 = vset.pattern.permute.xlu1 %v4361_v11  ;;  %2572 = vmatmul.mubr.f32.gmra.mxu0 %v2372_v4  ;;  %vm1830_vm7 = vcmp.eq.s32.totalorder %v4764_v21, %v1750_v35  ;;  %vm1831_vm8 = vcmp.eq.s32.totalorder %v4773_v24, %v1750_v35 }
 0x15d   : > { %1427 = vperm.xlu1 %4296, %v4327_v38   ;;  %v3851_v55 = vsel %vm1830_vm7, 1.0, %v4358_v1  ;;  %v3852_v30 = vsel %vm1831_vm8, 1.0, %v4358_v1  ;;  %vm1484_vm8 = vcmp.eq.s32.totalorder %v4764_v21, %v4804_v29 }
 0x15e   : > { %v2022_v57 = vadd.f32 %v3851_v55, %v1670_v37  ;;  %v2023_v20 = vadd.f32 %v3852_v30, %v1671_v48  ;;  %v3793_v55 = vsel %vm1484_vm8, 1.0, %v4358_v1  ;;  %v2114_v30 = vpop.permute.xlu0 %2113 }
 0x160   : > { %v1401_v31 = vpop.permute.xlu1 %1400 }
 0x161   : > { %vm1480_vm9 = vcmp.eq.s32.totalorder %v4764_v21, %v1401_v31  ;;  %vm1481_vm10 = vcmp.eq.s32.totalorder %v4773_v24, %v1401_v31  ;;  %4297 = vset.pattern.permute.xlu1 %v4360_v9 }
 0x162   : > { %v3789_v56 = vsel %vm1480_vm9, 1.0, %v4358_v1  ;;  %v3790_v7 = vsel %vm1481_vm10, 1.0, %v4358_v1  ;;  %2128 = vperm.xlu1 %4297, %v4780_v27   ;;  %vm1485_vm9 = vcmp.eq.s32.totalorder %v4773_v24, %v4804_v29  ;;  %vm1135_vm10 = vcmp.eq.s32.totalorder %v4773_v24, %v5059_v33 }
 0x163   : > { %v1673_v12 = vadd.f32 %v3790_v7, %v3726_v26  ;;  %v1672_v49 = vadd.f32 %v3789_v56, %v3725_v17  ;;  %v3794_v56 = vsel %vm1485_vm9, 1.0, %v4358_v1  ;;  %v3732_v29 = vsel %vm1135_vm10, 1.0, %v4358_v1 }
 0x164   : > { %v3731_v33 = vsel %vm1134_vm12, 1.0, %v4358_v1 }
 0x165   : > { %v2102_v62 = vpop.permute.xlu1 %2101  ;;  %v2025_v27 = vadd.f32 %v3854_v47, %v1673_v12  ;;  %v2024_v3 = vadd.f32 %v3853_v59, %v1672_v49  ;;  %v3860_v59 = vsel %vm1839_vm15, 1.0, %v4358_v1 }
 0x166   : > { %vm2182_vm13 = vcmp.eq.s32.totalorder %v4764_v21, %v2102_v62  ;;  %vm2183_vm14 = vcmp.eq.s32.totalorder %v4773_v24, %v2102_v62  ;;  %4298 = vset.pattern.permute.xlu1 %v4359_v6 }
 0x167   : > { %v3915_v10 = vsel %vm2182_vm13, 1.0, %v4358_v1  ;;  %v3916_v63 = vsel %vm2183_vm14, 1.0, %v4358_v1  ;;  %1078 = vperm.xlu1 %4298, %v992_v15   ;;  %v2377_v18 = vadd.f32 %v3918_v58, %v2025_v27  ;;  %v2376_v8 = vadd.f32 %v3917_v16, %v2024_v3  ;;  %v995_v27 = vld [vmem:[%s4455_s26 + $0xe0] sm:$0xff] }
 0x168   : > { %v2375_v53 = vadd.f32 %v3916_v63, %v2023_v20  ;;  %v2374_v2 = vadd.f32 %v3915_v10, %v2022_v57 }
 0x16a   : > { %2576 = vmatprep.mubr.f32.mxu0 %v2375_v53  ;;  %v1052_v5 = vpop.permute.xlu1 %1051 }
 0x16b   : > { %4299 = vset.pattern.permute.xlu1 %v4361_v11  ;;  %2577 = vmatmul.mubr.f32.gmra.mxu0 %v2374_v2  ;;  %vm1130_vm2 = vcmp.eq.s32.totalorder %v4764_v21, %v1052_v5  ;;  %vm1131_vm3 = vcmp.eq.s32.totalorder %v4773_v24, %v1052_v5 }
 0x16c   : > { %1430 = vperm.xlu1 %4299, %v992_v15   ;;  %2581 = vmatprep.mubr.f32.mxu0 %v2377_v18  ;;  %v3727_v54 = vsel %vm1130_vm2, 1.0, %v4358_v1  ;;  %v3728_v50 = vsel %vm1131_vm3, 1.0, %v4358_v1  ;;  %vm1838_vm3 = vcmp.eq.s32.totalorder %v4764_v21, %v5231_v51 }
 0x16d   : > { %v3859_v51 = vsel %vm1838_vm3, 1.0, %v4358_v1 }
 0x16f   : > { %2582 = vmatmul.mubr.f32.gmra.mxu0 %v2376_v8  ;;  %v1404_v61 = vpop.permute.xlu1 %1403 }
 0x170   : > { %4300 = vset.pattern.permute.xlu1 %v4357_v0  ;;  %vm1482_vm0 = vcmp.eq.s32.totalorder %v4764_v21, %v1404_v61  ;;  %vm1483_vm1 = vcmp.eq.s32.totalorder %v4773_v24, %v1404_v61 }
 0x171   : > { %1782 = vperm.xlu1 %4300, %v992_v15   ;;  %v3791_v14 = vsel %vm1482_vm0, 1.0, %v4358_v1  ;;  %v3792_v60 = vsel %vm1483_vm1, 1.0, %v4358_v1 }
 0x172   : > { %v1674_v4 = vadd.f32 %v3791_v14, %v3727_v54  ;;  %v1675_v35 = vadd.f32 %v3792_v60, %v3728_v50 }
 0x174   : > { %v1756_v41 = vpop.permute.xlu1 %1755 }
 0x175   : > { %4301 = vset.pattern.permute.xlu1 %v4359_v6  ;;  %vm1834_vm4 = vcmp.eq.s32.totalorder %v4764_v21, %v1756_v41  ;;  %vm1835_vm6 = vcmp.eq.s32.totalorder %v4773_v24, %v1756_v41 }
 0x176   : > { %1081 = vperm.xlu1 %4301, %v5053_v19   ;;  %v3855_v28 = vsel %vm1834_vm4, 1.0, %v4358_v1  ;;  %v3856_v34 = vsel %vm1835_vm6, 1.0, %v4358_v1  ;;  %vm2191_vm4 = vcmp.eq.s32.totalorder %v4773_v24, %v2114_v30 }
 0x177   : > { %v2026_v42 = vadd.f32 %v3855_v28, %v1674_v4  ;;  %v2027_v43 = vadd.f32 %v3856_v34, %v1675_v35  ;;  %v3924_v2 = vsel %vm2191_vm4, 1.0, %v4358_v1 }
 0x179   : > { %v1055_v22 = vpop.permute.xlu1 %1054 }
 0x17a   : > { %4302 = vset.pattern.permute.xlu1 %v4360_v9  ;;  %vm1132_vm11 = vcmp.eq.s32.totalorder %v4764_v21, %v1055_v22  ;;  %vm1133_vm13 = vcmp.eq.s32.totalorder %v4773_v24, %v1055_v22 }
 0x17b   : > { %2134 = vperm.xlu1 %4302, %v992_v15   ;;  %v3729_v7 = vsel %vm1132_vm11, 1.0, %v4358_v1  ;;  %v3730_v37 = vsel %vm1133_vm13, 1.0, %v4358_v1 }
 0x17c   : > { %v1676_v57 = vadd.f32 %v3793_v55, %v3729_v7  ;;  %v1677_v20 = vadd.f32 %v3794_v56, %v3730_v37 }
 0x17e   : > { %v2108_v38 = vpop.permute.xlu1 %2107 }
 0x17f   : > { %vm2186_vm7 = vcmp.eq.s32.totalorder %v4764_v21, %v2108_v38  ;;  %vm2187_vm5 = vcmp.eq.s32.totalorder %v4773_v24, %v2108_v38  ;;  %4303 = vset.pattern.permute.xlu1 %v4357_v0 }
 0x180   : > { %v3919_v26 = vsel %vm2186_vm7, 1.0, %v4358_v1  ;;  %v3920_v44 = vsel %vm2187_vm5, 1.0, %v4358_v1  ;;  %1785 = vperm.xlu1 %4303, %v5053_v19   ;;  %vm2190_vm5 = vcmp.eq.s32.totalorder %v4764_v21, %v2114_v30 }
 0x181   : > { %v2379_v31 = vadd.f32 %v3920_v44, %v2027_v43  ;;  %v2378_v17 = vadd.f32 %v3919_v26, %v2026_v42  ;;  %v3923_v61 = vsel %vm2190_vm5, 1.0, %v4358_v1 }
 0x183   : > { %2586 = vmatprep.mubr.f32.mxu0 %v2379_v31  ;;  %v1759_v46 = vpop.permute.xlu1 %1758 }
 0x184   : > { %4304 = vset.pattern.permute.xlu1 %v4361_v11  ;;  %2587 = vmatmul.mubr.f32.gmra.mxu0 %v2378_v17  ;;  %vm1836_vm14 = vcmp.eq.s32.totalorder %v4764_v21, %v1759_v46  ;;  %vm1837_vm0 = vcmp.eq.s32.totalorder %v4773_v24, %v1759_v46 }
 0x185   : > { %1436 = vperm.xlu1 %4304, %v4328_v52   ;;  %v3857_v12 = vsel %vm1836_vm14, 1.0, %v4358_v1  ;;  %v3858_v49 = vsel %vm1837_vm0, 1.0, %v4358_v1  ;;  %vm2678_vm14 = vcmask 261120  }
 0x186   : > { %v2028_v58 = vadd.f32 %v3857_v12, %v1676_v57  ;;  %v2029_v53 = vadd.f32 %v3858_v49, %v1677_v20 }
 0x188   : > { %v1410_v47 = vpop.permute.xlu1 %1409 }
 0x189   : > { %vm1486_vm1 = vcmp.eq.s32.totalorder %v4764_v21, %v1410_v47  ;;  %vm1487_vm2 = vcmp.eq.s32.totalorder %v4773_v24, %v1410_v47  ;;  %4305 = vset.pattern.permute.xlu1 %v4360_v9 }
 0x18a   : > { %v3795_v48 = vsel %vm1486_vm1, 1.0, %v4358_v1  ;;  %v3796_v15 = vsel %vm1487_vm2, 1.0, %v4358_v1  ;;  %2137 = vperm.xlu1 %4305, %v5053_v19   ;;  %vm1490_vm1 = vcmp.eq.s32.totalorder %v4764_v21, %v4841_v45  ;;  %vm1141_vm2 = vcmp.eq.s32.totalorder %v4773_v24, %v5072_v32 }
 0x18b   : > { %v1679_v62 = vadd.f32 %v3796_v15, %v3732_v29  ;;  %v1678_v10 = vadd.f32 %v3795_v48, %v3731_v33  ;;  %v3799_v12 = vsel %vm1490_vm1, 1.0, %v4358_v1  ;;  %v3738_v48 = vsel %vm1141_vm2, 1.0, %v4358_v1 }
 0x18d   : > { %v2111_v63 = vpop.permute.xlu1 %2110  ;;  %v2031_v19 = vadd.f32 %v3860_v59, %v1679_v62  ;;  %v2030_v8 = vadd.f32 %v3859_v51, %v1678_v10 }
 0x18e   : > { %vm2188_vm6 = vcmp.eq.s32.totalorder %v4764_v21, %v2111_v63  ;;  %vm2189_vm7 = vcmp.eq.s32.totalorder %v4773_v24, %v2111_v63  ;;  %4307 = vset.pattern.permute.xlu1 %v4359_v6 }
 0x18f   : > { %v3921_v3 = vsel %vm2188_vm6, 1.0, %v4358_v1  ;;  %v3922_v16 = vsel %vm2189_vm7, 1.0, %v4358_v1  ;;  %1087 = vperm.xlu1 %4307, %v995_v27   ;;  %v2383_v22 = vadd.f32 %v3924_v2, %v2031_v19  ;;  %v2382_v14 = vadd.f32 %v3923_v61, %v2030_v8  ;;  %v998_v2 = vld [vmem:[%s4455_s26 + $0xf8] sm:$0xff] }
 0x190   : > { %v2381_v5 = vadd.f32 %v3922_v16, %v2029_v53  ;;  %v2380_v18 = vadd.f32 %v3921_v3, %v2028_v58  ;;  %vm1491_vm6 = vcmp.eq.s32.totalorder %v4773_v24, %v4841_v45  ;;  %vm1140_vm7 = vcmp.eq.s32.totalorder %v4764_v21, %v5072_v32 }
 0x191   : > { %v3800_v32 = vsel %vm1491_vm6, 1.0, %v4358_v1  ;;  %v3737_v57 = vsel %vm1140_vm7, 1.0, %v4358_v1 }
 0x192   : > { %2591 = vmatprep.mubr.f32.mxu0 %v2381_v5  ;;  %v1061_v41 = vpop.permute.xlu1 %1060 }
 0x193   : > { %4308 = vset.pattern.permute.xlu1 %v4361_v11  ;;  %2592 = vmatmul.mubr.f32.gmra.mxu0 %v2380_v18  ;;  %vm1136_vm10 = vcmp.eq.s32.totalorder %v4764_v21, %v1061_v41  ;;  %vm1137_vm12 = vcmp.eq.s32.totalorder %v4773_v24, %v1061_v41 }
 0x194   : > { %1439 = vperm.xlu1 %4308, %v995_v27   ;;  %2596 = vmatprep.mubr.f32.mxu0 %v2383_v22  ;;  %v3733_v4 = vsel %vm1136_vm10, 1.0, %v4358_v1  ;;  %v3734_v38 = vsel %vm1137_vm12, 1.0, %v4358_v1  ;;  %vm1844_vm12 = vcmp.eq.s32.totalorder %v4764_v21, %v5237_v25 }
 0x195   : > { %v3865_v61 = vsel %vm1844_vm12, 1.0, %v4358_v1 }
 0x197   : > { %2597 = vmatmul.mubr.f32.gmra.mxu0 %v2382_v14  ;;  %v1413_v60 = vpop.permute.xlu1 %1412 }
 0x198   : > { %4310 = vset.pattern.permute.xlu1 %v4357_v0  ;;  %vm1488_vm8 = vcmp.eq.s32.totalorder %v4764_v21, %v1413_v60  ;;  %vm1489_vm9 = vcmp.eq.s32.totalorder %v4773_v24, %v1413_v60 }
 0x199   : > { %1791 = vperm.xlu1 %4310, %v995_v27   ;;  %v3797_v50 = vsel %vm1488_vm8, 1.0, %v4358_v1  ;;  %v3798_v34 = vsel %vm1489_vm9, 1.0, %v4358_v1  ;;  %vm1845_vm9 = vcmp.eq.s32.totalorder %v4773_v24, %v5237_v25 }
 0x19a   : > { %v1680_v42 = vadd.f32 %v3797_v50, %v3733_v4  ;;  %v1681_v26 = vadd.f32 %v3798_v34, %v3734_v38  ;;  %v3866_v53 = vsel %vm1845_vm9, 1.0, %v4358_v1 }
 0x19c   : > { %v1765_v54 = vpop.permute.xlu1 %1764 }
 0x19d   : > { %4311 = vset.pattern.permute.xlu1 %v4359_v6  ;;  %vm1840_vm11 = vcmp.eq.s32.totalorder %v4764_v21, %v1765_v54  ;;  %vm1841_vm13 = vcmp.eq.s32.totalorder %v4773_v24, %v1765_v54 }
 0x19e   : > { %1090 = vperm.xlu1 %4311, %v5066_v39   ;;  %v3861_v35 = vsel %vm1840_vm11, 1.0, %v4358_v1  ;;  %v3862_v43 = vsel %vm1841_vm13, 1.0, %v4358_v1 }
 0x19f   : > { %v2032_v44 = vadd.f32 %v3861_v35, %v1680_v42  ;;  %v2033_v46 = vadd.f32 %v3862_v43, %v1681_v26 }
 0x1a1   : > { %v1064_v28 = vpop.permute.xlu1 %1063 }
 0x1a2   : > { %4313 = vset.pattern.permute.xlu1 %v4360_v9  ;;  %vm1138_vm3 = vcmp.eq.s32.totalorder %v4764_v21, %v1064_v28  ;;  %vm1139_vm4 = vcmp.eq.s32.totalorder %v4773_v24, %v1064_v28 }
 0x1a3   : > { %2143 = vperm.xlu1 %4313, %v995_v27   ;;  %v3735_v15 = vsel %vm1138_vm3, 1.0, %v4358_v1  ;;  %v3736_v45 = vsel %vm1139_vm4, 1.0, %v4358_v1  ;;  %v2123_v27 = vpop.permute.xlu0 %2122 }
 0x1a4   : > { %v1682_v51 = vadd.f32 %v3799_v12, %v3735_v15  ;;  %vm2197_vm13 = vcmp.eq.s32.totalorder %v4773_v24, %v2123_v27  ;;  %vm2196_vm1 = vcmp.eq.s32.totalorder %v4764_v21, %v2123_v27 }
 0x1a5   : > { %v3930_v14 = vsel %vm2197_vm13, 1.0, %v4358_v1  ;;  %v3929_v35 = vsel %vm2196_vm1, 1.0, %v4358_v1 }
 0x1a6   : > { %v2508_v31 = vpop.f32.mrf.mxu0  ;;  %v2117_v17 = vpop.permute.xlu1 %2116 }
 0x1a7   : > { %vm2192_vm15 = vcmp.eq.s32.totalorder %v4764_v21, %v2117_v17  ;;  %vm2193_vm0 = vcmp.eq.s32.totalorder %v4773_v24, %v2117_v17  ;;  %4100 = vmatprep.mubr.msk.f32.mxu1 %vm2678_vm14, %v2508_v31  ;;  %4314 = vset.pattern.permute.xlu1 %v4357_v0 }
 0x1a8   : > { %v3925_v52 = vsel %vm2192_vm15, 1.0, %v4358_v1  ;;  %v3926_v55 = vsel %vm2193_vm0, 1.0, %v4358_v1  ;;  %v2510_v56 = vpop.f32.mrf.mxu0  ;;  %1794 = vperm.xlu1 %4314, %v5066_v39  }
 0x1a9   : > { %v2385_v29 = vadd.f32 %v3926_v55, %v2033_v46  ;;  %v2384_v7 = vadd.f32 %v3925_v52, %v2032_v44  ;;  %v5453_v46 = vpop.permute.xlu0 %2131 }
 0x1aa   : > { %v2513_v47 = vpop.f32.mrf.mxu0 }
 0x1ab   : > { %2601 = vmatprep.mubr.f32.mxu0 %v2385_v29  ;;  %4101 = vmatmul.mubr.msk.f32.vlgmr.msra.gmra.mxu1 %vm2678_vm14, %v2513_v47  ;;  %v1768_v33 = vpop.permute.xlu1 %1767 }
 0x1ac   : > { %v2515_v37 = vpop.f32.mrf.mxu0  ;;  %4315 = vset.pattern.permute.xlu1 %v4361_v11  ;;  %2602 = vmatmul.mubr.f32.gmra.mxu0 %v2384_v7  ;;  %vm1842_vm5 = vcmp.eq.s32.totalorder %v4764_v21, %v1768_v33  ;;  %vm1843_vm8 = vcmp.eq.s32.totalorder %v4773_v24, %v1768_v33 }
 0x1ad   : > { %1445 = vperm.xlu1 %4315, %v5154_v40   ;;  %v3863_v49 = vsel %vm1842_vm5, 1.0, %v4358_v1  ;;  %v3864_v58 = vsel %vm1843_vm8, 1.0, %v4358_v1  ;;  %v5468_v47 = vpop.permute.xlu0 %2140 }
 0x1ae   : > { %v2518_v30 = vpop.f32.mrf.mxu0  ;;  %v2034_v3 = vadd.f32 %v3863_v49, %v1682_v51 }
 0x1af   : > { %4103 = vmatprep.mubr.msk.f32.mxu1 %vm2678_vm14, %v2518_v30 }
 0x1b0   : > { %v2520_v40 = vpop.f32.mrf.mxu0  ;;  %v1419_v59 = vpop.permute.xlu1 %1418 }
 0x1b1   : > { %vm1492_vm10 = vcmp.eq.s32.totalorder %v4764_v21, %v1419_v59  ;;  %vm1493_vm11 = vcmp.eq.s32.totalorder %v4773_v24, %v1419_v59  ;;  %4316 = vset.pattern.permute.xlu1 %v4360_v9 }
 0x1b2   : > { %v3802_v62 = vsel %vm1493_vm11, 1.0, %v4358_v1  ;;  %v2523_v20 = vpop.f32.mrf.mxu0  ;;  %2146 = vperm.xlu1 %4316, %v5066_v39   ;;  %v3801_v10 = vsel %vm1492_vm10, 1.0, %v4358_v1  ;;  %v1683_v39 = vadd.f32 %v3800_v32, %v3736_v45  ;;  %vm1147_vm10 = vcmp.eq.s32.totalorder %v4773_v24, %v5088_v13 }
 0x1b3   : > { %v1685_v63 = vadd.f32 %v3802_v62, %v3738_v48  ;;  %4104 = vmatmul.mubr.msk.f32.gmra.mxu1 %vm2678_vm14, %v2523_v20  ;;  %v1684_v18 = vadd.f32 %v3801_v10, %v3737_v57  ;;  %v1425_v57 = vpop.permute.xlu0 %1424  ;;  %v3744_v62 = vsel %vm1147_vm10, 1.0, %v4358_v1  ;;  %vm2202_vm10 = vcmp.eq.s32.totalorder %v4764_v21, %v5453_v46 }
 0x1b4   : > { %v2525_v19 = vpop.f32.mrf.mxu0  ;;  %v2035_v5 = vadd.f32 %v3864_v58, %v1683_v39  ;;  %vm1496_vm11 = vcmp.eq.s32.totalorder %v4764_v21, %v1425_v57  ;;  %vm1497_vm13 = vcmp.eq.s32.totalorder %v4773_v24, %v1425_v57 }
 0x1b5   : > { %v2120_v16 = vpop.permute.xlu1 %2119  ;;  %v2037_v22 = vadd.f32 %v3866_v53, %v1685_v63  ;;  %v2036_v4 = vadd.f32 %v3865_v61, %v1684_v18  ;;  %v3805_v20 = vsel %vm1496_vm11, 1.0, %v4358_v1  ;;  %v3806_v58 = vsel %vm1497_vm13, 1.0, %v4358_v1 }
 0x1b6   : > { %vm2194_vm15 = vcmp.eq.s32.totalorder %v4764_v21, %v2120_v16  ;;  %vm2195_vm0 = vcmp.eq.s32.totalorder %v4773_v24, %v2120_v16  ;;  %v2528_v8 = vpop.f32.mrf.mxu0  ;;  %4318 = vset.pattern.permute.xlu1 %v4359_v6 }
 0x1b7   : > { %v3927_v25 = vsel %vm2194_vm15, 1.0, %v4358_v1  ;;  %v3928_v41 = vsel %vm2195_vm0, 1.0, %v4358_v1  ;;  %4106 = vmatprep.mubr.msk.f32.mxu1 %vm2678_vm14, %v2528_v8  ;;  %1096 = vperm.xlu1 %4318, %v998_v2   ;;  %v2389_v38 = vadd.f32 %v3930_v14, %v2037_v22  ;;  %v2388_v26 = vadd.f32 %v3929_v35, %v2036_v4 }
 0x1b8   : > { %v2530_v60 = vpop.f32.mrf.mxu0  ;;  %v2387_v54 = vadd.f32 %v3928_v41, %v2035_v5  ;;  %v2386_v50 = vadd.f32 %v3927_v25, %v2034_v3  ;;  %vm1146_vm0 = vcmp.eq.s32.totalorder %v4764_v21, %v5088_v13 }
 0x1b9   : > { %v3743_v18 = vsel %vm1146_vm0, 1.0, %v4358_v1 }
 0x1ba   : > { %v2533_v28 = vpop.f32.mrf.mxu0  ;;  %2606 = vmatprep.mubr.f32.mxu0 %v2387_v54  ;;  %v1070_v34 = vpop.permute.xlu1 %1069 }
 0x1bb   : > { %4107 = vmatmul.mubr.msk.f32.gmra.mxu1 %vm2678_vm14, %v2533_v28  ;;  %4319 = vset.pattern.permute.xlu1 %v4361_v11  ;;  %vm1142_vm4 = vcmp.eq.s32.totalorder %v4764_v21, %v1070_v34  ;;  %vm1143_vm6 = vcmp.eq.s32.totalorder %v4773_v24, %v1070_v34 }
 0x1bc   : > { %2607 = vmatmul.mubr.f32.gmra.mxu0 %v2386_v50  ;;  %v2535_v42 = vpop.f32.mrf.mxu0  ;;  %1448 = vperm.xlu1 %4319, %v998_v2   ;;  %v3739_v55 = vsel %vm1142_vm4, 1.0, %v4358_v1  ;;  %v3740_v56 = vsel %vm1143_vm6, 1.0, %v4358_v1 }
 0x1bd   : > { %2611 = vmatprep.mubr.f32.mxu0 %v2389_v38  ;;  %v3935_v42 = vsel %vm2202_vm10, 1.0, %v4358_v1 }
 0x1be   : > { %v2538_v43 = vpop.f32.mrf.mxu0 }
 0x1bf   : > { %4109 = vmatprep.mubr.msk.f32.mxu1 %vm2678_vm14, %v2538_v43  ;;  %v1422_v44 = vpop.permute.xlu1 %1421 }
 0x1c0   : > { %2612 = vmatmul.mubr.f32.gmra.mxu0 %v2388_v26  ;;  %v2540_v31 = vpop.f32.mrf.mxu0  ;;  %4321 = vset.pattern.permute.xlu1 %v4357_v0  ;;  %vm1494_vm2 = vcmp.eq.s32.totalorder %v4764_v21, %v1422_v44  ;;  %vm1495_vm3 = vcmp.eq.s32.totalorder %v4773_v24, %v1422_v44 }
 0x1c1   : > { %1800 = vperm.xlu1 %4321, %v998_v2   ;;  %v3803_v11 = vsel %vm1494_vm2, 1.0, %v4358_v1  ;;  %v3804_v52 = vsel %vm1495_vm3, 1.0, %v4358_v1  ;;  %vm1851_vm2 = vcmp.eq.s32.totalorder %v4773_v24, %v5250_v23 }
 0x1c2   : > { %v1686_v37 = vadd.f32 %v3803_v11, %v3739_v55  ;;  %v1687_v30 = vadd.f32 %v3804_v52, %v3740_v56  ;;  %v3872_v19 = vsel %vm1851_vm2, 1.0, %v4358_v1 }
 0x1c4   : > { %v1774_v17 = vpop.permute.xlu1 %1773 }
 0x1c5   : > { %4322 = vset.pattern.permute.xlu1 %v4360_v9  ;;  %vm1846_vm7 = vcmp.eq.s32.totalorder %v4764_v21, %v1774_v17  ;;  %vm1847_vm5 = vcmp.eq.s32.totalorder %v4773_v24, %v1774_v17 }
 0x1c6   : > { %2152 = vperm.xlu1 %4322, %v998_v2   ;;  %v3867_v29 = vsel %vm1846_vm7, 1.0, %v4358_v1  ;;  %v3868_v7 = vsel %vm1847_vm5, 1.0, %v4358_v1  ;;  %vm1850_vm7 = vcmp.eq.s32.totalorder %v4764_v21, %v5250_v23  ;;  %vm2203_vm5 = vcmp.eq.s32.totalorder %v4773_v24, %v5453_v46  ;;  %v1434_v46 = vpop.permute.xlu0 %1433 }
 0x1c7   : > { %v2038_v15 = vadd.f32 %v3867_v29, %v1686_v37  ;;  %v2039_v40 = vadd.f32 %v3868_v7, %v1687_v30  ;;  %v3871_v8 = vsel %vm1850_vm7, 1.0, %v4358_v1  ;;  %v3936_v13 = vsel %vm2203_vm5, 1.0, %v4358_v1 }
 0x1c8   : > { %vm1503_vm5 = vcmp.eq.s32.totalorder %v4773_v24, %v1434_v46 }
 0x1c9   : > { %v1073_v0 = vpop.permute.xlu1 %1072 }
 0x1ca   : > { %4324 = vset.pattern.permute.xlu1 %v4359_v6  ;;  %vm1144_vm12 = vcmp.eq.s32.totalorder %v4764_v21, %v1073_v0  ;;  %vm1145_vm15 = vcmp.eq.s32.totalorder %v4773_v24, %v1073_v0  ;;  %v5530_v37 = vpop.permute.xlu0 %1442 }
 0x1cb   : > { %v3741_v27 = vsel %vm1144_vm12, 1.0, %v4358_v1  ;;  %v3742_v10 = vsel %vm1145_vm15, 1.0, %v4358_v1 }
 0x1cc   : > { %v2543_v33 = vpop.f32.mrf.mxu0  ;;  %v1688_v2 = vadd.f32 %v3805_v20, %v3741_v27  ;;  %v1689_v23 = vadd.f32 %v3806_v58, %v3742_v10  ;;  %v3812_v10 = vsel %vm1503_vm5, 1.0, %v4358_v1 }
 0x1cd   : > { %4110 = vmatmul.mubr.msk.f32.gmra.mxu1 %vm2678_vm14, %v2543_v33 }
 0x1ce   : > { %v2545_v12 = vpop.f32.mrf.mxu0  ;;  %v2126_v48 = vpop.permute.xlu1 %2125 }
 0x1cf   : > { %vm2198_vm8 = vcmp.eq.s32.totalorder %v4764_v21, %v2126_v48  ;;  %vm2199_vm9 = vcmp.eq.s32.totalorder %v4773_v24, %v2126_v48 }
 0x1d0   : > { %v3931_v6 = vsel %vm2198_vm8, 1.0, %v4358_v1  ;;  %v3932_v59 = vsel %vm2199_vm9, 1.0, %v4358_v1 }
 0x1d1   : > { %v2391_v45 = vadd.f32 %v3932_v59, %v2039_v40  ;;  %v2390_v32 = vadd.f32 %v3931_v6, %v2038_v15 }
 0x1d3   : > { %2616 = vmatprep.mubr.f32.mxu0 %v2391_v45  ;;  %v1777_v49 = vpop.permute.xlu1 %1776 }
 0x1d4   : > { %2617 = vmatmul.mubr.f32.gmra.mxu0 %v2390_v32  ;;  %vm1848_vm1 = vcmp.eq.s32.totalorder %v4764_v21, %v1777_v49  ;;  %vm1849_vm3 = vcmp.eq.s32.totalorder %v4773_v24, %v1777_v49  ;;  %v1085_v49 = vpop.permute.xlu0 %1084 }
 0x1d5   : > { %v3869_v63 = vsel %vm1848_vm1, 1.0, %v4358_v1  ;;  %v3870_v3 = vsel %vm1849_vm3, 1.0, %v4358_v1  ;;  %vm1153_vm7 = vcmp.eq.s32.totalorder %v4773_v24, %v1085_v49 }
 0x1d6   : > { %v2040_v61 = vadd.f32 %v3869_v63, %v1688_v2  ;;  %v2041_v14 = vadd.f32 %v3870_v3, %v1689_v23 }
 0x1d8   : > { %v1428_v51 = vpop.permute.xlu1 %1427 }
 0x1d9   : > { %vm1498_vm4 = vcmp.eq.s32.totalorder %v4764_v21, %v1428_v51  ;;  %vm1499_vm6 = vcmp.eq.s32.totalorder %v4773_v24, %v1428_v51  ;;  %v3750_v51 = vsel %vm1153_vm7, 1.0, %v4358_v1 }
 0x1da   : > { %v3807_v53 = vsel %vm1498_vm4, 1.0, %v4358_v1  ;;  %v3808_v39 = vsel %vm1499_vm6, 1.0, %v4358_v1  ;;  %vm1502_vm4 = vcmp.eq.s32.totalorder %v4764_v21, %v1434_v46 }
 0x1db   : > { %v1691_v16 = vadd.f32 %v3808_v39, %v3744_v62  ;;  %v2548_v5 = vpop.f32.mrf.mxu0  ;;  %v1690_v25 = vadd.f32 %v3807_v53, %v3743_v18  ;;  %v3811_v20 = vsel %vm1502_vm4, 1.0, %v4358_v1  ;;  %vm2208_vm4 = vcmp.eq.s32.totalorder %v4764_v21, %v5468_v47 }
 0x1dc   : > { %4112 = vmatprep.mubr.msk.f32.mxu1 %vm2678_vm14, %v2548_v5 }
 0x1dd   : > { %v2550_v41 = vpop.f32.mrf.mxu0  ;;  %v2129_v22 = vpop.permute.xlu1 %2128  ;;  %v2043_v60 = vadd.f32 %v3872_v19, %v1691_v16  ;;  %v2042_v38 = vadd.f32 %v3871_v8, %v1690_v25 }
 0x1de   : > { %vm2200_vm8 = vcmp.eq.s32.totalorder %v4764_v21, %v2129_v22  ;;  %vm2201_vm9 = vcmp.eq.s32.totalorder %v4773_v24, %v2129_v22 }
 0x1df   : > { %v3933_v54 = vsel %vm2200_vm8, 1.0, %v4358_v1  ;;  %v3934_v50 = vsel %vm2201_vm9, 1.0, %v4358_v1  ;;  %v2553_v28 = vpop.f32.mrf.mxu0  ;;  %v2395_v26 = vadd.f32 %v3936_v13, %v2043_v60  ;;  %v2394_v44 = vadd.f32 %v3935_v42, %v2042_v38 }
 0x1e0   : > { %4113 = vmatmul.mubr.msk.f32.gmra.mxu1 %vm2678_vm14, %v2553_v28  ;;  %v2393_v34 = vadd.f32 %v3934_v50, %v2041_v14  ;;  %v2392_v4 = vadd.f32 %v3933_v54, %v2040_v61  ;;  %vm1857_vm9 = vcmp.eq.s32.totalorder %v4773_v24, %v5258_v36 }
 0x1e1   : > { %v2555_v35 = vpop.f32.mrf.mxu0  ;;  %v3878_v8 = vsel %vm1857_vm9, 1.0, %v4358_v1 }
 0x1e2   : > { %2621 = vmatprep.mubr.f32.mxu0 %v2393_v34  ;;  %v1079_v43 = vpop.permute.xlu1 %1078 }
 0x1e3   : > { %2622 = vmatmul.mubr.f32.gmra.mxu0 %v2392_v4  ;;  %vm1148_vm13 = vcmp.eq.s32.totalorder %v4764_v21, %v1079_v43  ;;  %vm1149_vm15 = vcmp.eq.s32.totalorder %v4773_v24, %v1079_v43 }
 0x1e4   : > { %2626 = vmatprep.mubr.f32.mxu0 %v2395_v26  ;;  %v3745_v55 = vsel %vm1148_vm13, 1.0, %v4358_v1  ;;  %v3746_v56 = vsel %vm1149_vm15, 1.0, %v4358_v1 }
 0x1e7   : > { %2627 = vmatmul.mubr.f32.gmra.mxu0 %v2394_v44  ;;  %v1431_v31 = vpop.permute.xlu1 %1430 }
 0x1e8   : > { %vm1500_vm11 = vcmp.eq.s32.totalorder %v4764_v21, %v1431_v31  ;;  %vm1501_vm12 = vcmp.eq.s32.totalorder %v4773_v24, %v1431_v31 }
 0x1e9   : > { %v3809_v11 = vsel %vm1500_vm11, 1.0, %v4358_v1  ;;  %v3810_v52 = vsel %vm1501_vm12, 1.0, %v4358_v1  ;;  %vm1152_vm11 = vcmp.eq.s32.totalorder %v4764_v21, %v1085_v49 }
 0x1ea   : > { %v1692_v30 = vadd.f32 %v3809_v11, %v3745_v55  ;;  %v1693_v12 = vadd.f32 %v3810_v52, %v3746_v56  ;;  %v3749_v39 = vsel %vm1152_vm11, 1.0, %v4358_v1 }
 0x1ec   : > { %v1783_v17 = vpop.permute.xlu1 %1782 }
 0x1ed   : > { %vm1852_vm0 = vcmp.eq.s32.totalorder %v4764_v21, %v1783_v17  ;;  %vm1853_vm1 = vcmp.eq.s32.totalorder %v4773_v24, %v1783_v17 }
 0x1ee   : > { %v3873_v29 = vsel %vm1852_vm0, 1.0, %v4358_v1  ;;  %v3874_v7 = vsel %vm1853_vm1, 1.0, %v4358_v1  ;;  %vm1856_vm0 = vcmp.eq.s32.totalorder %v4764_v21, %v5258_v36  ;;  %vm2209_vm1 = vcmp.eq.s32.totalorder %v4773_v24, %v5468_v47 }
 0x1ef   : > { %v2044_v40 = vadd.f32 %v3873_v29, %v1692_v30  ;;  %v2045_v6 = vadd.f32 %v3874_v7, %v1693_v12  ;;  %v3877_v28 = vsel %vm1856_vm0, 1.0, %v4358_v1  ;;  %v3942_v35 = vsel %vm2209_vm1, 1.0, %v4358_v1  ;;  %v1094_v30 = vpop.permute.xlu0 %1093 }
 0x1f0   : > { %v3941_v36 = vsel %vm2208_vm4, 1.0, %v4358_v1  ;;  %vm1159_vm1 = vcmp.eq.s32.totalorder %v4773_v24, %v1094_v30 }
 0x1f1   : > { %v1082_v0 = vpop.permute.xlu1 %1081 }
 0x1f2   : > { %vm1150_vm6 = vcmp.eq.s32.totalorder %v4764_v21, %v1082_v0  ;;  %vm1151_vm8 = vcmp.eq.s32.totalorder %v4773_v24, %v1082_v0 }
 0x1f3   : > { %v3747_v27 = vsel %vm1150_vm6, 1.0, %v4358_v1  ;;  %v3748_v63 = vsel %vm1151_vm8, 1.0, %v4358_v1  ;;  %v1798_v49 = vpop.permute.xlu0 %1797 }
 0x1f4   : > { %v2558_v33 = vpop.f32.mrf.mxu0  ;;  %v1694_v3 = vadd.f32 %v3811_v20, %v3747_v27  ;;  %v1695_v23 = vadd.f32 %v3812_v10, %v3748_v63 }
 0x1f5   : > { %4115 = vmatprep.mubr.msk.f32.mxu1 %vm2678_vm14, %v2558_v33 }
 0x1f6   : > { %v2560_v48 = vpop.f32.mrf.mxu0  ;;  %v2135_v15 = vpop.permute.xlu1 %2134 }
 0x1f7   : > { %vm2204_vm2 = vcmp.eq.s32.totalorder %v4764_v21, %v2135_v15  ;;  %vm2205_vm3 = vcmp.eq.s32.totalorder %v4773_v24, %v2135_v15  ;;  %v2150_v63 = vpop.permute.xlu0 %2149 }
 0x1f8   : > { %v3937_v59 = vsel %vm2204_vm2, 1.0, %v4358_v1  ;;  %v3938_v45 = vsel %vm2205_vm3, 1.0, %v4358_v1 }
 0x1f9   : > { %v2397_v32 = vadd.f32 %v3938_v45, %v2045_v6  ;;  %v2396_v57 = vadd.f32 %v3937_v59, %v2044_v40 }
 0x1fb   : > { %2631 = vmatprep.mubr.f32.mxu0 %v2397_v32  ;;  %v1786_v62 = vpop.permute.xlu1 %1785 }
 0x1fc   : > { %2632 = vmatmul.mubr.f32.gmra.mxu0 %v2396_v57  ;;  %vm1854_vm10 = vcmp.eq.s32.totalorder %v4764_v21, %v1786_v62  ;;  %vm1855_vm12 = vcmp.eq.s32.totalorder %v4773_v24, %v1786_v62 }
 0x1fd   : > { %v3875_v53 = vsel %vm1854_vm10, 1.0, %v4358_v1  ;;  %v3876_v16 = vsel %vm1855_vm12, 1.0, %v4358_v1 }
 0x1fe   : > { %v2046_v61 = vadd.f32 %v3875_v53, %v1694_v3  ;;  %v2047_v14 = vadd.f32 %v3876_v16, %v1695_v23 }
 0x200   : > { %v1437_v58 = vpop.permute.xlu1 %1436 }
 0x201   : > { %vm1504_vm13 = vcmp.eq.s32.totalorder %v4764_v21, %v1437_v58  ;;  %vm1505_vm15 = vcmp.eq.s32.totalorder %v4773_v24, %v1437_v58 }
 0x202   : > { %v3813_v19 = vsel %vm1504_vm13, 1.0, %v4358_v1  ;;  %v3814_v2 = vsel %vm1505_vm15, 1.0, %v4358_v1  ;;  %vm1508_vm13 = vcmp.eq.s32.totalorder %v4764_v21, %v5530_v37  ;;  %vm1509_vm15 = vcmp.eq.s32.totalorder %v4773_v24, %v5530_v37 }
 0x203   : > { %v1697_v5 = vadd.f32 %v3814_v2, %v3750_v51  ;;  %v2563_v18 = vpop.f32.mrf.mxu0  ;;  %v1696_v25 = vadd.f32 %v3813_v19, %v3749_v39  ;;  %v3817_v62 = vsel %vm1508_vm13, 1.0, %v4358_v1  ;;  %v3818_v20 = vsel %vm1509_vm15, 1.0, %v4358_v1 }
 0x204   : > { %4116 = vmatmul.mubr.msk.f32.gmra.mxu1 %vm2678_vm14, %v2563_v18  ;;  %v3756_v37 = vsel %vm1159_vm1, 1.0, %v4358_v1  ;;  %vm2214_vm13 = vcmp.eq.s32.totalorder %v4764_v21, %v2150_v63 }
 0x205   : > { %v2565_v41 = vpop.f32.mrf.mxu0  ;;  %v2138_v22 = vpop.permute.xlu1 %2137  ;;  %v2049_v60 = vadd.f32 %v3878_v8, %v1697_v5  ;;  %v2048_v42 = vadd.f32 %v3877_v28, %v1696_v25 }
 0x206   : > { %vm2206_vm2 = vcmp.eq.s32.totalorder %v4764_v21, %v2138_v22  ;;  %vm2207_vm3 = vcmp.eq.s32.totalorder %v4773_v24, %v2138_v22 }
 0x207   : > { %v3939_v13 = vsel %vm2206_vm2, 1.0, %v4358_v1  ;;  %v3940_v54 = vsel %vm2207_vm3, 1.0, %v4358_v1  ;;  %v2568_v50 = vpop.f32.mrf.mxu0  ;;  %v2401_v26 = vadd.f32 %v3942_v35, %v2049_v60  ;;  %v2400_v44 = vadd.f32 %v3941_v36, %v2048_v42 }
 0x208   : > { %4118 = vmatprep.mubr.msk.f32.mxu1 %vm2678_vm14, %v2568_v50  ;;  %v2399_v34 = vadd.f32 %v3940_v54, %v2047_v14  ;;  %v2398_v4 = vadd.f32 %v3939_v13, %v2046_v61  ;;  %vm1158_vm3 = vcmp.eq.s32.totalorder %v4764_v21, %v1094_v30  ;;  %v3947_v42 = vsel %vm2214_vm13, 1.0, %v4358_v1 }
 0x209   : > { %v2570_v38 = vpop.f32.mrf.mxu0  ;;  %v3755_v10 = vsel %vm1158_vm3, 1.0, %v4358_v1 }
 0x20a   : > { %2636 = vmatprep.mubr.f32.mxu0 %v2399_v34  ;;  %v1088_v43 = vpop.permute.xlu1 %1087 }
 0x20b   : > { %2637 = vmatmul.mubr.f32.gmra.mxu0 %v2398_v4  ;;  %vm1154_vm5 = vcmp.eq.s32.totalorder %v4764_v21, %v1088_v43  ;;  %vm1155_vm8 = vcmp.eq.s32.totalorder %v4773_v24, %v1088_v43 }
 0x20c   : > { %2641 = vmatprep.mubr.f32.mxu0 %v2401_v26  ;;  %v3751_v11 = vsel %vm1154_vm5, 1.0, %v4358_v1  ;;  %v3752_v52 = vsel %vm1155_vm8, 1.0, %v4358_v1 }
 0x20f   : > { %2642 = vmatmul.mubr.f32.gmra.mxu0 %v2400_v44  ;;  %v1440_v31 = vpop.permute.xlu1 %1439 }
 0x210   : > { %vm1506_vm6 = vcmp.eq.s32.totalorder %v4764_v21, %v1440_v31  ;;  %vm1507_vm7 = vcmp.eq.s32.totalorder %v4773_v24, %v1440_v31 }
 0x211   : > { %v3815_v46 = vsel %vm1506_vm6, 1.0, %v4358_v1  ;;  %v3816_v0 = vsel %vm1507_vm7, 1.0, %v4358_v1  ;;  %vm1863_vm7 = vcmp.eq.s32.totalorder %v4773_v24, %v1798_v49 }
 0x212   : > { %v1698_v7 = vadd.f32 %v3815_v46, %v3751_v11  ;;  %v1699_v33 = vadd.f32 %v3816_v0, %v3752_v52  ;;  %v3884_v16 = vsel %vm1863_vm7, 1.0, %v4358_v1 }
 0x214   : > { %v1792_v17 = vpop.permute.xlu1 %1791 }
 0x215   : > { %vm1858_vm9 = vcmp.eq.s32.totalorder %v4764_v21, %v1792_v17  ;;  %vm1859_vm10 = vcmp.eq.s32.totalorder %v4773_v24, %v1792_v17 }
 0x216   : > { %v3879_v55 = vsel %vm1858_vm9, 1.0, %v4358_v1  ;;  %v3880_v56 = vsel %vm1859_vm10, 1.0, %v4358_v1  ;;  %vm1862_vm9 = vcmp.eq.s32.totalorder %v4764_v21, %v1798_v49  ;;  %vm2215_vm10 = vcmp.eq.s32.totalorder %v4773_v24, %v2150_v63  ;;  %v3034_v49 = vld [vmem:[%s6599_s7 + $0x10] sm:$0xff] }
 0x217   : > { %v2050_v15 = vadd.f32 %v3879_v55, %v1698_v7  ;;  %v2051_v40 = vadd.f32 %v3880_v56, %v1699_v33  ;;  %v3883_v61 = vsel %vm1862_vm9, 1.0, %v4358_v1  ;;  %v3948_v13 = vsel %vm2215_vm10, 1.0, %v4358_v1 }
 0x218   : > { %v5678_v63 = vstv %s431_s17 }
 0x219   : > { %v1091_v47 = vpop.permute.xlu1 %1090 }
 0x21a   : > { %vm1156_vm0 = vcmp.eq.s32.totalorder %v4764_v21, %v1091_v47  ;;  %vm1157_vm2 = vcmp.eq.s32.totalorder %v4773_v24, %v1091_v47 }
 0x21b   : > { %v3753_v27 = vsel %vm1156_vm0, 1.0, %v4358_v1  ;;  %v3754_v58 = vsel %vm1157_vm2, 1.0, %v4358_v1 }
 0x21c   : > { %v2573_v29 = vpop.f32.mrf.mxu0  ;;  %v1700_v2 = vadd.f32 %v3817_v62, %v3753_v27  ;;  %v1701_v23 = vadd.f32 %v3818_v20, %v3754_v58  ;;  %v3032_v58 = vld [vmem:[%s6599_s7] sm:$0xff] }
 0x21d   : > { %4119 = vmatmul.mubr.msk.f32.gmra.mxu1 %vm2678_vm14, %v2573_v29 }
 0x21e   : > { %v2575_v12 = vpop.f32.mrf.mxu0  ;;  %v2144_v48 = vpop.permute.xlu1 %2143 }
 0x21f   : > { %vm2210_vm11 = vcmp.eq.s32.totalorder %v4764_v21, %v2144_v48  ;;  %vm2211_vm12 = vcmp.eq.s32.totalorder %v4773_v24, %v2144_v48 }
 0x220   : > { %v3943_v6 = vsel %vm2210_vm11, 1.0, %v4358_v1  ;;  %v3944_v59 = vsel %vm2211_vm12, 1.0, %v4358_v1 }
 0x221   : > { %v2403_v45 = vadd.f32 %v3944_v59, %v2051_v40  ;;  %v2402_v32 = vadd.f32 %v3943_v6, %v2050_v15 }
 0x223   : > { %2646 = vmatprep.mubr.f32.mxu0 %v2403_v45  ;;  %v1795_v57 = vpop.permute.xlu1 %1794 }
 0x224   : > { %2647 = vmatmul.mubr.f32.gmra.mxu0 %v2402_v32  ;;  %vm1860_vm4 = vcmp.eq.s32.totalorder %v4764_v21, %v1795_v57  ;;  %vm1861_vm6 = vcmp.eq.s32.totalorder %v4773_v24, %v1795_v57  ;;  %v3035_v57 = vld [vmem:[%s6599_s7 + $0x18] sm:$0xff] }
 0x225   : > { %v3881_v53 = vsel %vm1860_vm4, 1.0, %v4358_v1  ;;  %v3882_v3 = vsel %vm1861_vm6, 1.0, %v4358_v1  ;;  %4148 = vmatprep.subr.mxu1 %v3035_v57 }
 0x226   : > { %v2052_v8 = vadd.f32 %v3881_v53, %v1700_v2  ;;  %v2053_v14 = vadd.f32 %v3882_v3, %v1701_v23  ;;  %4149 = vmatpush3.msra.mxu1 %v3035_v57  ;;  %v416_v57 = vld [vmem:[%s5675_s24 + $0x88] sm:$0xff] }
 0x227   : > { %4150 = vmatprep.subr.mxu1 %v3034_v49 }
 0x228   : > { %v1446_v51 = vpop.permute.xlu1 %1445  ;;  %4151 = vmatpush3.msra.mxu1 %v3034_v49 }
 0x229   : > { %vm1510_vm5 = vcmp.eq.s32.totalorder %v4764_v21, %v1446_v51  ;;  %vm1511_vm8 = vcmp.eq.s32.totalorder %v4773_v24, %v1446_v51  ;;  %v3033_v51 = vld [vmem:[%s6599_s7 + $0x8] sm:$0xff] }
 0x22a   : > { %v3819_v39 = vsel %vm1510_vm5, 1.0, %v4358_v1  ;;  %v3820_v19 = vsel %vm1511_vm8, 1.0, %v4358_v1  ;;  %4152 = vmatprep.subr.mxu1 %v3033_v51 }
 0x22b   : > { %v1703_v5 = vadd.f32 %v3820_v19, %v3756_v37  ;;  %v2578_v18 = vpop.f32.mrf.mxu0  ;;  %v1702_v25 = vadd.f32 %v3819_v39, %v3755_v10  ;;  %4153 = vmatpush3.msra.mxu1 %v3033_v51  ;;  %v399_v10 = vld [vmem:[%s5675_s24] sm:$0xff]  ;;  %v5681_v39 = vstv %s3690_s20  ;;  %v400_v19 = vld [vmem:[%s5675_s24 + $0x8] sm:$0xff]  ;;  %v418_v51 = vld [vmem:[%s5675_s24 + $0x98] sm:$0xff] }
 0x22c   : > { %4121 = vmatprep.mubr.msk.f32.mxu1 %vm2678_vm14, %v2578_v18  ;;  %4154 = vmatprep.subr.mxu1 %v3032_v58  ;;  %v434_v53 = vmax.f32 %v5678_v63, %v399_v10  ;;  %v435_v3 = vmax.f32 %v5678_v63, %v400_v19  ;;  %v453_v10 = vmax.f32 %v5678_v63, %v418_v51 }
 0x22d   : > { %v2580_v41 = vpop.f32.mrf.mxu0  ;;  %v2147_v22 = vpop.permute.xlu1 %2146  ;;  %v2055_v60 = vadd.f32 %v3884_v16, %v1703_v5  ;;  %v2054_v35 = vadd.f32 %v3883_v61, %v1702_v25  ;;  %4155 = vmatpush3.msra.mxu1 %v3032_v58  ;;  %v402_v16 = vld [vmem:[%s5675_s24 + $0x18] sm:$0xff] }
 0x22e   : > { %vm2212_vm11 = vcmp.eq.s32.totalorder %v4764_v21, %v2147_v22  ;;  %vm2213_vm12 = vcmp.eq.s32.totalorder %v4773_v24, %v2147_v22  ;;  %v467_v2 = vmin.f32 %v5681_v39, %v434_v53  ;;  %v468_v5 = vmin.f32 %v5681_v39, %v435_v3  ;;  %v404_v22 = vld [vmem:[%s5675_s24 + $0x28] sm:$0xff]  ;;  %v417_v53 = vld [vmem:[%s5675_s24 + $0x90] sm:$0xff] }
 0x22f   : > { %v3945_v54 = vsel %vm2212_vm11, 1.0, %v4358_v1  ;;  %v3946_v50 = vsel %vm2213_vm12, 1.0, %v4358_v1  ;;  %v2583_v28 = vpop.f32.mrf.mxu0  ;;  %v2407_v43 = vadd.f32 %v3948_v13, %v2055_v60  ;;  %v2406_v36 = vadd.f32 %v3947_v42, %v2054_v35  ;;  %v403_v13 = vld [vmem:[%s5675_s24 + $0x20] sm:$0xff]  ;;  %v405_v35 = vld [vmem:[%s5675_s24 + $0x30] sm:$0xff]  ;;  %v420_v3 = vld [vmem:[%s5675_s24 + $0xa8] sm:$0xff] }
 0x230   : > { %4122 = vmatmul.mubr.msk.f32.gmra.mxu1 %vm2678_vm14, %v2583_v28  ;;  %v2405_v34 = vadd.f32 %v3946_v50, %v2053_v14  ;;  %v2404_v4 = vadd.f32 %v3945_v54, %v2052_v8  ;;  %509 = vperm.xlu0 %4323, %v467_v2   ;;  %v437_v18 = vmax.f32 %v5678_v63, %v402_v16  ;;  %v401_v8 = vld [vmem:[%s5675_s24 + $0x10] sm:$0xff]  ;;  %v406_v28 = vld [vmem:[%s5675_s24 + $0x38] sm:$0xff]  ;;  %v419_v16 = vld [vmem:[%s5675_s24 + $0xa0] sm:$0xff] }
 0x231   : > { %v2585_v38 = vpop.f32.mrf.mxu0  ;;  %514 = vperm.xlu1 %4324, %v468_v5   ;;  %v436_v25 = vmax.f32 %v5678_v63, %v401_v8  ;;  %v439_v60 = vmax.f32 %v5678_v63, %v404_v22  ;;  %v438_v50 = vmax.f32 %v5678_v63, %v403_v13  ;;  %v440_v42 = vmax.f32 %v5678_v63, %v405_v35  ;;  %v422_v5 = vld [vmem:[%s5675_s24 + $0xb8] sm:$0xff]  ;;  %v421_v8 = vld [vmem:[%s5675_s24 + $0xb0] sm:$0xff] }
 0x232   : > { %2651 = vmatprep.mubr.f32.mxu0 %v2405_v34  ;;  %v1097_v26 = vpop.permute.xlu1 %1096  ;;  %v470_v61 = vmin.f32 %v5681_v39, %v437_v18  ;;  %v486_v19 = vmin.f32 %v5681_v39, %v453_v10  ;;  %v452_v2 = vmax.f32 %v5678_v63, %v417_v53  ;;  %v455_v18 = vmax.f32 %v5678_v63, %v420_v3 }
 0x233   : > { %2652 = vmatmul.mubr.f32.gmra.mxu0 %v2404_v4  ;;  %vm1160_vm1 = vcmp.eq.s32.totalorder %v4764_v21, %v1097_v26  ;;  %vm1161_vm2 = vcmp.eq.s32.totalorder %v4773_v24, %v1097_v26  ;;  %v469_v14 = vmin.f32 %v5681_v39, %v436_v25  ;;  %v472_v54 = vmin.f32 %v5681_v39, %v439_v60 }
 0x234   : > { %2656 = vmatprep.mubr.f32.mxu0 %v2407_v43  ;;  %v3757_v46 = vsel %vm1160_vm1, 1.0, %v4358_v1  ;;  %v3758_v0 = vsel %vm1161_vm2, 1.0, %v4358_v1  ;;  %524 = vperm.xlu0 %4323, %v470_v61   ;;  %v471_v34 = vmin.f32 %v5681_v39, %v438_v50  ;;  %v441_v4 = vmax.f32 %v5678_v63, %v406_v28  ;;  %v408_v43 = vld [vmem:[%s5675_s24 + $0x48] sm:$0xff] }
 0x235   : > { %519 = vperm.xlu1 %4324, %v469_v14   ;;  %v473_v26 = vmin.f32 %v5681_v39, %v440_v42  ;;  %v485_v61 = vmin.f32 %v5681_v39, %v452_v2  ;;  %v457_v25 = vmax.f32 %v5678_v63, %v422_v5  ;;  %v456_v14 = vmax.f32 %v5678_v63, %v421_v8  ;;  %v424_v28 = vld [vmem:[%s5675_s24 + $0xc8] sm:$0xff]  ;;  %v426_v42 = vld [vmem:[%s5675_s24 + $0xd8] sm:$0xff] }
 0x236   : > { %v474_v38 = vmin.f32 %v5681_v39, %v441_v4  ;;  %v423_v4 = vld [vmem:[%s5675_s24 + $0xc0] sm:$0xff] }
 0x237   : > { %2657 = vmatmul.mubr.f32.gmra.mxu0 %v2406_v36  ;;  %v1449_v44 = vpop.permute.xlu1 %1448  ;;  %v443_v36 = vmax.f32 %v5678_v63, %v408_v43  ;;  %v490_v60 = vmin.f32 %v5681_v39, %v457_v25 }
 0x238   : > { %vm1512_vm15 = vcmp.eq.s32.totalorder %v4764_v21, %v1449_v44  ;;  %vm1513_vm0 = vcmp.eq.s32.totalorder %v4773_v24, %v1449_v44  ;;  %534 = vperm.xlu0 %4323, %v472_v54   ;;  %v407_v44 = vld [vmem:[%s5675_s24 + $0x40] sm:$0xff]  ;;  %v489_v54 = vmin.f32 %v5681_v39, %v456_v14 }
 0x239   : > { %v3821_v17 = vsel %vm1512_vm15, 1.0, %v4358_v1  ;;  %v3822_v47 = vsel %vm1513_vm0, 1.0, %v4358_v1  ;;  %529 = vperm.xlu1 %4324, %v471_v34   ;;  %v459_v34 = vmax.f32 %v5678_v63, %v424_v28 }
 0x23a   : > { %v1704_v55 = vadd.f32 %v3821_v17, %v3757_v46  ;;  %v1705_v56 = vadd.f32 %v3822_v47, %v3758_v0  ;;  %v442_v17 = vmax.f32 %v5678_v63, %v407_v44  ;;  %v410_v47 = vld [vmem:[%s5675_s24 + $0x58] sm:$0xff] }
 0x23b   : > { %v492_v35 = vmin.f32 %v5681_v39, %v459_v34 }
 0x23c   : > { %v1801_v31 = vpop.permute.xlu1 %1800  ;;  %544 = vperm.xlu0 %4323, %v474_v38   ;;  %v475_v0 = vmin.f32 %v5681_v39, %v442_v17  ;;  %v458_v38 = vmax.f32 %v5678_v63, %v423_v4  ;;  %v428_v17 = vld [vmem:[%s5675_s24 + $0xe8] sm:$0xff] }
 0x23d   : > { %vm1864_vm3 = vcmp.eq.s32.totalorder %v4764_v21, %v1801_v31  ;;  %vm1865_vm4 = vcmp.eq.s32.totalorder %v4773_v24, %v1801_v31  ;;  %539 = vperm.xlu1 %4324, %v473_v26   ;;  %v476_v31 = vmin.f32 %v5681_v39, %v443_v36  ;;  %v461_v26 = vmax.f32 %v5678_v63, %v426_v42  ;;  %v425_v36 = vld [vmem:[%s5675_s24 + $0xd0] sm:$0xff] }
 0x23e   : > { %v3885_v11 = vsel %vm1864_vm3, 1.0, %v4358_v1  ;;  %v3886_v52 = vsel %vm1865_vm4, 1.0, %v4358_v1  ;;  %v491_v43 = vmin.f32 %v5681_v39, %v458_v38 }
 0x23f   : > { %v2056_v7 = vadd.f32 %v3885_v11, %v1704_v55  ;;  %v2057_v33 = vadd.f32 %v3886_v52, %v1705_v56  ;;  %v445_v11 = vmax.f32 %v5678_v63, %v410_v47  ;;  %v409_v52 = vld [vmem:[%s5675_s24 + $0x50] sm:$0xff]  ;;  %v494_v44 = vmin.f32 %v5681_v39, %v461_v26 }
 0x240   : > { %554 = vperm.xlu0 %4323, %v476_v31   ;;  %v460_v31 = vmax.f32 %v5678_v63, %v425_v36 }
 0x241   : > { %v2153_v29 = vpop.permute.xlu1 %2152  ;;  %549 = vperm.xlu1 %4324, %v475_v0   ;;  %v478_v56 = vmin.f32 %v5681_v39, %v445_v11  ;;  %v427_v0 = vld [vmem:[%s5675_s24 + $0xe0] sm:$0xff] }
 0x242   : > { %vm2216_vm6 = vcmp.eq.s32.totalorder %v4764_v21, %v2153_v29  ;;  %vm2217_vm7 = vcmp.eq.s32.totalorder %v4773_v24, %v2153_v29  ;;  %v444_v29 = vmax.f32 %v5678_v63, %v409_v52  ;;  %v493_v47 = vmin.f32 %v5681_v39, %v460_v31 }
 0x243   : > { %v3949_v30 = vsel %vm2216_vm6, 1.0, %v4358_v1  ;;  %v3950_v12 = vsel %vm2217_vm7, 1.0, %v4358_v1  ;;  %v462_v52 = vmax.f32 %v5678_v63, %v427_v0 }
 0x244   : > { %v2408_v48 = vadd.f32 %v3949_v30, %v2056_v7  ;;  %v2409_v15 = vadd.f32 %v3950_v12, %v2057_v33  ;;  %v2588_v40 = vpop.f32.mrf.mxu0  ;;  %v412_v7 = vld [vmem:[%s5675_s24 + $0x68] sm:$0xff]  ;;  %564 = vperm.xlu0 %4323, %v478_v56   ;;  %v477_v30 = vmin.f32 %v5681_v39, %v444_v29  ;;  %v429_v56 = vld [vmem:[%s5675_s24 + $0xf0] sm:$0xff] }
 0x245   : > { %4124 = vmatprep.mubr.msk.f32.mxu1 %vm2678_vm14, %v2588_v40  ;;  %v447_v12 = vmax.f32 %v5678_v63, %v412_v7  ;;  %v464_v7 = vmax.f32 %v5678_v63, %v429_v56 }
 0x246   : > { %v2590_v6 = vpop.f32.mrf.mxu0  ;;  %2661 = vmatprep.mubr.f32.mxu0 %v2409_v15  ;;  %559 = vperm.xlu1 %4324, %v477_v30   ;;  %v495_v30 = vmin.f32 %v5681_v39, %v462_v52 }
 0x247   : > { %2662 = vmatmul.mubr.f32.gmra.mxu0 %v2408_v48  ;;  %v411_v48 = vld [vmem:[%s5675_s24 + $0x60] sm:$0xff]  ;;  %v480_v40 = vmin.f32 %v5681_v39, %v447_v12 }
 0x248   : > { %v446_v6 = vmax.f32 %v5678_v63, %v411_v48 }
 0x249   : > { %574 = vperm.xlu0 %4323, %v480_v40  }
 0x253   : > { %v2593_v59 = vpop.f32.mrf.mxu0 }
 0x254   : > { %4125 = vmatmul.mubr.msk.f32.gmra.mxu1 %vm2678_vm14, %v2593_v59  ;;  %v414_v59 = vld [vmem:[%s5675_s24 + $0x78] sm:$0xff] }
 0x255   : > { %v2595_v45 = vpop.f32.mrf.mxu0 }
 0x256   : > { %v479_v45 = vmin.f32 %v5681_v39, %v446_v6 }
 0x257   : > { %v2598_v32 = vpop.f32.mrf.mxu0 }
 0x258   : > { %4127 = vmatprep.mubr.msk.f32.mxu1 %vm2678_vm14, %v2598_v32  ;;  %v449_v32 = vmax.f32 %v5678_v63, %v414_v59  ;;  %569 = vperm.xlu1 %4324, %v479_v45  }
 0x259   : > { %v2600_v21 = vpop.f32.mrf.mxu0 }
 0x25a   : > { %v413_v21 = vld [vmem:[%s5675_s24 + $0x70] sm:$0xff] }
 0x26b   : > { %v4102_v45 = vpop.f32.mrf.mxu1 }
 0x26c   : > { %v2603_v24 = vpop.f32.mrf.mxu0 }
 0x26d   : > { %4128 = vmatmul.mubr.msk.f32.gmra.mxu1 %vm2678_vm14, %v2603_v24  ;;  %v482_v24 = vmin.f32 %v5681_v39, %v449_v32  ;;  %v2841_v32 = vpop.f32.mrf.mxu1 }
 0x26e   : > { %v2605_v1 = vpop.f32.mrf.mxu0 }
 0x26f   : > { %v448_v1 = vmax.f32 %v5678_v63, %v413_v21  ;;  %584 = vperm.xlu0 %4323, %v482_v24  }
 0x271   : > { %v481_v49 = vmin.f32 %v5681_v39, %v448_v1 }
 0x273   : > { %579 = vperm.xlu1 %4324, %v481_v49   ;;  %v4105_v21 = vpop.f32.mrf.mxu1 }
 0x275   : > { %v2851_v1 = vpop.f32.mrf.mxu1 }
 0x27c   : > { %v2608_v62 = vpop.f32.mrf.mxu0 }
 0x27d   : > { %4130 = vmatprep.mubr.msk.f32.mxu1 %vm2678_vm14, %v2608_v62  ;;  %v451_v62 = vmax.f32 %v5678_v63, %v416_v57  ;;  %v4108_v57 = vpop.f32.mrf.mxu1 }
 0x27e   : > { %v2610_v20 = vpop.f32.mrf.mxu0 }
 0x27f   : > { %v415_v20 = vld [vmem:[%s5675_s24 + $0x80] sm:$0xff] }
 0x280   : > { %v2613_v27 = vpop.f32.mrf.mxu0 }
 0x281   : > { %4131 = vmatmul.mubr.msk.f32.gmra.mxu1 %vm2678_vm14, %v2613_v27  ;;  %v484_v27 = vmin.f32 %v5681_v39, %v451_v62 }
 0x282   : > { %v2615_v37 = vpop.f32.mrf.mxu0 }
 0x283   : > { %v450_v37 = vmax.f32 %v5678_v63, %v415_v20  ;;  %594 = vperm.xlu0 %4323, %v484_v27   ;;  %v2861_v20 = vpop.f32.mrf.mxu1 }
 0x285   : > { %v483_v58 = vmin.f32 %v5681_v39, %v450_v37  ;;  %v5790_v37 = vld [vmem:[%s6598_s6] ss:$0 sm:$0xff] }
 0x286   : > { %v2847_v10 = vadd.f32 %v4102_v45, %v5790_v37  ;;  %v2852_v2 = vadd.f32 %v5790_v37, %v2851_v1  ;;  %v2867_v14 = vadd.f32 %v4108_v57, %v5790_v37 }
 0x287   : > { %589 = vperm.xlu1 %4324, %v483_v58   ;;  %604 = vperm.xlu0 %4323, %v486_v19   ;;  %v2842_v58 = vadd.f32 %v5790_v37, %v2841_v32 }
 0x288   : > { %v3002_v8 = vmax.f32 %v2852_v2, 0.0  ;;  %v3005_v36 = vmax.f32 %v2867_v14, 0.0 }
 0x289   : > { %v3000_v19 = vmax.f32 %v2842_v58, 0.0 }
 0x28b   : > { %599 = vperm.xlu1 %4324, %v485_v61   ;;  %v2862_v61 = vadd.f32 %v5790_v37, %v2861_v20 }
 0x28d   : > { %v4111_v27 = vpop.f32.mrf.mxu1  ;;  %v3004_v28 = vmax.f32 %v2862_v61, 0.0 }
 0x294   : > { %v2618_v23 = vpop.f32.mrf.mxu0 }
 0x295   : > { %4133 = vmatprep.mubr.msk.f32.mxu1 %vm2678_vm14, %v2618_v23  ;;  %v454_v23 = vmax.f32 %v5678_v63, %v419_v16 }
 0x296   : > { %v2620_v41 = vpop.f32.mrf.mxu0 }
 0x297   : > { %v488_v41 = vmin.f32 %v5681_v39, %v455_v18  ;;  %v487_v22 = vmin.f32 %v5681_v39, %v454_v23  ;;  %v3001_v18 = vmax.f32 %v2847_v10, 0.0  ;;  %v2857_v23 = vadd.f32 %v4105_v21, %v5790_v37 }
 0x299   : > { %614 = vperm.xlu0 %4323, %v488_v41   ;;  %609 = vperm.xlu1 %4324, %v487_v22   ;;  %v5803_v41 = vld [vmem:[%s6595_s3] ss:$0 sm:$0xff]  ;;  %v3003_v22 = vmax.f32 %v2857_v23, 0.0 }
 0x29d   : > { %624 = vperm.xlu0 %4323, %v490_v60   ;;  %619 = vperm.xlu1 %4324, %v489_v54   ;;  %v5817_v54 = vld [vmem:[%s6595_s3 + $0x2] ss:$0 sm:$0xff] }
 0x2a1   : > { %634 = vperm.xlu0 %4323, %v492_v35   ;;  %629 = vperm.xlu1 %4324, %v491_v43   ;;  %v2877_v35 = vadd.f32 %v4111_v27, %v5790_v37 }
 0x2a3   : > { %v2623_v46 = vpop.f32.mrf.mxu0  ;;  %v3007_v52 = vmax.f32 %v2877_v35, 0.0 }
 0x2a4   : > { %4134 = vmatmul.mubr.msk.f32.gmra.mxu1 %vm2678_vm14, %v2623_v46  ;;  %v463_v46 = vmax.f32 %v5678_v63, %v428_v17  ;;  %v5836_v17 = vld [vmem:[%s6595_s3 + $0x3] ss:$0 sm:$0xff] }
 0x2a5   : > { %v2625_v55 = vpop.f32.mrf.mxu0  ;;  %644 = vperm.xlu0 %4323, %v494_v44   ;;  %639 = vperm.xlu1 %4324, %v493_v47  }
 0x2a6   : > { %v496_v11 = vmin.f32 %v5681_v39, %v463_v46  ;;  %v430_v55 = vld [vmem:[%s5675_s24 + $0xf8] sm:$0xff] }
 0x2a7   : > { %v2628_v33 = vpop.f32.mrf.mxu0  ;;  %v465_v29 = vmax.f32 %v5678_v63, %v430_v55 }
 0x2a8   : > { %4136 = vmatprep.mubr.msk.f32.mxu1 %vm2678_vm14, %v2628_v33 }
 0x2a9   : > { %v2630_v15 = vpop.f32.mrf.mxu0  ;;  %654 = vperm.xlu0 %4323, %v496_v11   ;;  %v498_v12 = vmin.f32 %v5681_v39, %v465_v29  ;;  %649 = vperm.xlu1 %4324, %v495_v30  }
 0x2aa   : > { %v497_v15 = vmin.f32 %v5681_v39, %v464_v7 }
 0x2ac   : > { %v515_v42 = vpop.permute.xlu1 %514 }
 0x2ad   : > { %664 = vperm.xlu0 %4323, %v498_v12   ;;  %659 = vperm.xlu1 %4324, %v497_v15   ;;  %v768_v26 = vsub.f32 %v515_v42, %v5803_v41  ;;  %vm668_vm9 = vcmp.le.f32.partialorder %v5803_v41, %v515_v42 }
 0x2af   : > { %v804_v0 = vmul.f32 %v5817_v54, %v768_v26 }
 0x2b0   : > { %v520_v56 = vpop.permute.xlu1 %519 }
 0x2b1   : > { %4325 = vset.pattern.permute.xlu0 %v4360_v9  ;;  %v2871_v9 = vpop.f32.mrf.mxu1  ;;  %vm669_vm15 = vcmp.le.f32.partialorder %v5803_v41, %v520_v56  ;;  %v769_v15 = vsub.f32 %v520_v56, %v5803_v41 }
 0x2b2   : > { %v2872_v34 = vadd.f32 %v5790_v37, %v2871_v9 }
 0x2b3   : > { %v4114_v51 = vpop.f32.mrf.mxu1 }
 0x2b4   : > { %v5823_v38 = vadd.f32 %v4114_v51, %v5790_v37  ;;  %v3006_v47 = vmax.f32 %v2872_v34, 0.0  ;;  %v530_v57 = vpop.permute.xlu1 %529 }
 0x2b5   : > { %v2881_v53 = vpop.f32.mrf.mxu1  ;;  %vm671_vm6 = vcmp.le.f32.partialorder %v5803_v41, %v530_v57  ;;  %v771_v27 = vsub.f32 %v530_v57, %v5803_v41 }
 0x2b6   : > { %v2882_v46 = vadd.f32 %v5790_v37, %v2881_v53 }
 0x2b7   : > { %v807_v2 = vmul.f32 %v5817_v54, %v771_v27 }
 0x2b9   : > { %v843_v35 = vadd.f32 %v5836_v17, %v807_v2 }
 0x2bc   : > { %v2633_v13 = vpop.f32.mrf.mxu0 }
 0x2bd   : > { %4137 = vmatmul.mubr.msk.f32.gmra.mxu1 %vm2678_vm14, %v2633_v13  ;;  %v5812_v13 = vld [vmem:[%s6595_s3 + $0x1] ss:$0 sm:$0xff] }
 0x2be   : > { %v2635_v50 = vpop.f32.mrf.mxu0  ;;  %vm704_vm10 = vcmp.lt.f32.partialorder %v515_v42, %v5812_v13  ;;  %vm705_vm1 = vcmp.lt.f32.partialorder %v520_v56, %v5812_v13 }
 0x2bf   : > { %v510_v50 = vpop.permute.xlu0 %509  ;;  %vm5864_vm0 = vmand %vm668_vm9, %vm704_vm10 }
 0x2c0   : > { %v767_v4 = vsub.f32 %v510_v50, %v5803_v41  ;;  %vm667_vm5 = vcmp.le.f32.partialorder %v5803_v41, %v510_v50  ;;  %vm703_vm8 = vcmp.lt.f32.partialorder %v510_v50, %v5812_v13  ;;  %vm5898_vm7 = vmand %vm669_vm15, %vm705_vm1 }
 0x2c1   : > { %vm5850_vm13 = vmand %vm667_vm5, %vm703_vm8  ;;  %vm707_vm5 = vcmp.lt.f32.partialorder %v530_v57, %v5812_v13 }
 0x2c2   : > { %v803_v43 = vmul.f32 %v5817_v54, %v767_v4 }
 0x2c3   : > { %v525_v31 = vpop.permute.xlu0 %524 }
 0x2c4   : > { %v4117_v16 = vpop.f32.mrf.mxu1  ;;  %v770_v11 = vsub.f32 %v525_v31, %v5803_v41  ;;  %vm670_vm11 = vcmp.le.f32.partialorder %v5803_v41, %v525_v31  ;;  %vm706_vm12 = vcmp.lt.f32.partialorder %v525_v31, %v5812_v13  ;;  %v839_v7 = vadd.f32 %v5836_v17, %v803_v43 }
 0x2c5   : > { %v2897_v45 = vadd.f32 %v4117_v16, %v5790_v37  ;;  %vm5880_vm4 = vmand %vm670_vm11, %vm706_vm12 }
 0x2c6   : > { %v2891_v25 = vpop.f32.mrf.mxu1  ;;  %v806_v12 = vmul.f32 %v5817_v54, %v770_v11  ;;  %vm5935_vm12 = vmand %vm671_vm6, %vm707_vm5 }
 0x2c7   : > { %v2892_v30 = vadd.f32 %v5790_v37, %v2891_v25  ;;  %v875_v31 = vsel %vm5935_vm12, %v843_v35, 0.0 }
 0x2cb   : > { %v2638_v33 = vpop.f32.mrf.mxu0 }
 0x2cc   : > { %4139 = vmatprep.mubr.msk.f32.mxu1 %vm2678_vm14, %v2638_v33  ;;  %v3009_v33 = vmax.f32 %v5823_v38, 0.0 }
 0x2cd   : > { %v2640_v48 = vpop.f32.mrf.mxu0 }
 0x2cf   : > { %v2643_v40 = vpop.f32.mrf.mxu0 }
 0x2d0   : > { %4140 = vmatmul.mubr.msk.f32.gmra.mxu1 %vm2678_vm14, %v2643_v40  ;;  %v535_v40 = vpop.permute.xlu0 %534 }
 0x2d1   : > { %v2645_v6 = vpop.f32.mrf.mxu0  ;;  %vm672_vm2 = vcmp.le.f32.partialorder %v5803_v41, %v535_v40  ;;  %vm708_vm3 = vcmp.lt.f32.partialorder %v535_v40, %v5812_v13  ;;  %v772_v1 = vsub.f32 %v535_v40, %v5803_v41 }
 0x2d2   : > { %v871_v6 = vsel %vm5850_vm13, %v839_v7, 0.0  ;;  %vm5917_vm10 = vmand %vm672_vm2, %vm708_vm3 }
 0x2d3   : > { %903 = vadd.xlane.f32.xlu1 %v871_v6  ;;  %v808_v58 = vmul.f32 %v5817_v54, %v772_v1 }
 0x2d4   : > { %v545_v10 = vpop.permute.xlu0 %544 }
 0x2d5   : > { %vm674_vm8 = vcmp.le.f32.partialorder %v5803_v41, %v545_v10  ;;  %vm710_vm9 = vcmp.lt.f32.partialorder %v545_v10, %v5812_v13  ;;  %v844_v61 = vadd.f32 %v5836_v17, %v808_v58 }
 0x2d6   : > { %vm5948_vm15 = vmand %vm674_vm8, %vm710_vm9 }
 0x2d7   : > { %v876_v4 = vsel %vm5917_vm10, %v844_v61, 0.0 }
 0x2d8   : > { %v555_v34 = vpop.permute.xlu0 %554 }
 0x2d9   : > { %vm712_vm1 = vcmp.lt.f32.partialorder %v555_v34, %v5812_v13  ;;  %v776_v42 = vsub.f32 %v555_v34, %v5803_v41 }
 0x2db   : > { %v812_v11 = vmul.f32 %v5817_v54, %v776_v42 }
 0x2dc   : > { %v565_v29 = vpop.permute.xlu0 %564 }
 0x2dd   : > { %v5807_v60 = vpop.f32.mrf.mxu1  ;;  %vm714_vm5 = vcmp.lt.f32.partialorder %v565_v29, %v5812_v13 }
 0x2df   : > { %v2901_v44 = vpop.f32.mrf.mxu1 }
 0x2e0   : > { %v2902_v20 = vadd.f32 %v5790_v37, %v2901_v44 }
 0x2e2   : > { %v3012_v25 = vmax.f32 %v2902_v20, 0.0 }
 0x2e4   : > { %v2648_v63 = vpop.f32.mrf.mxu0 }
 0x2e5   : > { %4142 = vmatprep.mubr.msk.f32.mxu1 %vm2678_vm14, %v2648_v63  ;;  %v840_v63 = vadd.f32 %v5836_v17, %v804_v0 }
 0x2e6   : > { %v2650_v59 = vpop.f32.mrf.mxu0 }
 0x2e7   : > { %v3008_v59 = vmax.f32 %v2882_v46, 0.0 }
 0x2f0   : > { %v5841_v55 = vpop.f32.mrf.mxu1 }
 0x2f2   : > { %v2911_v21 = vpop.f32.mrf.mxu1 }
 0x2f3   : > { %v2653_v24 = vpop.f32.mrf.mxu0 }
 0x2f4   : > { %4143 = vmatmul.mubr.msk.f32.gmra.mxu1 %vm2678_vm14, %v2653_v24  ;;  %v805_v24 = vmul.f32 %v5817_v54, %v769_v15 }
 0x2f5   : > { %v2655_v39 = vpop.f32.mrf.mxu0 }
 0x2f6   : > { %v872_v39 = vsel %vm5864_vm0, %v840_v63, 0.0  ;;  %vm676_vm0 = vcmp.le.f32.partialorder %v5803_v41, %v555_v34 }
 0x2f7   : > { %v2658_v49 = vpop.f32.mrf.mxu0  ;;  %905 = vadd.xlane.f32.xlu0 %v872_v39  ;;  %vm5983_vm6 = vmand %vm676_vm0, %vm712_vm1 }
 0x2f8   : > { %4145 = vmatprep.mubr.msk.f32.mxu1 %vm2678_vm14, %v2658_v49  ;;  %v842_v49 = vadd.f32 %v5836_v17, %v806_v12  ;;  %v848_v12 = vadd.f32 %v5836_v17, %v812_v11 }
 0x2f9   : > { %v2660_v62 = vpop.f32.mrf.mxu0 }
 0x2fa   : > { %v3010_v62 = vmax.f32 %v2892_v30, 0.0  ;;  %v874_v53 = vsel %vm5880_vm4, %v842_v49, 0.0  ;;  %v778_v30 = vsub.f32 %v565_v29, %v5803_v41 }
 0x2fb   : > { %909 = vadd.xlane.f32.xlu1 %v874_v53 }
 0x2ff   : > { %913 = vadd.xlane.f32.xlu1 %v876_v4 }
 0x307   : > { %v2663_v3 = vpop.f32.mrf.mxu0 }
 0x308   : > { %4146 = vmatmul.mubr.msk.f32.gmra.mxu1 %vm2678_vm14, %v2663_v3  ;;  %v774_v3 = vsub.f32 %v545_v10, %v5803_v41 }
 0x309   : > { %v2665_v5 = vpop.f32.mrf.mxu0  ;;  %4156 = vmatprep.mubr.msk.f32.mxu1 %vm2678_vm14, %v3000_v19  ;;  %v841_v19 = vadd.f32 %v5836_v17, %v805_v24  ;;  %v575_v24 = vpop.permute.xlu0 %574 }
 0x30a   : > { %v3011_v5 = vmax.f32 %v2897_v45, 0.0  ;;  %v810_v14 = vmul.f32 %v5817_v54, %v774_v3  ;;  %v880_v45 = vsel %vm5983_vm6, %v848_v12, 0.0  ;;  %v780_v49 = vsub.f32 %v575_v24, %v5803_v41 }
 0x30b   : > { %v873_v23 = vsel %vm5898_vm7, %v841_v19, 0.0  ;;  %vm678_vm7 = vcmp.le.f32.partialorder %v5803_v41, %v565_v29  ;;  %vm680_vm12 = vcmp.le.f32.partialorder %v5803_v41, %v575_v24 }
 0x30c   : > { %4157 = vmatmul.mubr.msk.f32.vlgmr.msra.gmra.mxu1 %vm2678_vm14, %v3001_v18  ;;  %v2907_v18 = vadd.f32 %v5807_v60, %v5790_v37  ;;  %907 = vadd.xlane.f32.xlu0 %v873_v23  ;;  %v846_v43 = vadd.f32 %v5836_v17, %v810_v14  ;;  %v816_v58 = vmul.f32 %v5817_v54, %v780_v49 }
 0x30d   : > { %4159 = vmatprep.mubr.msk.f32.mxu1 %vm2678_vm14, %v3002_v8  ;;  %v540_v8 = vpop.permute.xlu1 %539  ;;  %v585_v2 = vpop.permute.xlu0 %584 }
 0x30e   : > { %vm673_vm11 = vcmp.le.f32.partialorder %v5803_v41, %v540_v8  ;;  %vm709_vm13 = vcmp.lt.f32.partialorder %v540_v8, %v5812_v13  ;;  %v3013_v26 = vmax.f32 %v2907_v18, 0.0  ;;  %v782_v16 = vsub.f32 %v585_v2, %v5803_v41 }
 0x30f   : > { %vm5971_vm2 = vmand %vm673_vm11, %vm709_vm13  ;;  %vm716_vm13 = vcmp.lt.f32.partialorder %v575_v24, %v5812_v13  ;;  %v852_v18 = vadd.f32 %v5836_v17, %v816_v58 }
 0x310   : > { %4160 = vmatmul.mubr.msk.f32.gmra.mxu1 %vm2678_vm14, %v3003_v22  ;;  %v2912_v22 = vadd.f32 %v5790_v37, %v2911_v21  ;;  %911 = vadd.xlane.f32.xlu0 %v875_v31  ;;  %vm6017_vm11 = vmand %vm678_vm7, %vm714_vm5 }
 0x311   : > { %4162 = vmatprep.mubr.msk.f32.mxu1 %vm2678_vm14, %v3004_v28  ;;  %v773_v28 = vsub.f32 %v540_v8, %v5803_v41 }
 0x312   : > { %v3014_v46 = vmax.f32 %v2912_v22, 0.0  ;;  %v818_v22 = vmul.f32 %v5817_v54, %v782_v16 }
 0x313   : > { %v809_v44 = vmul.f32 %v5817_v54, %v773_v28  ;;  %v595_v28 = vpop.permute.xlu0 %594 }
 0x314   : > { %4163 = vmatmul.mubr.msk.f32.gmra.mxu1 %vm2678_vm14, %v3005_v36  ;;  %v5902_v51 = vpop.f32.mrf.mxu1  ;;  %v2917_v36 = vadd.f32 %v5841_v55, %v5790_v37  ;;  %v784_v42 = vsub.f32 %v595_v28, %v5803_v41  ;;  %v854_v31 = vadd.f32 %v5836_v17, %v818_v22 }
 0x315   : > { %4165 = vmatprep.mubr.msk.f32.mxu1 %vm2678_vm14, %v3006_v47  ;;  %v550_v47 = vpop.permute.xlu1 %549  ;;  %v845_v7 = vadd.f32 %v5836_v17, %v809_v44  ;;  %v2927_v63 = vadd.f32 %v5902_v51, %v5790_v37 }
 0x316   : > { %v2921_v50 = vpop.f32.mrf.mxu1  ;;  %vm675_vm3 = vcmp.le.f32.partialorder %v5803_v41, %v550_v47  ;;  %vm711_vm4 = vcmp.lt.f32.partialorder %v550_v47, %v5812_v13  ;;  %v775_v56 = vsub.f32 %v550_v47, %v5803_v41  ;;  %v3015_v6 = vmax.f32 %v2917_v36, 0.0 }
 0x317   : > { %v2922_v0 = vadd.f32 %v5790_v37, %v2921_v50  ;;  %v877_v15 = vsel %vm5971_vm2, %v845_v7, 0.0  ;;  %vm6005_vm8 = vmand %vm675_vm3, %vm711_vm4  ;;  %v3017_v51 = vmax.f32 %v2927_v63, 0.0  ;;  %vm682_vm3 = vcmp.le.f32.partialorder %v5803_v41, %v585_v2  ;;  %v605_v55 = vpop.permute.xlu0 %604 }
 0x318   : > { %4166 = vmatmul.mubr.msk.f32.gmra.mxu1 %vm2678_vm14, %v3007_v52  ;;  %v878_v52 = vsel %vm5948_vm15, %v846_v43, 0.0  ;;  %v811_v48 = vmul.f32 %v5817_v54, %v775_v56  ;;  %915 = vadd.xlane.f32.xlu0 %v877_v15  ;;  %vm6050_vm2 = vmand %vm680_vm12, %vm716_vm13  ;;  %vm718_vm4 = vcmp.lt.f32.partialorder %v585_v2, %v5812_v13  ;;  %v820_v47 = vmul.f32 %v5817_v54, %v784_v42 }
 0x319   : > { %4168 = vmatprep.mubr.msk.f32.mxu1 %vm2678_vm14, %v3008_v59  ;;  %917 = vadd.xlane.f32.xlu1 %v878_v52  ;;  %v560_v40 = vpop.permute.xlu1 %559  ;;  %v814_v59 = vmul.f32 %v5817_v54, %v778_v30  ;;  %v3016_v57 = vmax.f32 %v2922_v0, 0.0  ;;  %v884_v34 = vsel %vm6050_vm2, %v852_v18, 0.0 }
 0x31a   : > { %vm677_vm9 = vcmp.le.f32.partialorder %v5803_v41, %v560_v40  ;;  %vm713_vm10 = vcmp.lt.f32.partialorder %v560_v40, %v5812_v13  ;;  %v777_v21 = vsub.f32 %v560_v40, %v5803_v41  ;;  %v847_v1 = vadd.f32 %v5836_v17, %v811_v48 }
 0x31b   : > { %vm6037_vm15 = vmand %vm677_vm9, %vm713_vm10  ;;  %vm720_vm10 = vcmp.lt.f32.partialorder %v595_v28, %v5812_v13  ;;  %v856_v15 = vadd.f32 %v5836_v17, %v820_v47  ;;  %v615_v63 = vpop.permute.xlu0 %614 }
 0x31c   : > { %4169 = vmatmul.mubr.msk.f32.gmra.mxu1 %vm2678_vm14, %v3009_v33  ;;  %v813_v20 = vmul.f32 %v5817_v54, %v777_v21  ;;  %v879_v27 = vsel %vm6005_vm8, %v847_v1, 0.0  ;;  %vm684_vm8 = vcmp.le.f32.partialorder %v5803_v41, %v595_v28  ;;  %vm6084_vm9 = vmand %vm682_vm3, %vm718_vm4  ;;  %v786_v33 = vsub.f32 %v605_v55, %v5803_v41 }
 0x31d   : > { %4171 = vmatprep.mubr.msk.f32.mxu1 %vm2678_vm14, %v3010_v62  ;;  %921 = vadd.xlane.f32.xlu1 %v880_v45  ;;  %v850_v62 = vadd.f32 %v5836_v17, %v814_v59  ;;  %v570_v9 = vpop.permute.xlu1 %569  ;;  %v886_v56 = vsel %vm6084_vm9, %v854_v31, 0.0  ;;  %v788_v32 = vsub.f32 %v615_v63, %v5803_v41 }
 0x31e   : > { %919 = vadd.xlane.f32.xlu0 %v879_v27  ;;  %vm679_vm0 = vcmp.le.f32.partialorder %v5803_v41, %v570_v9  ;;  %vm715_vm1 = vcmp.lt.f32.partialorder %v570_v9, %v5812_v13  ;;  %v779_v19 = vsub.f32 %v570_v9, %v5803_v41  ;;  %v849_v3 = vadd.f32 %v5836_v17, %v813_v20 }
 0x31f   : > { %v882_v10 = vsel %vm6017_vm11, %v850_v62, 0.0  ;;  %vm6068_vm7 = vmand %vm679_vm0, %vm715_vm1  ;;  %vm686_vm0 = vcmp.le.f32.partialorder %v5803_v41, %v605_v55  ;;  %vm722_vm1 = vcmp.lt.f32.partialorder %v605_v55, %v5812_v13  ;;  %v822_v40 = vmul.f32 %v5817_v54, %v786_v33  ;;  %v625_v20 = vpop.permute.xlu0 %624 }
 0x320   : > { %4172 = vmatmul.mubr.msk.f32.gmra.mxu1 %vm2678_vm14, %v3011_v5  ;;  %v815_v23 = vmul.f32 %v5817_v54, %v779_v19  ;;  %v881_v8 = vsel %vm6037_vm15, %v849_v3, 0.0  ;;  %vm6114_vm15 = vmand %vm684_vm8, %vm720_vm10  ;;  %v790_v58 = vsub.f32 %v625_v20, %v5803_v41 }
 0x321   : > { %4174 = vmatprep.mubr.msk.f32.mxu1 %vm2678_vm14, %v3012_v25  ;;  %925 = vadd.xlane.f32.xlu1 %v882_v10  ;;  %v580_v61 = vpop.permute.xlu1 %579  ;;  %v888_v59 = vsel %vm6114_vm15, %v856_v15, 0.0  ;;  %v858_v21 = vadd.f32 %v5836_v17, %v822_v40 }
 0x322   : > { %923 = vadd.xlane.f32.xlu0 %v881_v8  ;;  %vm681_vm6 = vcmp.le.f32.partialorder %v5803_v41, %v580_v61  ;;  %v781_v14 = vsub.f32 %v580_v61, %v5803_v41  ;;  %vm717_vm5 = vcmp.lt.f32.partialorder %v580_v61, %v5812_v13  ;;  %v851_v4 = vadd.f32 %v5836_v17, %v815_v23 }
 0x323   : > { %vm6099_vm11 = vmand %vm681_vm6, %vm717_vm5  ;;  %vm688_vm6 = vcmp.le.f32.partialorder %v5803_v41, %v615_v63  ;;  %v826_v3 = vmul.f32 %v5817_v54, %v790_v58  ;;  %v635_v18 = vpop.permute.xlu0 %634 }
 0x324   : > { %4175 = vmatmul.mubr.msk.f32.gmra.mxu1 %vm2678_vm14, %v3013_v26  ;;  %v817_v38 = vmul.f32 %v5817_v54, %v781_v14  ;;  %v883_v36 = vsel %vm6068_vm7, %v851_v4, 0.0  ;;  %vm724_vm7 = vcmp.lt.f32.partialorder %v615_v63, %v5812_v13  ;;  %vm754_vm5 = vmand %vm686_vm0, %vm722_vm1 }
 0x325   : > { %4177 = vmatprep.mubr.msk.f32.mxu1 %vm2678_vm14, %v3014_v46  ;;  %929 = vadd.xlane.f32.xlu1 %v884_v34  ;;  %v590_v44 = vpop.permute.xlu1 %589  ;;  %v890_v27 = vsel %vm754_vm5, %v858_v21, 0.0 }
 0x326   : > { %927 = vadd.xlane.f32.xlu0 %v883_v36  ;;  %v783_v46 = vsub.f32 %v590_v44, %v5803_v41  ;;  %v853_v29 = vadd.f32 %v5836_v17, %v817_v38  ;;  %vm683_vm12 = vcmp.le.f32.partialorder %v5803_v41, %v590_v44  ;;  %vm719_vm13 = vcmp.lt.f32.partialorder %v590_v44, %v5812_v13 }
 0x327   : > { %vm751_vm4 = vmand %vm683_vm12, %vm719_vm13  ;;  %vm690_vm12 = vcmp.le.f32.partialorder %v5803_v41, %v625_v20  ;;  %vm726_vm13 = vcmp.lt.f32.partialorder %v625_v20, %v5812_v13  ;;  %v645_v42 = vpop.permute.xlu0 %644 }
 0x328   : > { %4178 = vmatmul.mubr.msk.f32.gmra.mxu1 %vm2678_vm14, %v3015_v6  ;;  %v819_v7 = vmul.f32 %v5817_v54, %v783_v46  ;;  %v885_v12 = vsel %vm6099_vm11, %v853_v29, 0.0  ;;  %vm6164_vm11 = vmand %vm688_vm6, %vm724_vm7  ;;  %v794_v31 = vsub.f32 %v645_v42, %v5803_v41 }
 0x329   : > { %4180 = vmatprep.mubr.msk.f32.mxu1 %vm2678_vm14, %v3016_v57  ;;  %933 = vadd.xlane.f32.xlu1 %v886_v56  ;;  %v600_v48 = vpop.permute.xlu1 %599  ;;  %v824_v57 = vmul.f32 %v5817_v54, %v788_v32 }
 0x32a   : > { %931 = vadd.xlane.f32.xlu0 %v885_v12  ;;  %vm685_vm2 = vcmp.le.f32.partialorder %v5803_v41, %v600_v48  ;;  %vm721_vm3 = vcmp.lt.f32.partialorder %v600_v48, %v5812_v13  ;;  %v785_v6 = vsub.f32 %v600_v48, %v5803_v41  ;;  %v855_v45 = vadd.f32 %v5836_v17, %v819_v7 }
 0x32b   : > { %vm6151_vm8 = vmand %vm685_vm2, %vm721_vm3  ;;  %v860_v2 = vadd.f32 %v5836_v17, %v824_v57  ;;  %vm692_vm3 = vcmp.le.f32.partialorder %v5803_v41, %v635_v18  ;;  %v830_v55 = vmul.f32 %v5817_v54, %v794_v31  ;;  %v655_v30 = vpop.permute.xlu0 %654 }
 0x32c   : > { %4181 = vmatmul.mubr.msk.f32.gmra.mxu1 %vm2678_vm14, %v3017_v51  ;;  %v821_v24 = vmul.f32 %v5817_v54, %v785_v6  ;;  %v887_v1 = vsel %vm751_vm4, %v855_v45, 0.0  ;;  %vm6194_vm2 = vmand %vm690_vm12, %vm726_vm13  ;;  %vm728_vm4 = vcmp.lt.f32.partialorder %v635_v18, %v5812_v13  ;;  %v796_v40 = vsub.f32 %v655_v30, %v5803_v41 }
 0x32d   : > { %v4129_v25 = vpop.f32.mrf.mxu1  ;;  %937 = vadd.xlane.f32.xlu1 %v888_v59  ;;  %v610_v39 = vpop.permute.xlu1 %609  ;;  %v892_v23 = vsel %vm6164_vm11, %v860_v2, 0.0  ;;  %v866_v45 = vadd.f32 %v5836_v17, %v830_v55 }
 0x32e   : > { %v2937_v50 = vadd.f32 %v4129_v25, %v5790_v37  ;;  %935 = vadd.xlane.f32.xlu0 %v887_v1  ;;  %v787_v49 = vsub.f32 %v610_v39, %v5803_v41  ;;  %vm687_vm9 = vcmp.le.f32.partialorder %v5803_v41, %v610_v39  ;;  %vm723_vm10 = vcmp.lt.f32.partialorder %v610_v39, %v5812_v13 }
 0x32f   : > { %v2931_v35 = vpop.f32.mrf.mxu1  ;;  %v857_v9 = vadd.f32 %v5836_v17, %v821_v24  ;;  %vm6179_vm15 = vmand %vm687_vm9, %vm723_vm10  ;;  %v792_v25 = vsub.f32 %v635_v18, %v5803_v41  ;;  %vm730_vm10 = vcmp.lt.f32.partialorder %v645_v42, %v5812_v13  ;;  %v832_v32 = vmul.f32 %v5817_v54, %v796_v40  ;;  %v665_v24 = vpop.permute.xlu0 %664 }
 0x330   : > { %v2932_v26 = vadd.f32 %v5790_v37, %v2931_v35  ;;  %v3019_v11 = vmax.f32 %v2937_v50, 0.0  ;;  %v823_v51 = vmul.f32 %v5817_v54, %v787_v49  ;;  %v862_v50 = vadd.f32 %v5836_v17, %v826_v3  ;;  %vm6226_vm9 = vmand %vm692_vm3, %vm728_vm4 }
 0x331   : > { %941 = vadd.xlane.f32.xlu1 %v890_v27  ;;  %v889_v53 = vsel %vm6151_vm8, %v857_v9, 0.0  ;;  %v620_v19 = vpop.permute.xlu1 %619  ;;  %v828_v34 = vmul.f32 %v5817_v54, %v792_v25  ;;  %vm694_vm8 = vcmp.le.f32.partialorder %v5803_v41, %v645_v42  ;;  %v798_v57 = vsub.f32 %v665_v24, %v5803_v41 }
 0x332   : > { %v3018_v52 = vmax.f32 %v2932_v26, 0.0  ;;  %939 = vadd.xlane.f32.xlu0 %v889_v53  ;;  %v789_v16 = vsub.f32 %v620_v19, %v5803_v41  ;;  %vm689_vm0 = vcmp.le.f32.partialorder %v5803_v41, %v620_v19  ;;  %vm725_vm1 = vcmp.lt.f32.partialorder %v620_v19, %v5812_v13 }
 0x333   : > { %v859_v8 = vadd.f32 %v5836_v17, %v823_v51  ;;  %vm6210_vm7 = vmand %vm689_vm0, %vm725_vm1  ;;  %v894_v43 = vsel %vm6194_vm2, %v862_v50, 0.0  ;;  %vm696_vm0 = vcmp.le.f32.partialorder %v5803_v41, %v655_v30  ;;  %vm732_vm1 = vcmp.lt.f32.partialorder %v655_v30, %v5812_v13 }
 0x334   : > { %4183 = vmatprep.mubr.msk.f32.mxu1 %vm2678_vm14, %v3018_v52  ;;  %v825_v61 = vmul.f32 %v5817_v54, %v789_v16  ;;  %v864_v52 = vadd.f32 %v5836_v17, %v828_v34  ;;  %v868_v49 = vadd.f32 %v5836_v17, %v832_v32  ;;  %v834_v9 = vmul.f32 %v5817_v54, %v798_v57 }
 0x335   : > { %4184 = vmatmul.mubr.msk.f32.gmra.mxu1 %vm2678_vm14, %v3019_v11  ;;  %945 = vadd.xlane.f32.xlu1 %v892_v23  ;;  %v891_v14 = vsel %vm6179_vm15, %v859_v8, 0.0  ;;  %v630_v60 = vpop.permute.xlu1 %629  ;;  %vm6256_vm15 = vmand %vm694_vm8, %vm730_vm10 }
 0x336   : > { %943 = vadd.xlane.f32.xlu0 %v891_v14  ;;  %vm691_vm6 = vcmp.le.f32.partialorder %v5803_v41, %v630_v60  ;;  %v791_v4 = vsub.f32 %v630_v60, %v5803_v41  ;;  %vm727_vm5 = vcmp.lt.f32.partialorder %v630_v60, %v5812_v13  ;;  %v861_v26 = vadd.f32 %v5836_v17, %v825_v61 }
 0x337   : > { %vm6241_vm11 = vmand %vm691_vm6, %vm727_vm5  ;;  %v896_v12 = vsel %vm6226_vm9, %v864_v52, 0.0  ;;  %v898_v1 = vsel %vm6256_vm15, %v866_v45, 0.0  ;;  %vm734_vm5 = vcmp.lt.f32.partialorder %v665_v24, %v5812_v13  ;;  %v870_v19 = vadd.f32 %v5836_v17, %v834_v9 }
 0x338   : > { %v827_v44 = vmul.f32 %v5817_v54, %v791_v4  ;;  %v893_v0 = vsel %vm6210_vm7, %v861_v26, 0.0  ;;  %vm764_vm6 = vmand %vm696_vm0, %vm732_vm1  ;;  %vm698_vm7 = vcmp.le.f32.partialorder %v5803_v41, %v665_v24 }
 0x339   : > { %949 = vadd.xlane.f32.xlu1 %v894_v43  ;;  %v640_v11 = vpop.permute.xlu1 %639  ;;  %v900_v58 = vsel %vm764_vm6, %v868_v49, 0.0 }
 0x33a   : > { %947 = vadd.xlane.f32.xlu0 %v893_v0  ;;  %v793_v56 = vsub.f32 %v640_v11, %v5803_v41  ;;  %v863_v48 = vadd.f32 %v5836_v17, %v827_v44  ;;  %vm693_vm12 = vcmp.le.f32.partialorder %v5803_v41, %v640_v11  ;;  %vm729_vm13 = vcmp.lt.f32.partialorder %v640_v11, %v5812_v13  ;;  %v6317_v11 = vld [vmem:[%s6600_s8] ss:$0 sm:$0xff] }
 0x33b   : > { %vm761_vm2 = vmand %vm693_vm12, %vm729_vm13  ;;  %vm3435_vm13 = vcmask 130048  }
 0x33c   : > { %v829_v15 = vmul.f32 %v5817_v54, %v793_v56  ;;  %v895_v63 = vsel %vm6241_vm11, %v863_v48, 0.0  ;;  %vm766_vm11 = vmand %vm698_vm7, %vm734_vm5 }
 0x33d   : > { %953 = vadd.xlane.f32.xlu1 %v896_v12  ;;  %v650_v59 = vpop.permute.xlu1 %649  ;;  %v902_v3 = vsel %vm766_vm11, %v870_v19, 0.0 }
 0x33e   : > { %951 = vadd.xlane.f32.xlu0 %v895_v63  ;;  %v795_v21 = vsub.f32 %v650_v59, %v5803_v41  ;;  %v865_v39 = vadd.f32 %v5836_v17, %v829_v15  ;;  %vm695_vm3 = vcmp.le.f32.partialorder %v5803_v41, %v650_v59  ;;  %vm731_vm4 = vcmp.lt.f32.partialorder %v650_v59, %v5812_v13 }
 0x33f   : > { %vm763_vm8 = vmand %vm695_vm3, %vm731_vm4 }
 0x340   : > { %v831_v62 = vmul.f32 %v5817_v54, %v795_v21  ;;  %v897_v20 = vsel %vm761_vm2, %v865_v39, 0.0 }
 0x341   : > { %v4132_v28 = vpop.f32.mrf.mxu1  ;;  %957 = vadd.xlane.f32.xlu1 %v898_v1  ;;  %v660_v27 = vpop.permute.xlu1 %659 }
 0x342   : > { %v2947_v38 = vadd.f32 %v4132_v28, %v5790_v37  ;;  %955 = vadd.xlane.f32.xlu0 %v897_v20  ;;  %v797_v51 = vsub.f32 %v660_v27, %v5803_v41  ;;  %v867_v10 = vadd.f32 %v5836_v17, %v831_v62  ;;  %vm697_vm9 = vcmp.le.f32.partialorder %v5803_v41, %v660_v27 }
 0x343   : > { %v2941_v36 = vpop.f32.mrf.mxu1  ;;  %vm733_vm10 = vcmp.lt.f32.partialorder %v660_v27, %v5812_v13 }
 0x344   : > { %v2942_v46 = vadd.f32 %v5790_v37, %v2941_v36  ;;  %v3021_v7 = vmax.f32 %v2947_v38, 0.0  ;;  %v833_v53 = vmul.f32 %v5817_v54, %v797_v51  ;;  %v899_v2 = vsel %vm763_vm8, %v867_v10, 0.0  ;;  %vm765_vm12 = vmand %vm697_vm9, %vm733_vm10 }
 0x345   : > { %961 = vadd.xlane.f32.xlu1 %v900_v58 }
 0x346   : > { %v3020_v33 = vmax.f32 %v2942_v46, 0.0  ;;  %959 = vadd.xlane.f32.xlu0 %v899_v2  ;;  %v869_v16 = vadd.f32 %v5836_v17, %v833_v53 }
 0x348   : > { %4186 = vmatprep.mubr.msk.f32.mxu1 %vm2678_vm14, %v3020_v33  ;;  %v901_v5 = vsel %vm765_vm12, %v869_v16, 0.0  ;;  %v6324_v33 = vld [vmem:[%s6601_s9] ss:$0 sm:$0xff] }
 0x349   : > { %4187 = vmatmul.mubr.msk.f32.gmra.mxu1 %vm2678_vm14, %v3021_v7  ;;  %965 = vadd.xlane.f32.xlu1 %v902_v3 }
 0x34a   : > { %963 = vadd.xlane.f32.xlu0 %v901_v5 }
 0x364   : > { %v4135_v18 = vpop.f32.mrf.mxu1 }
 0x365   : > { %v2957_v41 = vadd.f32 %v4135_v18, %v5790_v37 }
 0x366   : > { %v2951_v23 = vpop.f32.mrf.mxu1 }
 0x367   : > { %v2952_v13 = vadd.f32 %v5790_v37, %v2951_v23  ;;  %v3023_v8 = vmax.f32 %v2957_v41, 0.0 }
 0x369   : > { %v3022_v54 = vmax.f32 %v2952_v13, 0.0 }
 0x36b   : > { %4189 = vmatprep.mubr.msk.f32.mxu1 %vm2678_vm14, %v3022_v54 }
 0x36c   : > { %4190 = vmatmul.mubr.msk.f32.gmra.mxu1 %vm2678_vm14, %v3023_v8 }
 0x37d   : > { %v4138_v61 = vpop.f32.mrf.mxu1 }
 0x37e   : > { %v2967_v25 = vadd.f32 %v4138_v61, %v5790_v37 }
 0x37f   : > { %v2961_v17 = vpop.f32.mrf.mxu1 }
 0x380   : > { %v2962_v22 = vadd.f32 %v5790_v37, %v2961_v17  ;;  %v3025_v60 = vmax.f32 %v2967_v25, 0.0 }
 0x382   : > { %v3024_v14 = vmax.f32 %v2962_v22, 0.0 }
 0x384   : > { %4192 = vmatprep.mubr.msk.f32.mxu1 %vm2678_vm14, %v3024_v14 }
 0x385   : > { %4193 = vmatmul.mubr.msk.f32.gmra.mxu1 %vm2678_vm14, %v3025_v60 }
 0x390   : > { %v4141_v50 = vpop.f32.mrf.mxu1 }
 0x391   : > { %v2977_v28 = vadd.f32 %v4141_v50, %v5790_v37 }
 0x392   : > { %v2971_v34 = vpop.f32.mrf.mxu1 }
 0x393   : > { %v2972_v4 = vadd.f32 %v5790_v37, %v2971_v34  ;;  %v3027_v38 = vmax.f32 %v2977_v28, 0.0 }
 0x395   : > { %v3026_v35 = vmax.f32 %v2972_v4, 0.0 }
 0x397   : > { %4195 = vmatprep.mubr.msk.f32.mxu1 %vm2678_vm14, %v3026_v35 }
 0x398   : > { %4196 = vmatmul.mubr.msk.f32.gmra.mxu1 %vm2678_vm14, %v3027_v38 }
 0x3b4   : > { %v4144_v42 = vpop.f32.mrf.mxu1 }
 0x3b5   : > { %v2987_v43 = vadd.f32 %v4144_v42, %v5790_v37 }
 0x3b6   : > { %v2981_v26 = vpop.f32.mrf.mxu1 }
 0x3b7   : > { %v2982_v36 = vadd.f32 %v5790_v37, %v2981_v26  ;;  %v3029_v31 = vmax.f32 %v2987_v43, 0.0 }
 0x3b9   : > { %v3028_v44 = vmax.f32 %v2982_v36, 0.0 }
 0x3bb   : > { %4198 = vmatprep.mubr.msk.f32.mxu1 %vm2678_vm14, %v3028_v44 }
 0x3bc   : > { %4199 = vmatmul.mubr.msk.f32.gmra.mxu1 %vm2678_vm14, %v3029_v31 }
 0x3c8   : > { %v4147_v47 = vpop.f32.mrf.mxu1 }
 0x3c9   : > { %v2997_v46 = vadd.f32 %v4147_v47, %v5790_v37 }
 0x3ca   : > { %v2991_v0 = vpop.f32.mrf.mxu1 }
 0x3cb   : > { %v2992_v52 = vadd.f32 %v5790_v37, %v2991_v0  ;;  %v3031_v7 = vmax.f32 %v2997_v46, 0.0 }
 0x3cc   : > { %v4158_v55 = vpop.f32.mrf.mxu1 }
 0x3cd   : > { %v3030_v56 = vmax.f32 %v2992_v52, 0.0  ;;  %v3211_v29 = vadd.f32 %v4158_v55, %v6317_v11 }
 0x3ce   : > { %v3205_v30 = vpop.f32.mrf.mxu1 }
 0x3cf   : > { %v3365_v12 = vmax.f32 %v3211_v29, 0.0  ;;  %v3206_v48 = vadd.f32 %v6317_v11, %v3205_v30  ;;  %4201 = vmatprep.mubr.msk.f32.mxu1 %vm2678_vm14, %v3030_v56 }
 0x3d0   : > { %v4161_v15 = vpop.f32.mrf.mxu1  ;;  %4202 = vmatmul.mubr.msk.f32.gmra.mxu1 %vm2678_vm14, %v3031_v7  ;;  %vm3564_vm14 = vcmask 7168  }
 0x3d1   : > { %v3404_v37 = vmul.f32 %v6324_v33, %v3365_v12  ;;  %v3364_v40 = vmax.f32 %v3206_v48, 0.0  ;;  %v3221_v6 = vadd.f32 %v4161_v15, %v6317_v11 }
 0x3d2   : > { %v3215_v63 = vpop.f32.mrf.mxu1 }
 0x3d3   : > { %v3403_v59 = vmul.f32 %v6324_v33, %v3364_v40  ;;  %v3367_v45 = vmax.f32 %v3221_v6, 0.0  ;;  %v3216_v32 = vadd.f32 %v6317_v11, %v3215_v63  ;;  %v3439_v21 = vsel %vm3435_vm13, %v3404_v37, 0.0 }
 0x3d4   : > { %3440 = vadd.xlane.f32.xlu1 %v3439_v21  ;;  %v4164_v24 = vpop.f32.mrf.mxu1 }
 0x3d5   : > { %v3406_v1 = vmul.f32 %v6324_v33, %v3367_v45  ;;  %v3366_v39 = vmax.f32 %v3216_v32, 0.0  ;;  %v3231_v57 = vadd.f32 %v4164_v24, %v6317_v11  ;;  %v3436_v49 = vsel %vm3435_vm13, %v3403_v59, 0.0 }
 0x3d6   : > { %v3225_v62 = vpop.f32.mrf.mxu1  ;;  %3437 = vadd.xlane.f32.xlu0 %v3436_v49 }
 0x3d7   : > { %v3405_v20 = vmul.f32 %v6324_v33, %v3366_v39  ;;  %v3369_v27 = vmax.f32 %v3231_v57, 0.0  ;;  %v3226_v9 = vadd.f32 %v6317_v11, %v3225_v62  ;;  %v3445_v51 = vsel %vm3435_vm13, %v3406_v1, 0.0 }
 0x3d8   : > { %3446 = vadd.xlane.f32.xlu1 %v3445_v51  ;;  %v4167_v58 = vpop.f32.mrf.mxu1 }
 0x3d9   : > { %v3408_v10 = vmul.f32 %v6324_v33, %v3369_v27  ;;  %v3368_v53 = vmax.f32 %v3226_v9, 0.0  ;;  %v3241_v19 = vadd.f32 %v4167_v58, %v6317_v11  ;;  %v3442_v2 = vsel %vm3435_vm13, %v3405_v20, 0.0 }
 0x3da   : > { %v3235_v3 = vpop.f32.mrf.mxu1  ;;  %3443 = vadd.xlane.f32.xlu0 %v3442_v2 }
 0x3db   : > { %v3407_v16 = vmul.f32 %v6324_v33, %v3368_v53  ;;  %v3371_v5 = vmax.f32 %v3241_v19, 0.0  ;;  %v3236_v18 = vadd.f32 %v6317_v11, %v3235_v3  ;;  %v3451_v41 = vsel %vm3435_vm13, %v3408_v10, 0.0 }
 0x3dc   : > { %3452 = vadd.xlane.f32.xlu1 %v3451_v41  ;;  %v4170_v23 = vpop.f32.mrf.mxu1 }
 0x3dd   : > { %v3410_v13 = vmul.f32 %v6324_v33, %v3371_v5  ;;  %v3370_v54 = vmax.f32 %v3236_v18, 0.0  ;;  %v3251_v8 = vadd.f32 %v4170_v23, %v6317_v11  ;;  %v3448_v61 = vsel %vm3435_vm13, %v3407_v16, 0.0 }
 0x3de   : > { %v3245_v25 = vpop.f32.mrf.mxu1  ;;  %3449 = vadd.xlane.f32.xlu0 %v3448_v61 }
 0x3df   : > { %v3409_v17 = vmul.f32 %v6324_v33, %v3370_v54  ;;  %v3373_v22 = vmax.f32 %v3251_v8, 0.0  ;;  %v3246_v14 = vadd.f32 %v6317_v11, %v3245_v25  ;;  %v3457_v60 = vsel %vm3435_vm13, %v3410_v13, 0.0  ;;  %v6386_v8 = vpop.xlane.xlu1 %903  ;;  %v6389_v25 = vpop.xlane.xlu0 %905 }
 0x3e0   : > { %3458 = vadd.xlane.f32.xlu1 %v3457_v60  ;;  %v4173_v50 = vpop.f32.mrf.mxu1 }
 0x3e1   : > { %v3412_v28 = vmul.f32 %v6324_v33, %v3373_v22  ;;  %v3372_v34 = vmax.f32 %v3246_v14, 0.0  ;;  %v3261_v4 = vadd.f32 %v4173_v50, %v6317_v11  ;;  %v3454_v35 = vsel %vm3435_vm13, %v3409_v17, 0.0 }
 0x3e2   : > { %v3255_v38 = vpop.f32.mrf.mxu1  ;;  %3455 = vadd.xlane.f32.xlu0 %v3454_v35 }
 0x3e3   : > { %v3411_v42 = vmul.f32 %v6324_v33, %v3372_v34  ;;  %v3375_v43 = vmax.f32 %v3261_v4, 0.0  ;;  %v3256_v26 = vadd.f32 %v6317_v11, %v3255_v38  ;;  %v3463_v36 = vsel %vm3435_vm13, %v3412_v28, 0.0  ;;  %v6391_v17 = vpop.xlane.xlu1 %909  ;;  %v6393_v22 = vpop.xlane.xlu0 %907 }
 0x3e4   : > { %3464 = vadd.xlane.f32.xlu1 %v3463_v36  ;;  %v4176_v44 = vpop.f32.mrf.mxu1 }
 0x3e5   : > { %v3414_v31 = vmul.f32 %v6324_v33, %v3375_v43  ;;  %v3374_v47 = vmax.f32 %v3256_v26, 0.0  ;;  %v3271_v46 = vadd.f32 %v4176_v44, %v6317_v11  ;;  %v3460_v0 = vsel %vm3435_vm13, %v3411_v42, 0.0 }
 0x3e6   : > { %v3265_v52 = vpop.f32.mrf.mxu1  ;;  %3461 = vadd.xlane.f32.xlu0 %v3460_v0 }
 0x3e7   : > { %v3413_v55 = vmul.f32 %v6324_v33, %v3374_v47  ;;  %v3377_v56 = vmax.f32 %v3271_v46, 0.0  ;;  %v3266_v29 = vadd.f32 %v6317_v11, %v3265_v52  ;;  %v3469_v7 = vsel %vm3435_vm13, %v3414_v31, 0.0  ;;  %v6395_v60 = vpop.xlane.xlu1 %913  ;;  %v6398_v34 = vpop.xlane.xlu0 %911 }
 0x3e8   : > { %3470 = vadd.xlane.f32.xlu1 %v3469_v7  ;;  %v4179_v30 = vpop.f32.mrf.mxu1 }
 0x3e9   : > { %v3416_v12 = vmul.f32 %v6324_v33, %v3377_v56  ;;  %v3376_v48 = vmax.f32 %v3266_v29, 0.0  ;;  %v3281_v15 = vadd.f32 %v4179_v30, %v6317_v11  ;;  %v3466_v37 = vsel %vm3435_vm13, %v3413_v55, 0.0 }
 0x3ea   : > { %v3275_v40 = vpop.f32.mrf.mxu1  ;;  %3467 = vadd.xlane.f32.xlu0 %v3466_v37 }
 0x3eb   : > { %v3415_v6 = vmul.f32 %v6324_v33, %v3376_v48  ;;  %v3379_v63 = vmax.f32 %v3281_v15, 0.0  ;;  %v3276_v59 = vadd.f32 %v6317_v11, %v3275_v40  ;;  %v3475_v45 = vsel %vm3435_vm13, %v3416_v12, 0.0  ;;  %v6402_v43 = vpop.xlane.xlu1 %917  ;;  %v6406_v44 = vpop.xlane.xlu0 %915 }
 0x3ec   : > { %3476 = vadd.xlane.f32.xlu1 %v3475_v45  ;;  %v4182_v32 = vpop.f32.mrf.mxu1 }
 0x3ed   : > { %v3418_v21 = vmul.f32 %v6324_v33, %v3379_v63  ;;  %v3378_v24 = vmax.f32 %v3276_v59, 0.0  ;;  %v3291_v1 = vadd.f32 %v4182_v32, %v6317_v11  ;;  %v3472_v39 = vsel %vm3435_vm13, %v3415_v6, 0.0 }
 0x3ee   : > { %v3285_v57 = vpop.f32.mrf.mxu1  ;;  %3473 = vadd.xlane.f32.xlu0 %v3472_v39 }
 0x3ef   : > { %v3417_v49 = vmul.f32 %v6324_v33, %v3378_v24  ;;  %v3381_v62 = vmax.f32 %v3291_v1, 0.0  ;;  %v3286_v20 = vadd.f32 %v6317_v11, %v3285_v57  ;;  %v3481_v27 = vsel %vm3435_vm13, %v3418_v21, 0.0  ;;  %v6409_v47 = vpop.xlane.xlu1 %921  ;;  %v6411_v46 = vpop.xlane.xlu0 %919 }
 0x3f0   : > { %3482 = vadd.xlane.f32.xlu1 %v3481_v27 }
 0x3f1   : > { %v3420_v9 = vmul.f32 %v6324_v33, %v3381_v62  ;;  %v3380_v51 = vmax.f32 %v3286_v20, 0.0  ;;  %v3478_v58 = vsel %vm3435_vm13, %v3417_v49, 0.0 }
 0x3f2   : > { %3479 = vadd.xlane.f32.xlu0 %v3478_v58 }
 0x3f3   : > { %v3419_v10 = vmul.f32 %v6324_v33, %v3380_v51  ;;  %v3487_v53 = vsel %vm3435_vm13, %v3420_v9, 0.0  ;;  %v6413_v0 = vpop.xlane.xlu1 %925  ;;  %v6415_v52 = vpop.xlane.xlu0 %923 }
 0x3f4   : > { %3488 = vadd.xlane.f32.xlu1 %v3487_v53 }
 0x3f5   : > { %v4185_v19 = vpop.f32.mrf.mxu1  ;;  %v3484_v2 = vsel %vm3435_vm13, %v3419_v10, 0.0 }
 0x3f6   : > { %v3301_v3 = vadd.f32 %v4185_v19, %v6317_v11  ;;  %3485 = vadd.xlane.f32.xlu0 %v3484_v2 }
 0x3f7   : > { %v3295_v16 = vpop.f32.mrf.mxu1  ;;  %v6417_v55 = vpop.xlane.xlu1 %929 }
 0x3f8   : > { %v3383_v5 = vmax.f32 %v3301_v3, 0.0  ;;  %v3296_v18 = vadd.f32 %v6317_v11, %v3295_v16  ;;  %v6419_v56 = vpop.xlane.xlu0 %927 }
 0x3fa   : > { %v3422_v41 = vmul.f32 %v6324_v33, %v3383_v5  ;;  %v3382_v23 = vmax.f32 %v3296_v18, 0.0 }
 0x3fb   : > { %v6421_v29 = vpop.xlane.xlu1 %933 }
 0x3fc   : > { %v3421_v13 = vmul.f32 %v6324_v33, %v3382_v23  ;;  %v3493_v54 = vsel %vm3435_vm13, %v3422_v41, 0.0  ;;  %v6423_v7 = vpop.xlane.xlu0 %931 }
 0x3fd   : > { %3494 = vadd.xlane.f32.xlu1 %v3493_v54 }
 0x3fe   : > { %v3490_v61 = vsel %vm3435_vm13, %v3421_v13, 0.0 }
 0x3ff   : > { %3491 = vadd.xlane.f32.xlu0 %v3490_v61  ;;  %v6426_v48 = vpop.xlane.xlu1 %937 }
 0x400   : > { %v6429_v6 = vpop.xlane.xlu0 %935 }
 0x403   : > { %v6434_v21 = vpop.xlane.xlu1 %941 }
 0x404   : > { %v6437_v1 = vpop.xlane.xlu0 %939 }
 0x407   : > { %v6439_v39 = vpop.xlane.xlu1 %945 }
 0x408   : > { %v6441_v57 = vpop.xlane.xlu0 %943 }
 0x409   : > { %v4188_v14 = vpop.f32.mrf.mxu1 }
 0x40a   : > { %v3311_v50 = vadd.f32 %v4188_v14, %v6317_v11 }
 0x40b   : > { %v3305_v28 = vpop.f32.mrf.mxu1  ;;  %v6443_v49 = vpop.xlane.xlu1 %949 }
 0x40c   : > { %v3385_v4 = vmax.f32 %v3311_v50, 0.0  ;;  %v3306_v35 = vadd.f32 %v6317_v11, %v3305_v28  ;;  %v6445_v62 = vpop.xlane.xlu0 %947 }
 0x40e   : > { %v3424_v38 = vmul.f32 %v6324_v33, %v3385_v4  ;;  %v3384_v42 = vmax.f32 %v3306_v35, 0.0 }
 0x40f   : > { %v6447_v27 = vpop.xlane.xlu1 %953 }
 0x410   : > { %v3423_v26 = vmul.f32 %v6324_v33, %v3384_v42  ;;  %v3499_v36 = vsel %vm3435_vm13, %v3424_v38, 0.0  ;;  %v6450_v58 = vpop.xlane.xlu0 %951 }
 0x411   : > { %3500 = vadd.xlane.f32.xlu1 %v3499_v36 }
 0x412   : > { %v3496_v31 = vsel %vm3435_vm13, %v3423_v26, 0.0 }
 0x413   : > { %3497 = vadd.xlane.f32.xlu0 %v3496_v31  ;;  %v6454_v3 = vpop.xlane.xlu1 %957 }
 0x414   : > { %v6458_v18 = vpop.xlane.xlu0 %955 }
 0x417   : > { %v6461_v23 = vpop.xlane.xlu1 %961 }
 0x418   : > { %v6463_v13 = vpop.xlane.xlu0 %959 }
 0x41b   : > { %v6465_v54 = vpop.xlane.xlu1 %965 }
 0x41c   : > { %v6468_v50 = vpop.xlane.xlu0 %963 }
 0x42c   : > { %v4191_v30 = vpop.f32.mrf.mxu1 }
 0x42d   : > { %v3321_v12 = vadd.f32 %v4191_v30, %v6317_v11 }
 0x42e   : > { %v3315_v15 = vpop.f32.mrf.mxu1 }
 0x42f   : > { %v3387_v37 = vmax.f32 %v3321_v12, 0.0  ;;  %v3316_v40 = vadd.f32 %v6317_v11, %v3315_v15 }
 0x431   : > { %v3426_v63 = vmul.f32 %v6324_v33, %v3387_v37  ;;  %v3386_v59 = vmax.f32 %v3316_v40, 0.0 }
 0x433   : > { %v3425_v45 = vmul.f32 %v6324_v33, %v3386_v59  ;;  %v3505_v32 = vsel %vm3435_vm13, %v3426_v63, 0.0 }
 0x434   : > { %3506 = vadd.xlane.f32.xlu1 %v3505_v32 }
 0x435   : > { %v3502_v24 = vsel %vm3435_vm13, %v3425_v45, 0.0 }
 0x436   : > { %3503 = vadd.xlane.f32.xlu0 %v3502_v24 }
 0x445   : > { %v4194_v20 = vpop.f32.mrf.mxu1 }
 0x446   : > { %v3331_v9 = vadd.f32 %v4194_v20, %v6317_v11 }
 0x447   : > { %v3325_v51 = vpop.f32.mrf.mxu1 }
 0x448   : > { %v3389_v10 = vmax.f32 %v3331_v9, 0.0  ;;  %v3326_v53 = vadd.f32 %v6317_v11, %v3325_v51 }
 0x44a   : > { %v3428_v19 = vmul.f32 %v6324_v33, %v3389_v10  ;;  %v3388_v2 = vmax.f32 %v3326_v53, 0.0 }
 0x44c   : > { %v3427_v16 = vmul.f32 %v6324_v33, %v3388_v2  ;;  %v3511_v5 = vsel %vm3435_vm13, %v3428_v19, 0.0 }
 0x44d   : > { %3512 = vadd.xlane.f32.xlu1 %v3511_v5 }
 0x44e   : > { %v3508_v41 = vsel %vm3435_vm13, %v3427_v16, 0.0 }
 0x44f   : > { %3509 = vadd.xlane.f32.xlu0 %v3508_v41 }
 0x458   : > { %v4197_v61 = vpop.f32.mrf.mxu1 }
 0x459   : > { %v3341_v14 = vadd.f32 %v4197_v61, %v6317_v11 }
 0x45a   : > { %v3335_v28 = vpop.f32.mrf.mxu1 }
 0x45b   : > { %v3391_v4 = vmax.f32 %v3341_v14, 0.0  ;;  %v3336_v35 = vadd.f32 %v6317_v11, %v3335_v28 }
 0x45d   : > { %v3430_v38 = vmul.f32 %v6324_v33, %v3391_v4  ;;  %v3390_v42 = vmax.f32 %v3336_v35, 0.0  ;;  %v3441_v26 = vpop.xlane.xlu1 %3440 }
 0x45e   : > { %v3533_v36 = vadd.f32 %v3441_v26, %v6389_v25 }
 0x45f   : > { %v3429_v31 = vmul.f32 %v6324_v33, %v3390_v42  ;;  %v3438_v30 = vpop.xlane.xlu0 %3437  ;;  %v3517_v12 = vsel %vm3435_vm13, %v3430_v38, 0.0 }
 0x460   : > { %3566 = vst.msk [vmem:[%s6476_s22 + $0x8] sm:$0xff] %vm3564_vm14, %v3533_v36  ;;  %v3532_v15 = vadd.f32 %v3438_v30, %v6386_v8  ;;  %3518 = vadd.xlane.f32.xlu1 %v3517_v12 }
 0x461   : > { %v3447_v37 = vpop.xlane.xlu1 %3446  ;;  %v3514_v40 = vsel %vm3435_vm13, %v3429_v31, 0.0 }
 0x462   : > { %3565 = vst.msk [vmem:[%s6476_s22] sm:$0xff] %vm3564_vm14, %v3532_v15  ;;  %v3535_v25 = vadd.f32 %v3447_v37, %v6391_v17  ;;  %3515 = vadd.xlane.f32.xlu0 %v3514_v40 }
 0x463   : > { %v3444_v63 = vpop.xlane.xlu0 %3443 }
 0x464   : > { %3568 = vst.msk [vmem:[%s6476_s22 + $0x18] sm:$0xff] %vm3564_vm14, %v3535_v25  ;;  %v3534_v59 = vadd.f32 %v3444_v63, %v6393_v22 }
 0x465   : > { %v3453_v45 = vpop.xlane.xlu1 %3452 }
 0x466   : > { %3567 = vst.msk [vmem:[%s6476_s22 + $0x10] sm:$0xff] %vm3564_vm14, %v3534_v59  ;;  %v3537_v8 = vadd.f32 %v3453_v45, %v6395_v60 }
 0x467   : > { %v3450_v32 = vpop.xlane.xlu0 %3449 }
 0x468   : > { %3570 = vst.msk [vmem:[%s6476_s22 + $0x28] sm:$0xff] %vm3564_vm14, %v3537_v8  ;;  %v3536_v24 = vadd.f32 %v3450_v32, %v6398_v34 }
 0x469   : > { %v3459_v17 = vpop.xlane.xlu1 %3458 }
 0x46a   : > { %3569 = vst.msk [vmem:[%s6476_s22 + $0x20] sm:$0xff] %vm3564_vm14, %v3536_v24  ;;  %v3539_v20 = vadd.f32 %v3459_v17, %v6402_v43 }
 0x46b   : > { %v3456_v9 = vpop.xlane.xlu0 %3455 }
 0x46c   : > { %3572 = vst.msk [vmem:[%s6476_s22 + $0x38] sm:$0xff] %vm3564_vm14, %v3539_v20  ;;  %v3538_v22 = vadd.f32 %v3456_v9, %v6406_v44 }
 0x46d   : > { %v3465_v51 = vpop.xlane.xlu1 %3464 }
 0x46e   : > { %3571 = vst.msk [vmem:[%s6476_s22 + $0x30] sm:$0xff] %vm3564_vm14, %v3538_v22  ;;  %v3541_v60 = vadd.f32 %v3465_v51, %v6409_v47 }
 0x46f   : > { %v3462_v10 = vpop.xlane.xlu0 %3461 }
 0x470   : > { %3574 = vst.msk [vmem:[%s6476_s22 + $0x48] sm:$0xff] %vm3564_vm14, %v3541_v60  ;;  %v3540_v34 = vadd.f32 %v3462_v10, %v6411_v46 }
 0x471   : > { %v3471_v53 = vpop.xlane.xlu1 %3470 }
 0x472   : > { %3573 = vst.msk [vmem:[%s6476_s22 + $0x40] sm:$0xff] %vm3564_vm14, %v3540_v34  ;;  %v3543_v43 = vadd.f32 %v3471_v53, %v6413_v0 }
 0x473   : > { %v3468_v19 = vpop.xlane.xlu0 %3467 }
 0x474   : > { %3576 = vst.msk [vmem:[%s6476_s22 + $0x58] sm:$0xff] %vm3564_vm14, %v3543_v43  ;;  %v3542_v44 = vadd.f32 %v3468_v19, %v6415_v52 }
 0x475   : > { %v3477_v2 = vpop.xlane.xlu1 %3476 }
 0x476   : > { %3575 = vst.msk [vmem:[%s6476_s22 + $0x50] sm:$0xff] %vm3564_vm14, %v3542_v44  ;;  %v3545_v47 = vadd.f32 %v3477_v2, %v6417_v55 }
 0x477   : > { %v3474_v16 = vpop.xlane.xlu0 %3473 }
 0x478   : > { %3578 = vst.msk [vmem:[%s6476_s22 + $0x68] sm:$0xff] %vm3564_vm14, %v3545_v47  ;;  %v3544_v46 = vadd.f32 %v3474_v16, %v6419_v56 }
 0x479   : > { %v3483_v5 = vpop.xlane.xlu1 %3482 }
 0x47a   : > { %3577 = vst.msk [vmem:[%s6476_s22 + $0x60] sm:$0xff] %vm3564_vm14, %v3544_v46  ;;  %v3547_v0 = vadd.f32 %v3483_v5, %v6421_v29 }
 0x47b   : > { %v3480_v41 = vpop.xlane.xlu0 %3479 }
 0x47c   : > { %3580 = vst.msk [vmem:[%s6476_s22 + $0x78] sm:$0xff] %vm3564_vm14, %v3547_v0  ;;  %v3546_v52 = vadd.f32 %v3480_v41, %v6423_v7  ;;  %v4200_v61 = vpop.f32.mrf.mxu1 }
 0x47d   : > { %v3351_v55 = vadd.f32 %v4200_v61, %v6317_v11  ;;  %v3489_v14 = vpop.xlane.xlu1 %3488 }
 0x47e   : > { %3579 = vst.msk [vmem:[%s6476_s22 + $0x70] sm:$0xff] %vm3564_vm14, %v3546_v52  ;;  %v3549_v56 = vadd.f32 %v3489_v14, %v6426_v48  ;;  %v3345_v28 = vpop.f32.mrf.mxu1 }
 0x47f   : > { %v3393_v4 = vmax.f32 %v3351_v55, 0.0  ;;  %v3346_v35 = vadd.f32 %v6317_v11, %v3345_v28  ;;  %v3486_v29 = vpop.xlane.xlu0 %3485 }
 0x480   : > { %3582 = vst.msk [vmem:[%s6476_s22 + $0x88] sm:$0xff] %vm3564_vm14, %v3549_v56  ;;  %v3548_v38 = vadd.f32 %v3486_v29, %v6429_v6 }
 0x481   : > { %v3432_v7 = vmul.f32 %v6324_v33, %v3393_v4  ;;  %v3392_v42 = vmax.f32 %v3346_v35, 0.0 }
 0x482   : > { %3581 = vst.msk [vmem:[%s6476_s22 + $0x80] sm:$0xff] %vm3564_vm14, %v3548_v38 }
 0x483   : > { %v3431_v26 = vmul.f32 %v6324_v33, %v3392_v42  ;;  %v3523_v48 = vsel %vm3435_vm13, %v3432_v7, 0.0 }
 0x484   : > { %3524 = vadd.xlane.f32.xlu1 %v3523_v48 }
 0x485   : > { %v3520_v36 = vsel %vm3435_vm13, %v3431_v26, 0.0 }
 0x486   : > { %3521 = vadd.xlane.f32.xlu0 %v3520_v36  ;;  %v3495_v31 = vpop.xlane.xlu1 %3494 }
 0x487   : > { %v3551_v30 = vadd.f32 %v3495_v31, %v6434_v21 }
 0x488   : > { %v3492_v12 = vpop.xlane.xlu0 %3491 }
 0x489   : > { %3584 = vst.msk [vmem:[%s6476_s22 + $0x98] sm:$0xff] %vm3564_vm14, %v3551_v30  ;;  %v3550_v6 = vadd.f32 %v3492_v12, %v6437_v1 }
 0x48b   : > { %3583 = vst.msk [vmem:[%s6476_s22 + $0x90] sm:$0xff] %vm3564_vm14, %v3550_v6 }
 0x490   : > { %v4203_v15 = vpop.f32.mrf.mxu1 }
 0x491   : > { %v3361_v37 = vadd.f32 %v4203_v15, %v6317_v11 }
 0x492   : > { %v3355_v40 = vpop.f32.mrf.mxu1 }
 0x493   : > { %v3395_v25 = vmax.f32 %v3361_v37, 0.0  ;;  %v3356_v63 = vadd.f32 %v6317_v11, %v3355_v40 }
 0x495   : > { %v3434_v59 = vmul.f32 %v6324_v33, %v3395_v25  ;;  %v3394_v21 = vmax.f32 %v3356_v63, 0.0 }
 0x497   : > { %v3433_v45 = vmul.f32 %v6324_v33, %v3394_v21  ;;  %v3529_v1 = vsel %vm3435_vm13, %v3434_v59, 0.0 }
 0x498   : > { %3530 = vadd.xlane.f32.xlu1 %v3529_v1 }
 0x499   : > { %v3526_v8 = vsel %vm3435_vm13, %v3433_v45, 0.0 }
 0x49a   : > { %v3501_v32 = vpop.xlane.xlu1 %3500  ;;  %3527 = vadd.xlane.f32.xlu0 %v3526_v8 }
 0x49b   : > { %v3553_v24 = vadd.f32 %v3501_v32, %v6439_v39 }
 0x49c   : > { %v3498_v17 = vpop.xlane.xlu0 %3497 }
 0x49d   : > { %3586 = vst.msk [vmem:[%s6476_s22 + $0xa8] sm:$0xff] %vm3564_vm14, %v3553_v24  ;;  %v3552_v11 = vadd.f32 %v3498_v17, %v6441_v57 }
 0x49f   : > { %3585 = vst.msk [vmem:[%s6476_s22 + $0xa0] sm:$0xff] %vm3564_vm14, %v3552_v11 }
 0x4bd   : > { %v3507_v33 = vpop.xlane.xlu1 %3506 }
 0x4be   : > { %v3555_v20 = vadd.f32 %v3507_v33, %v6443_v49 }
 0x4bf   : > { %v3504_v9 = vpop.xlane.xlu0 %3503 }
 0x4c0   : > { %3588 = vst.msk [vmem:[%s6476_s22 + $0xb8] sm:$0xff] %vm3564_vm14, %v3555_v20  ;;  %v3554_v22 = vadd.f32 %v3504_v9, %v6445_v62 }
 0x4c2   : > { %3587 = vst.msk [vmem:[%s6476_s22 + $0xb0] sm:$0xff] %vm3564_vm14, %v3554_v22 }
 0x4d6   : > { %v3513_v39 = vpop.xlane.xlu1 %3512 }
 0x4d7   : > { %v3557_v51 = vadd.f32 %v3513_v39, %v6447_v27 }
 0x4d8   : > { %v3510_v57 = vpop.xlane.xlu0 %3509 }
 0x4d9   : > { %3590 = vst.msk [vmem:[%s6476_s22 + $0xc8] sm:$0xff] %vm3564_vm14, %v3557_v51  ;;  %v3556_v60 = vadd.f32 %v3510_v57, %v6450_v58 }
 0x4db   : > { %3589 = vst.msk [vmem:[%s6476_s22 + $0xc0] sm:$0xff] %vm3564_vm14, %v3556_v60 }
 0x4e9   : > { %v3519_v49 = vpop.xlane.xlu1 %3518 }
 0x4ea   : > { %v3559_v10 = vadd.f32 %v3519_v49, %v6454_v3 }
 0x4eb   : > { %v3516_v62 = vpop.xlane.xlu0 %3515 }
 0x4ec   : > { %3592 = vst.msk [vmem:[%s6476_s22 + $0xd8] sm:$0xff] %vm3564_vm14, %v3559_v10  ;;  %v3558_v34 = vadd.f32 %v3516_v62, %v6458_v18 }
 0x4ee   : > { %3591 = vst.msk [vmem:[%s6476_s22 + $0xd0] sm:$0xff] %vm3564_vm14, %v3558_v34 }
 0x50d   : > { %v3525_v27 = vpop.xlane.xlu1 %3524 }
 0x50e   : > { %v3561_v53 = vadd.f32 %v3525_v27, %v6461_v23 }
 0x50f   : > { %v3522_v43 = vpop.xlane.xlu0 %3521 }
 0x510   : > { %3594 = vst.msk [vmem:[%s6476_s22 + $0xe8] sm:$0xff] %vm3564_vm14, %v3561_v53  ;;  %v3560_v58 = vadd.f32 %v3522_v43, %v6463_v13 }
 0x512   : > { %3593 = vst.msk [vmem:[%s6476_s22 + $0xe0] sm:$0xff] %vm3564_vm14, %v3560_v58 }
 0x521   : > { %v3531_v19 = vpop.xlane.xlu1 %3530 }
 0x522   : > { %v3563_v3 = vadd.f32 %v3531_v19, %v6465_v54 }
 0x523   : > { %v3528_v44 = vpop.xlane.xlu0 %3527 }
 0x524   : > { %3596 = vst.msk [vmem:[%s6476_s22 + $0xf8] sm:$0xff] %vm3564_vm14, %v3563_v3  ;;  %v3562_v18 = vadd.f32 %v3528_v44, %v6468_v50 }
 0x526   : > { %3595 = vst.msk [vmem:[%s6476_s22 + $0xf0] sm:$0xff] %vm3564_vm14, %v3562_v18 }
 0x527 PF: > { %s21_s13 = sadd.s32 1, %s4354_s13  }
 0x528   : > { %p18_p1 = scmp.ge.s32.totalorder %s21_s13, 4  }
 0x52a   :  { %20 = sbr.rel (!%p18_p1) target bundleno = 1 (0x1), region = 98 }
 0x52f   :  { %3619 = vsyncpa [#allocation3], 1 }
 0x530   :  { %3621 = vsyncpa [#allocation3 + $0x1], 1 }

</bundles_post_ra>
